<compile_context>
chip_gen: v7x
topology: tpu7x:2x2x1
jax: 0.10.0
libtpu: 0.0.40
codegen_flags: <defaults>
</compile_context>

<pallas_src>
import numpy as np
import jax
import jax.numpy as jnp
from jax.experimental import pallas as pl
from jax.experimental.pallas import tpu as pltpu


_MSSSIM_WEIGHTS = (0.0448, 0.2856, 0.3001, 0.2363, 0.1333)
_MIN_PALLAS_SPATIAL = 32   # levels smaller than this run in plain jnp (launch overhead)


# ------------------------------ gaussian window --------------------------------
def _gaussian_1d(window_size, sigma=1.5):
    """Matches the reference `gaussian(window_size, sigma)` (center = window_size//2)."""
    xs = np.arange(window_size, dtype=np.float64)
    g = np.exp(-((xs - window_size // 2) ** 2) / (2.0 * sigma ** 2))
    g = g / g.sum()
    return g.astype(np.float32)


def _valid_filter_matrix(n, win, sigma=1.5):
    """Banded Toeplitz matrix (n-win+1, n): row i holds the gaussian taps at offset i.
    (M @ x)[i] = sum_a g[a] * x[i+a]  == 'valid' cross-correlation, exactly F.conv2d."""
    g = _gaussian_1d(win, sigma)
    no = n - win + 1
    m = np.zeros((no, n), dtype=np.float32)
    for i in range(no):
        m[i, i:i + win] = g
    return m


def _avg_pool_matrix(n):
    """(n//2, n) matrix: out[i] = 0.5*(in[2i] + in[2i+1]); floor semantics (odd tail drop)."""
    m = np.zeros((n // 2, n), dtype=np.float32)
    for i in range(n // 2):
        m[i, 2 * i] = 0.5
        m[i, 2 * i + 1] = 0.5
    return m


# ------------------- fused per-level SSIM Pallas kernel ------------------------
def _make_ssim_level_kernel():
    def kernel(c_ref, x_ref, y_ref, wv_ref, wh_ref, ph_ref, pw_ref,
               ssim_ref, cs_ref, p1_ref, p2_ref, pmax_ref, pmin_ref):
        # c_ref:            SMEM (2,) = [C1, C2]
        # x_ref / y_ref:    (1, 1, H, W) VMEM blocks (one channel plane per grid step)
        # wv_ref / wh_ref:  (Ho, H) / (W, Wo) banded gaussian Toeplitz matrices
        # ph_ref / pw_ref:  (H//2, H) / (W, W//2) 2x2 avg-pool matrices
        # ssim_ref/cs_ref:  (1, 1, 128) lane-dense per-(b,c) partial sums
        # p1_ref/p2_ref:    (1, 1, H//2, W//2) pooled planes for the next pyramid level
        # pmax_ref/pmin_ref:(1, 1, 128) per-(b,c) max/min of pooled img1 (next level's L)
        c1 = c_ref[0]
        c2 = c_ref[1]
        x = x_ref[0, 0]            # (H, W) f32
        y = y_ref[0, 0]
        wv = wv_ref[...]           # (Ho, H)
        wh = wh_ref[...]           # (W, Wo)

        # Separable "valid" gaussian window as two MXU matmuls (vertical, horizontal).
        def gwin(m):
            t = jnp.dot(wv, m, preferred_element_type=jnp.float32)       # (Ho, W)
            return jnp.dot(t, wh, preferred_element_type=jnp.float32)    # (Ho, Wo)

        mu1 = gwin(x)
        mu2 = gwin(y)
        e_x2 = gwin(x * x)
        e_y2 = gwin(y * y)
        e_xy = gwin(x * y)

        mu1_sq = mu1 * mu1
        mu2_sq = mu2 * mu2
        mu1_mu2 = mu1 * mu2
        sigma1_sq = e_x2 - mu1_sq
        sigma2_sq = e_y2 - mu2_sq
        sigma12 = e_xy - mu1_mu2

        v1 = 2.0 * sigma12 + c2
        v2 = sigma1_sq + sigma2_sq + c2
        # Shared EUP reciprocal for both maps (review micro-opt; ~1e-3-relative accurate).
        cs_map = v1 * pl.reciprocal(v2, approx=True)
        ssim_map = cs_map * (2.0 * mu1_mu2 + c1) * pl.reciprocal(
            mu1_sq + mu2_sq + c1, approx=True)

        ssim_ref[...] = jnp.full((1, 1, 128), jnp.sum(ssim_map), dtype=jnp.float32)
        cs_ref[...] = jnp.full((1, 1, 128), jnp.sum(cs_map), dtype=jnp.float32)

        # Fused 2x2 avg-pool for the next pyramid level (also MXU matmuls) plus the
        # next level's dynamic-range statistics of img1 (exact per-level reference math).
        ph = ph_ref[...]           # (H//2, H)
        pw = pw_ref[...]           # (W, W//2)
        p1 = jnp.dot(jnp.dot(ph, x, preferred_element_type=jnp.float32), pw,
                     preferred_element_type=jnp.float32)
        p2 = jnp.dot(jnp.dot(ph, y, preferred_element_type=jnp.float32), pw,
                     preferred_element_type=jnp.float32)
        p1_ref[0, 0] = p1
        p2_ref[0, 0] = p2
        pmax_ref[...] = jnp.full((1, 1, 128), jnp.max(p1), dtype=jnp.float32)
        pmin_ref[...] = jnp.full((1, 1, 128), jnp.min(p1), dtype=jnp.float32)

    return kernel


def _ssim_level_pallas(img1, img2, c1, c2, window_size=11):
    """One pyramid level: (ssim_mean, cs_mean, pooled1, pooled2, pooled1_max, pooled1_min)."""
    B, C, H, W = img1.shape
    win = min(window_size, H, W)            # real_size, as in the reference
    Ho, Wo = H - win + 1, W - win + 1
    H2, W2 = H // 2, W // 2

    wv = jnp.asarray(_valid_filter_matrix(H, win))          # (Ho, H)
    wh = jnp.asarray(_valid_filter_matrix(W, win)).T         # (W, Wo)
    ph = jnp.asarray(_avg_pool_matrix(H))                    # (H2, H)
    pw = jnp.asarray(_avg_pool_matrix(W)).T                  # (W, W2)
    c12 = jnp.stack([c1, c2]).astype(jnp.float32)            # SMEM scalars

    outs = pl.pallas_call(
        _make_ssim_level_kernel(),
        out_shape=(
            jax.ShapeDtypeStruct((B * C, 1, 128), jnp.float32),   # ssim partial sums
            jax.ShapeDtypeStruct((B * C, 1, 128), jnp.float32),   # cs partial sums
            jax.ShapeDtypeStruct((B, C, H2, W2), jnp.float32),    # pooled img1
            jax.ShapeDtypeStruct((B, C, H2, W2), jnp.float32),    # pooled img2
            jax.ShapeDtypeStruct((B * C, 1, 128), jnp.float32),   # max of pooled img1
            jax.ShapeDtypeStruct((B * C, 1, 128), jnp.float32),   # min of pooled img1
        ),
        grid=(B, C),
        in_specs=[
            pl.BlockSpec(memory_space=pltpu.MemorySpace.SMEM),       # [C1, C2]
            pl.BlockSpec((1, 1, H, W), lambda b, c: (b, c, 0, 0)),   # img1 plane
            pl.BlockSpec((1, 1, H, W), lambda b, c: (b, c, 0, 0)),   # img2 plane
            pl.BlockSpec((Ho, H), lambda b, c: (0, 0)),              # W_v
            pl.BlockSpec((W, Wo), lambda b, c: (0, 0)),              # W_h
            pl.BlockSpec((H2, H), lambda b, c: (0, 0)),              # P_h
            pl.BlockSpec((W, W2), lambda b, c: (0, 0)),              # P_w
        ],
        out_specs=(
            pl.BlockSpec((1, 1, 128), lambda b, c: (b * C + c, 0, 0)),
            pl.BlockSpec((1, 1, 128), lambda b, c: (b * C + c, 0, 0)),
            pl.BlockSpec((1, 1, H2, W2), lambda b, c: (b, c, 0, 0)),
            pl.BlockSpec((1, 1, H2, W2), lambda b, c: (b, c, 0, 0)),
            pl.BlockSpec((1, 1, 128), lambda b, c: (b * C + c, 0, 0)),
            pl.BlockSpec((1, 1, 128), lambda b, c: (b * C + c, 0, 0)),
        ),
        compiler_params=pltpu.CompilerParams(
            dimension_semantics=("parallel", "parallel"),
            # Stays well under v7x's 64 MiB physical VMEM; roomy for v5e/v6e (128 MiB).
            vmem_limit_bytes=48 * 1024 * 1024),
    )(c12, img1.astype(jnp.float32), img2.astype(jnp.float32), wv, wh, ph, pw)

    ssim_part, cs_part, pooled1, pooled2, pmax, pmin = outs
    denom = float(B * C * Ho * Wo)
    ssim_mean = jnp.sum(ssim_part[:, 0, 0]) / denom
    cs_mean = jnp.sum(cs_part[:, 0, 0]) / denom
    p1_max = jnp.max(pmax[:, 0, 0])
    p1_min = jnp.min(pmin[:, 0, 0])
    return ssim_mean, cs_mean, pooled1, pooled2, p1_max, p1_min


# ---------------- plain-jnp path for the tiny pyramid levels --------------------
def _ssim_level_jnp(img1, img2, c1, c2, window_size=11):
    B, C, H, W = img1.shape
    win = min(window_size, H, W)
    wv = jnp.asarray(_valid_filter_matrix(H, win))        # (Ho, H)
    whT = jnp.asarray(_valid_filter_matrix(W, win))       # (Wo, W)

    def gwin(m):
        t = jnp.einsum('oh,bchw->bcow', wv, m)
        return jnp.einsum('bcow,qw->bcoq', t, whT)

    img1 = img1.astype(jnp.float32)
    img2 = img2.astype(jnp.float32)
    mu1 = gwin(img1)
    mu2 = gwin(img2)
    mu1_sq = mu1 * mu1
    mu2_sq = mu2 * mu2
    mu1_mu2 = mu1 * mu2
    sigma1_sq = gwin(img1 * img1) - mu1_sq
    sigma2_sq = gwin(img2 * img2) - mu2_sq
    sigma12 = gwin(img1 * img2) - mu1_mu2

    v1 = 2.0 * sigma12 + c2
    v2 = sigma1_sq + sigma2_sq + c2
    cs_map = v1 / v2
    ssim_map = ((2.0 * mu1_mu2 + c1) * v1) / ((mu1_sq + mu2_sq + c1) * v2)
    return jnp.mean(ssim_map), jnp.mean(cs_map)


def _avg_pool_2x2(x):
    """F.avg_pool2d(x, (2, 2)) for NCHW, floor output size."""
    B, C, H, W = x.shape
    He, We = (H // 2) * 2, (W // 2) * 2
    xr = x[:, :, :He, :We].reshape(B, C, He // 2, 2, We // 2, 2)
    return xr.mean(axis=(3, 5))


# ------------------------------- MS-SSIM glue ------------------------------------
def msssim(img1, img2, window_size=11, val_range=None, normalize=False):
    weights = jnp.asarray(_MSSSIM_WEIGHTS, jnp.float32)
    levels = len(_MSSSIM_WEIGHTS)
    mssim, mcs = [], []

    if val_range is None:
        # Level-0 dynamic range from img1; deeper levels reuse the max/min the fused
        # kernel computed on the pooled image (exact per-level reference semantics
        # without re-reading the images from HBM).
        cur_max = jnp.max(img1)
        cur_min = jnp.min(img1)

    for lvl in range(levels):
        if val_range is None:
            max_val = jnp.where(cur_max > 128.0, 255.0, 1.0)
            min_val = jnp.where(cur_min < -0.5, -1.0, 0.0)
            L = max_val - min_val
        else:
            L = jnp.asarray(val_range, jnp.float32)
        c1 = (0.01 * L) ** 2
        c2 = (0.03 * L) ** 2

        _, _, H, W = img1.shape
        last = (lvl == levels - 1)
        if min(H, W) >= _MIN_PALLAS_SPATIAL:
            sim, cs, nxt1, nxt2, nmax, nmin = _ssim_level_pallas(
                img1, img2, c1, c2, window_size)
        else:
            sim, cs = _ssim_level_jnp(img1, img2, c1, c2, window_size)
            if not last:
                nxt1 = _avg_pool_2x2(img1)
                nxt2 = _avg_pool_2x2(img2)
                nmax = jnp.max(nxt1)
                nmin = jnp.min(nxt1)

        mssim.append(sim)
        mcs.append(cs)
        if not last:
            img1, img2 = nxt1, nxt2
            if val_range is None:
                cur_max, cur_min = nmax, nmin

    mssim = jnp.stack(mssim)
    mcs = jnp.stack(mcs)
    if normalize:
        mssim = (mssim + 1.0) / 2.0
        mcs = (mcs + 1.0) / 2.0
    pow1 = mcs ** weights
    pow2 = mssim ** weights
    # Identical to the reference expression: torch.prod(pow1[:-1] * pow2[-1])
    return jnp.prod(pow1[:-1] * pow2[-1])


def msssim_loss(pred, gt, valid=None, boundary_ignore=None):
    """MSSSIMLoss.forward: optional boundary crop, then MS-SSIM of (pred, gt)."""
    # `valid` is accepted but unused, exactly as in the reference MSSSIMLoss.forward.
    if boundary_ignore is not None:
        pred = pred[..., boundary_ignore:-boundary_ignore, boundary_ignore:-boundary_ignore]
        gt = gt[..., boundary_ignore:-boundary_ignore, boundary_ignore:-boundary_ignore]
    # TODO(synk): some repo variants pass normalize=True to msssim; the canonical
    # msssim() default (normalize=False) is used here.
    return msssim(pred, gt, window_size=11, val_range=None, normalize=False)


# --------------------------------- main ------------------------------------------
if __name__ == "__main__":
    key = jax.random.PRNGKey(0)
    k1, k2 = jax.random.split(key)

    # 5 pyramid levels: 64 -> 32 (fused Pallas kernels) -> 16 -> 8 -> 4 (plain jnp);
    # the gaussian window adapts to min(11, H, W) at each level, as in the reference.
    B, C, H, W = 2, 3, 64, 64
    gt = jax.random.uniform(k1, (B, C, H, W), dtype=jnp.float32)
    pred = jnp.clip(gt + 0.05 * jax.random.normal(k2, (B, C, H, W)),
                    0.0, 1.0).astype(jnp.float32)

    loss_fn = jax.jit(lambda p, g: msssim_loss(p, g))
    loss = jax.block_until_ready(loss_fn(pred, gt))
    assert bool(jnp.isfinite(loss)), f"non-finite loss: {loss}"
    print("KERNEL_OK")
</pallas_src>

<mosaic_0001>
module attributes {stable_mosaic.version = 11 : i64} {
  func.func @kernel(%arg0: i32, %arg1: i32, %arg2: memref<2xf32, #tpu.memory_space<smem>>, %arg3: memref<1x1x64x64xf32, #tpu.memory_space<vmem>>, %arg4: memref<1x1x64x64xf32, #tpu.memory_space<vmem>>, %arg5: memref<54x64xf32, #tpu.memory_space<vmem>>, %arg6: memref<64x54xf32, #tpu.memory_space<vmem>>, %arg7: memref<32x64xf32, #tpu.memory_space<vmem>>, %arg8: memref<64x32xf32, #tpu.memory_space<vmem>>, %arg9: memref<1x1x128xf32, #tpu.memory_space<vmem>>, %arg10: memref<1x1x128xf32, #tpu.memory_space<vmem>>, %arg11: memref<1x1x32x32xf32, #tpu.memory_space<vmem>>, %arg12: memref<1x1x32x32xf32, #tpu.memory_space<vmem>>, %arg13: memref<1x1x128xf32, #tpu.memory_space<vmem>>, %arg14: memref<1x1x128xf32, #tpu.memory_space<vmem>>) attributes {dimension_semantics = [#tpu.dimension_semantics<parallel>, #tpu.dimension_semantics<parallel>], iteration_bounds = array<i64: 2, 3>, scalar_prefetch = 0 : i64, scratch_operands = 0 : i64, tpu.core_type = #tpu.core_type<tc>, window_params = [{transform_indices = @transform_0, window_bounds = array<i64: 2>}, {transform_indices = @transform_1, window_bounds = array<i64: 1, 1, 64, 64>}, {transform_indices = @transform_2, window_bounds = array<i64: 1, 1, 64, 64>}, {pipeline_mode = #tpu.pipeline_mode<synchronous>, transform_indices = @transform_3, window_bounds = array<i64: 54, 64>}, {pipeline_mode = #tpu.pipeline_mode<synchronous>, transform_indices = @transform_4, window_bounds = array<i64: 64, 54>}, {pipeline_mode = #tpu.pipeline_mode<synchronous>, transform_indices = @transform_5, window_bounds = array<i64: 32, 64>}, {pipeline_mode = #tpu.pipeline_mode<synchronous>, transform_indices = @transform_6, window_bounds = array<i64: 64, 32>}, {transform_indices = @transform_7, window_bounds = array<i64: 1, 1, 128>}, {transform_indices = @transform_8, window_bounds = array<i64: 1, 1, 128>}, {transform_indices = @transform_9, window_bounds = array<i64: 1, 1, 32, 32>}, {transform_indices = @transform_10, window_bounds = array<i64: 1, 1, 32, 32>}, {transform_indices = @transform_11, window_bounds = array<i64: 1, 1, 128>}, {transform_indices = @transform_12, window_bounds = array<i64: 1, 1, 128>}]} {
    %c0 = arith.constant 0 : index
    %0 = memref.load %arg2[%c0] : memref<2xf32, #tpu.memory_space<smem>>
    %c1 = arith.constant 1 : index
    %1 = memref.load %arg2[%c1] : memref<2xf32, #tpu.memory_space<smem>>
    %c0_0 = arith.constant 0 : index
    %c0_1 = arith.constant 0 : index
    %c0_2 = arith.constant 0 : index
    %c0_3 = arith.constant 0 : index
    %2 = vector.load %arg3[%c0_0, %c0_1, %c0_2, %c0_3] : memref<1x1x64x64xf32, #tpu.memory_space<vmem>>, vector<1x1x64x64xf32>
    %3 = vector.shape_cast %2 : vector<1x1x64x64xf32> to vector<64x64xf32>
    %c0_4 = arith.constant 0 : index
    %c0_5 = arith.constant 0 : index
    %c0_6 = arith.constant 0 : index
    %c0_7 = arith.constant 0 : index
    %4 = vector.load %arg4[%c0_4, %c0_5, %c0_6, %c0_7] : memref<1x1x64x64xf32, #tpu.memory_space<vmem>>, vector<1x1x64x64xf32>
    %5 = vector.shape_cast %4 : vector<1x1x64x64xf32> to vector<64x64xf32>
    %c0_8 = arith.constant 0 : index
    %c0_9 = arith.constant 0 : index
    %6 = vector.load %arg5[%c0_8, %c0_9] : memref<54x64xf32, #tpu.memory_space<vmem>>, vector<54x64xf32>
    %c0_10 = arith.constant 0 : index
    %c0_11 = arith.constant 0 : index
    %7 = vector.load %arg6[%c0_10, %c0_11] : memref<64x54xf32, #tpu.memory_space<vmem>>, vector<64x54xf32>
    %cst = arith.constant dense<0.000000e+00> : vector<54x64xf32>
    %8 = tpu.matmul %6, %3, %cst {dimension_numbers = #tpu.dot_dimension_numbers<[1], [0], [0], [1], [0, 0, 1, 1], [], []>} : vector<54x64xf32>, vector<64x64xf32>, vector<54x64xf32> -> vector<54x64xf32>
    %cst_12 = arith.constant dense<0.000000e+00> : vector<54x54xf32>
    %9 = tpu.matmul %8, %7, %cst_12 {dimension_numbers = #tpu.dot_dimension_numbers<[1], [0], [0], [1], [0, 0, 1, 1], [], []>} : vector<54x64xf32>, vector<64x54xf32>, vector<54x54xf32> -> vector<54x54xf32>
    %cst_13 = arith.constant dense<0.000000e+00> : vector<54x64xf32>
    %10 = tpu.matmul %6, %5, %cst_13 {dimension_numbers = #tpu.dot_dimension_numbers<[1], [0], [0], [1], [0, 0, 1, 1], [], []>} : vector<54x64xf32>, vector<64x64xf32>, vector<54x64xf32> -> vector<54x64xf32>
    %cst_14 = arith.constant dense<0.000000e+00> : vector<54x54xf32>
    %11 = tpu.matmul %10, %7, %cst_14 {dimension_numbers = #tpu.dot_dimension_numbers<[1], [0], [0], [1], [0, 0, 1, 1], [], []>} : vector<54x64xf32>, vector<64x54xf32>, vector<54x54xf32> -> vector<54x54xf32>
    %12 = arith.mulf %3, %3 : vector<64x64xf32>
    %cst_15 = arith.constant dense<0.000000e+00> : vector<54x64xf32>
    %13 = tpu.matmul %6, %12, %cst_15 {dimension_numbers = #tpu.dot_dimension_numbers<[1], [0], [0], [1], [0, 0, 1, 1], [], []>} : vector<54x64xf32>, vector<64x64xf32>, vector<54x64xf32> -> vector<54x64xf32>
    %cst_16 = arith.constant dense<0.000000e+00> : vector<54x54xf32>
    %14 = tpu.matmul %13, %7, %cst_16 {dimension_numbers = #tpu.dot_dimension_numbers<[1], [0], [0], [1], [0, 0, 1, 1], [], []>} : vector<54x64xf32>, vector<64x54xf32>, vector<54x54xf32> -> vector<54x54xf32>
    %15 = arith.mulf %5, %5 : vector<64x64xf32>
    %cst_17 = arith.constant dense<0.000000e+00> : vector<54x64xf32>
    %16 = tpu.matmul %6, %15, %cst_17 {dimension_numbers = #tpu.dot_dimension_numbers<[1], [0], [0], [1], [0, 0, 1, 1], [], []>} : vector<54x64xf32>, vector<64x64xf32>, vector<54x64xf32> -> vector<54x64xf32>
    %cst_18 = arith.constant dense<0.000000e+00> : vector<54x54xf32>
    %17 = tpu.matmul %16, %7, %cst_18 {dimension_numbers = #tpu.dot_dimension_numbers<[1], [0], [0], [1], [0, 0, 1, 1], [], []>} : vector<54x64xf32>, vector<64x54xf32>, vector<54x54xf32> -> vector<54x54xf32>
    %18 = arith.mulf %3, %5 : vector<64x64xf32>
    %cst_19 = arith.constant dense<0.000000e+00> : vector<54x64xf32>
    %19 = tpu.matmul %6, %18, %cst_19 {dimension_numbers = #tpu.dot_dimension_numbers<[1], [0], [0], [1], [0, 0, 1, 1], [], []>} : vector<54x64xf32>, vector<64x64xf32>, vector<54x64xf32> -> vector<54x64xf32>
    %cst_20 = arith.constant dense<0.000000e+00> : vector<54x54xf32>
    %20 = tpu.matmul %19, %7, %cst_20 {dimension_numbers = #tpu.dot_dimension_numbers<[1], [0], [0], [1], [0, 0, 1, 1], [], []>} : vector<54x64xf32>, vector<64x54xf32>, vector<54x54xf32> -> vector<54x54xf32>
    %21 = arith.mulf %9, %9 : vector<54x54xf32>
    %22 = arith.mulf %11, %11 : vector<54x54xf32>
    %23 = arith.mulf %9, %11 : vector<54x54xf32>
    %24 = arith.subf %14, %21 : vector<54x54xf32>
    %25 = arith.subf %17, %22 : vector<54x54xf32>
    %26 = arith.subf %20, %23 : vector<54x54xf32>
    %cst_21 = arith.constant 2.000000e+00 : f32
    %27 = vector.broadcast %cst_21 : f32 to vector<54x54xf32>
    %28 = arith.mulf %27, %26 : vector<54x54xf32>
    %29 = vector.broadcast %1 : f32 to vector<54x54xf32>
    %30 = arith.addf %28, %29 : vector<54x54xf32>
    %31 = arith.addf %24, %25 : vector<54x54xf32>
    %32 = vector.broadcast %1 : f32 to vector<54x54xf32>
    %33 = arith.addf %31, %32 : vector<54x54xf32>
    %34 = tpu.reciprocal %33 {approx = true} : vector<54x54xf32> -> vector<54x54xf32>
    %35 = arith.mulf %30, %34 : vector<54x54xf32>
    %cst_22 = arith.constant 2.000000e+00 : f32
    %36 = vector.broadcast %cst_22 : f32 to vector<54x54xf32>
    %37 = arith.mulf %36, %23 : vector<54x54xf32>
    %38 = vector.broadcast %0 : f32 to vector<54x54xf32>
    %39 = arith.addf %37, %38 : vector<54x54xf32>
    %40 = arith.mulf %35, %39 : vector<54x54xf32>
    %41 = arith.addf %21, %22 : vector<54x54xf32>
    %42 = vector.broadcast %0 : f32 to vector<54x54xf32>
    %43 = arith.addf %41, %42 : vector<54x54xf32>
    %44 = tpu.reciprocal %43 {approx = true} : vector<54x54xf32> -> vector<54x54xf32>
    %45 = arith.mulf %40, %44 : vector<54x54xf32>
    %46 = vector.shape_cast %45 : vector<54x54xf32> to vector<1x54x54xf32>
    %cst_23 = arith.constant dense<0.000000e+00> : vector<1xf32>
    %47 = vector.multi_reduction <add>, %46, %cst_23 [1, 2] : vector<1x54x54xf32> to vector<1xf32>
    %48 = vector.shape_cast %47 : vector<1xf32> to vector<1x1x1xf32>
    %49 = vector.extract %48[0, 0, 0] : f32 from vector<1x1x1xf32>
    %50 = vector.broadcast %49 : f32 to vector<1x1x128xf32>
    %c0_24 = arith.constant 0 : index
    %c0_25 = arith.constant 0 : index
    %c0_26 = arith.constant 0 : index
    %51 = vector.load %arg9[%c0_24, %c0_25, %c0_26] : memref<1x1x128xf32, #tpu.memory_space<vmem>>, vector<1x1x128xf32>
    tpu.vector_store %arg9[%c0_24, %c0_25, %c0_26], %50 {strides = array<i32>} : memref<1x1x128xf32, #tpu.memory_space<vmem>>, vector<1x1x128xf32>,
    %52 = vector.shape_cast %35 : vector<54x54xf32> to vector<1x54x54xf32>
    %cst_27 = arith.constant dense<0.000000e+00> : vector<1xf32>
    %53 = vector.multi_reduction <add>, %52, %cst_27 [1, 2] : vector<1x54x54xf32> to vector<1xf32>
    %54 = vector.shape_cast %53 : vector<1xf32> to vector<1x1x1xf32>
    %55 = vector.extract %54[0, 0, 0] : f32 from vector<1x1x1xf32>
    %56 = vector.broadcast %55 : f32 to vector<1x1x128xf32>
    %c0_28 = arith.constant 0 : index
    %c0_29 = arith.constant 0 : index
    %c0_30 = arith.constant 0 : index
    %57 = vector.load %arg10[%c0_28, %c0_29, %c0_30] : memref<1x1x128xf32, #tpu.memory_space<vmem>>, vector<1x1x128xf32>
    tpu.vector_store %arg10[%c0_28, %c0_29, %c0_30], %56 {strides = array<i32>} : memref<1x1x128xf32, #tpu.memory_space<vmem>>, vector<1x1x128xf32>,
    %c0_31 = arith.constant 0 : index
    %c0_32 = arith.constant 0 : index
    %58 = vector.load %arg7[%c0_31, %c0_32] : memref<32x64xf32, #tpu.memory_space<vmem>>, vector<32x64xf32>
    %c0_33 = arith.constant 0 : index
    %c0_34 = arith.constant 0 : index
    %59 = vector.load %arg8[%c0_33, %c0_34] : memref<64x32xf32, #tpu.memory_space<vmem>>, vector<64x32xf32>
    %cst_35 = arith.constant dense<0.000000e+00> : vector<32x64xf32>
    %60 = tpu.matmul %58, %3, %cst_35 {dimension_numbers = #tpu.dot_dimension_numbers<[1], [0], [0], [1], [0, 0, 1, 1], [], []>} : vector<32x64xf32>, vector<64x64xf32>, vector<32x64xf32> -> vector<32x64xf32>
    %cst_36 = arith.constant dense<0.000000e+00> : vector<32x32xf32>
    %61 = tpu.matmul %60, %59, %cst_36 {dimension_numbers = #tpu.dot_dimension_numbers<[1], [0], [0], [1], [0, 0, 1, 1], [], []>} : vector<32x64xf32>, vector<64x32xf32>, vector<32x32xf32> -> vector<32x32xf32>
    %cst_37 = arith.constant dense<0.000000e+00> : vector<32x64xf32>
    %62 = tpu.matmul %58, %5, %cst_37 {dimension_numbers = #tpu.dot_dimension_numbers<[1], [0], [0], [1], [0, 0, 1, 1], [], []>} : vector<32x64xf32>, vector<64x64xf32>, vector<32x64xf32> -> vector<32x64xf32>
    %cst_38 = arith.constant dense<0.000000e+00> : vector<32x32xf32>
    %63 = tpu.matmul %62, %59, %cst_38 {dimension_numbers = #tpu.dot_dimension_numbers<[1], [0], [0], [1], [0, 0, 1, 1], [], []>} : vector<32x64xf32>, vector<64x32xf32>, vector<32x32xf32> -> vector<32x32xf32>
    %c0_39 = arith.constant 0 : index
    %c0_40 = arith.constant 0 : index
    %c0_41 = arith.constant 0 : index
    %c0_42 = arith.constant 0 : index
    %64 = vector.load %arg11[%c0_39, %c0_40, %c0_41, %c0_42] : memref<1x1x32x32xf32, #tpu.memory_space<vmem>>, vector<1x1x32x32xf32>
    %65 = vector.shape_cast %64 : vector<1x1x32x32xf32> to vector<32x32xf32>
    %66 = vector.shape_cast %61 : vector<32x32xf32> to vector<1x1x32x32xf32>
    tpu.vector_store %arg11[%c0_39, %c0_40, %c0_41, %c0_42], %66 {strides = array<i32>} : memref<1x1x32x32xf32, #tpu.memory_space<vmem>>, vector<1x1x32x32xf32>,
    %c0_43 = arith.constant 0 : index
    %c0_44 = arith.constant 0 : index
    %c0_45 = arith.constant 0 : index
    %c0_46 = arith.constant 0 : index
    %67 = vector.load %arg12[%c0_43, %c0_44, %c0_45, %c0_46] : memref<1x1x32x32xf32, #tpu.memory_space<vmem>>, vector<1x1x32x32xf32>
    %68 = vector.shape_cast %67 : vector<1x1x32x32xf32> to vector<32x32xf32>
    %69 = vector.shape_cast %63 : vector<32x32xf32> to vector<1x1x32x32xf32>
    tpu.vector_store %arg12[%c0_43, %c0_44, %c0_45, %c0_46], %69 {strides = array<i32>} : memref<1x1x32x32xf32, #tpu.memory_space<vmem>>, vector<1x1x32x32xf32>,
    %70 = vector.shape_cast %61 : vector<32x32xf32> to vector<1x32x32xf32>
    %cst_47 = arith.constant dense<0xFF800000> : vector<1xf32>
    %71 = vector.multi_reduction <maximumf>, %70, %cst_47 [1, 2] : vector<1x32x32xf32> to vector<1xf32>
    %72 = vector.shape_cast %71 : vector<1xf32> to vector<1x1x1xf32>
    %73 = vector.extract %72[0, 0, 0] : f32 from vector<1x1x1xf32>
    %74 = vector.broadcast %73 : f32 to vector<1x1x128xf32>
    %c0_48 = arith.constant 0 : index
    %c0_49 = arith.constant 0 : index
    %c0_50 = arith.constant 0 : index
    %75 = vector.load %arg13[%c0_48, %c0_49, %c0_50] : memref<1x1x128xf32, #tpu.memory_space<vmem>>, vector<1x1x128xf32>
    tpu.vector_store %arg13[%c0_48, %c0_49, %c0_50], %74 {strides = array<i32>} : memref<1x1x128xf32, #tpu.memory_space<vmem>>, vector<1x1x128xf32>,
    %76 = vector.shape_cast %61 : vector<32x32xf32> to vector<1x32x32xf32>
    %cst_51 = arith.constant dense<0x7F800000> : vector<1xf32>
    %77 = vector.multi_reduction <minimumf>, %76, %cst_51 [1, 2] : vector<1x32x32xf32> to vector<1xf32>
    %78 = vector.shape_cast %77 : vector<1xf32> to vector<1x1x1xf32>
    %79 = vector.extract %78[0, 0, 0] : f32 from vector<1x1x1xf32>
    %80 = vector.broadcast %79 : f32 to vector<1x1x128xf32>
    %c0_52 = arith.constant 0 : index
    %c0_53 = arith.constant 0 : index
    %c0_54 = arith.constant 0 : index
    %81 = vector.load %arg14[%c0_52, %c0_53, %c0_54] : memref<1x1x128xf32, #tpu.memory_space<vmem>>, vector<1x1x128xf32>
    tpu.vector_store %arg14[%c0_52, %c0_53, %c0_54], %80 {strides = array<i32>} : memref<1x1x128xf32, #tpu.memory_space<vmem>>, vector<1x1x128xf32>,
    return
  }
  func.func @transform_0(%arg0: i32, %arg1: i32) -> i32 {
    %c0_i32 = arith.constant 0 : i32
    %c0_i32_0 = arith.constant 0 : i32
    return %c0_i32 : i32
  }
  func.func @transform_1(%arg0: i32, %arg1: i32) -> (i32, i32, i32, i32) {
    %c0_i32 = arith.constant 0 : i32
    %c0_i32_0 = arith.constant 0 : i32
    %c0_i32_1 = arith.constant 0 : i32
    return %arg0, %arg1, %c0_i32, %c0_i32_0 : i32, i32, i32, i32
  }
  func.func @transform_2(%arg0: i32, %arg1: i32) -> (i32, i32, i32, i32) {
    %c0_i32 = arith.constant 0 : i32
    %c0_i32_0 = arith.constant 0 : i32
    %c0_i32_1 = arith.constant 0 : i32
    return %arg0, %arg1, %c0_i32, %c0_i32_0 : i32, i32, i32, i32
  }
  func.func @transform_3(%arg0: i32, %arg1: i32) -> (i32, i32) {
    %c0_i32 = arith.constant 0 : i32
    %c0_i32_0 = arith.constant 0 : i32
    %c0_i32_1 = arith.constant 0 : i32
    return %c0_i32, %c0_i32_0 : i32, i32
  }
  func.func @transform_4(%arg0: i32, %arg1: i32) -> (i32, i32) {
    %c0_i32 = arith.constant 0 : i32
    %c0_i32_0 = arith.constant 0 : i32
    %c0_i32_1 = arith.constant 0 : i32
    return %c0_i32, %c0_i32_0 : i32, i32
  }
  func.func @transform_5(%arg0: i32, %arg1: i32) -> (i32, i32) {
    %c0_i32 = arith.constant 0 : i32
    %c0_i32_0 = arith.constant 0 : i32
    %c0_i32_1 = arith.constant 0 : i32
    return %c0_i32, %c0_i32_0 : i32, i32
  }
  func.func @transform_6(%arg0: i32, %arg1: i32) -> (i32, i32) {
    %c0_i32 = arith.constant 0 : i32
    %c0_i32_0 = arith.constant 0 : i32
    %c0_i32_1 = arith.constant 0 : i32
    return %c0_i32, %c0_i32_0 : i32, i32
  }
  func.func @transform_7(%arg0: i32, %arg1: i32) -> (i32, i32, i32) {
    %c3_i32 = arith.constant 3 : i32
    %0 = arith.muli %arg0, %c3_i32 : i32
    %1 = arith.addi %0, %arg1 : i32
    %c0_i32 = arith.constant 0 : i32
    %c0_i32_0 = arith.constant 0 : i32
    %c0_i32_1 = arith.constant 0 : i32
    return %1, %c0_i32, %c0_i32_0 : i32, i32, i32
  }
  func.func @transform_8(%arg0: i32, %arg1: i32) -> (i32, i32, i32) {
    %c3_i32 = arith.constant 3 : i32
    %0 = arith.muli %arg0, %c3_i32 : i32
    %1 = arith.addi %0, %arg1 : i32
    %c0_i32 = arith.constant 0 : i32
    %c0_i32_0 = arith.constant 0 : i32
    %c0_i32_1 = arith.constant 0 : i32
    return %1, %c0_i32, %c0_i32_0 : i32, i32, i32
  }
  func.func @transform_9(%arg0: i32, %arg1: i32) -> (i32, i32, i32, i32) {
    %c0_i32 = arith.constant 0 : i32
    %c0_i32_0 = arith.constant 0 : i32
    %c0_i32_1 = arith.constant 0 : i32
    return %arg0, %arg1, %c0_i32, %c0_i32_0 : i32, i32, i32, i32
  }
  func.func @transform_10(%arg0: i32, %arg1: i32) -> (i32, i32, i32, i32) {
    %c0_i32 = arith.constant 0 : i32
    %c0_i32_0 = arith.constant 0 : i32
    %c0_i32_1 = arith.constant 0 : i32
    return %arg0, %arg1, %c0_i32, %c0_i32_0 : i32, i32, i32, i32
  }
  func.func @transform_11(%arg0: i32, %arg1: i32) -> (i32, i32, i32) {
    %c3_i32 = arith.constant 3 : i32
    %0 = arith.muli %arg0, %c3_i32 : i32
    %1 = arith.addi %0, %arg1 : i32
    %c0_i32 = arith.constant 0 : i32
    %c0_i32_0 = arith.constant 0 : i32
    %c0_i32_1 = arith.constant 0 : i32
    return %1, %c0_i32, %c0_i32_0 : i32, i32, i32
  }
  func.func @transform_12(%arg0: i32, %arg1: i32) -> (i32, i32, i32) {
    %c3_i32 = arith.constant 3 : i32
    %0 = arith.muli %arg0, %c3_i32 : i32
    %1 = arith.addi %0, %arg1 : i32
    %c0_i32 = arith.constant 0 : i32
    %c0_i32_0 = arith.constant 0 : i32
    %c0_i32_1 = arith.constant 0 : i32
    return %1, %c0_i32, %c0_i32_0 : i32, i32, i32
  }
}

module attributes {stable_mosaic.version = 11 : i64} {
  func.func @kernel(%arg0: i32, %arg1: i32, %arg2: memref<2xf32, #tpu.memory_space<smem>>, %arg3: memref<1x1x32x32xf32, #tpu.memory_space<vmem>>, %arg4: memref<1x1x32x32xf32, #tpu.memory_space<vmem>>, %arg5: memref<22x32xf32, #tpu.memory_space<vmem>>, %arg6: memref<32x22xf32, #tpu.memory_space<vmem>>, %arg7: memref<16x32xf32, #tpu.memory_space<vmem>>, %arg8: memref<32x16xf32, #tpu.memory_space<vmem>>, %arg9: memref<1x1x128xf32, #tpu.memory_space<vmem>>, %arg10: memref<1x1x128xf32, #tpu.memory_space<vmem>>, %arg11: memref<1x1x16x16xf32, #tpu.memory_space<vmem>>, %arg12: memref<1x1x16x16xf32, #tpu.memory_space<vmem>>, %arg13: memref<1x1x128xf32, #tpu.memory_space<vmem>>, %arg14: memref<1x1x128xf32, #tpu.memory_space<vmem>>) attributes {dimension_semantics = [#tpu.dimension_semantics<parallel>, #tpu.dimension_semantics<parallel>], iteration_bounds = array<i64: 2, 3>, scalar_prefetch = 0 : i64, scratch_operands = 0 : i64, tpu.core_type = #tpu.core_type<tc>, window_params = [{transform_indices = @transform_0, window_bounds = array<i64: 2>}, {transform_indices = @transform_1, window_bounds = array<i64: 1, 1, 32, 32>}, {transform_indices = @transform_2, window_bounds = array<i64: 1, 1, 32, 32>}, {pipeline_mode = #tpu.pipeline_mode<synchronous>, transform_indices = @transform_3, window_bounds = array<i64: 22, 32>}, {pipeline_mode = #tpu.pipeline_mode<synchronous>, transform_indices = @transform_4, window_bounds = array<i64: 32, 22>}, {pipeline_mode = #tpu.pipeline_mode<synchronous>, transform_indices = @transform_5, window_bounds = array<i64: 16, 32>}, {pipeline_mode = #tpu.pipeline_mode<synchronous>, transform_indices = @transform_6, window_bounds = array<i64: 32, 16>}, {transform_indices = @transform_7, window_bounds = array<i64: 1, 1, 128>}, {transform_indices = @transform_8, window_bounds = array<i64: 1, 1, 128>}, {transform_indices = @transform_9, window_bounds = array<i64: 1, 1, 16, 16>}, {transform_indices = @transform_10, window_bounds = array<i64: 1, 1, 16, 16>}, {transform_indices = @transform_11, window_bounds = array<i64: 1, 1, 128>}, {transform_indices = @transform_12, window_bounds = array<i64: 1, 1, 128>}]} {
    %c0 = arith.constant 0 : index
    %0 = memref.load %arg2[%c0] : memref<2xf32, #tpu.memory_space<smem>>
    %c1 = arith.constant 1 : index
    %1 = memref.load %arg2[%c1] : memref<2xf32, #tpu.memory_space<smem>>
    %c0_0 = arith.constant 0 : index
    %c0_1 = arith.constant 0 : index
    %c0_2 = arith.constant 0 : index
    %c0_3 = arith.constant 0 : index
    %2 = vector.load %arg3[%c0_0, %c0_1, %c0_2, %c0_3] : memref<1x1x32x32xf32, #tpu.memory_space<vmem>>, vector<1x1x32x32xf32>
    %3 = vector.shape_cast %2 : vector<1x1x32x32xf32> to vector<32x32xf32>
    %c0_4 = arith.constant 0 : index
    %c0_5 = arith.constant 0 : index
    %c0_6 = arith.constant 0 : index
    %c0_7 = arith.constant 0 : index
    %4 = vector.load %arg4[%c0_4, %c0_5, %c0_6, %c0_7] : memref<1x1x32x32xf32, #tpu.memory_space<vmem>>, vector<1x1x32x32xf32>
    %5 = vector.shape_cast %4 : vector<1x1x32x32xf32> to vector<32x32xf32>
    %c0_8 = arith.constant 0 : index
    %c0_9 = arith.constant 0 : index
    %6 = vector.load %arg5[%c0_8, %c0_9] : memref<22x32xf32, #tpu.memory_space<vmem>>, vector<22x32xf32>
    %c0_10 = arith.constant 0 : index
    %c0_11 = arith.constant 0 : index
    %7 = vector.load %arg6[%c0_10, %c0_11] : memref<32x22xf32, #tpu.memory_space<vmem>>, vector<32x22xf32>
    %cst = arith.constant dense<0.000000e+00> : vector<22x32xf32>
    %8 = tpu.matmul %6, %3, %cst {dimension_numbers = #tpu.dot_dimension_numbers<[1], [0], [0], [1], [0, 0, 1, 1], [], []>} : vector<22x32xf32>, vector<32x32xf32>, vector<22x32xf32> -> vector<22x32xf32>
    %cst_12 = arith.constant dense<0.000000e+00> : vector<22x22xf32>
    %9 = tpu.matmul %8, %7, %cst_12 {dimension_numbers = #tpu.dot_dimension_numbers<[1], [0], [0], [1], [0, 0, 1, 1], [], []>} : vector<22x32xf32>, vector<32x22xf32>, vector<22x22xf32> -> vector<22x22xf32>
    %cst_13 = arith.constant dense<0.000000e+00> : vector<22x32xf32>
    %10 = tpu.matmul %6, %5, %cst_13 {dimension_numbers = #tpu.dot_dimension_numbers<[1], [0], [0], [1], [0, 0, 1, 1], [], []>} : vector<22x32xf32>, vector<32x32xf32>, vector<22x32xf32> -> vector<22x32xf32>
    %cst_14 = arith.constant dense<0.000000e+00> : vector<22x22xf32>
    %11 = tpu.matmul %10, %7, %cst_14 {dimension_numbers = #tpu.dot_dimension_numbers<[1], [0], [0], [1], [0, 0, 1, 1], [], []>} : vector<22x32xf32>, vector<32x22xf32>, vector<22x22xf32> -> vector<22x22xf32>
    %12 = arith.mulf %3, %3 : vector<32x32xf32>
    %cst_15 = arith.constant dense<0.000000e+00> : vector<22x32xf32>
    %13 = tpu.matmul %6, %12, %cst_15 {dimension_numbers = #tpu.dot_dimension_numbers<[1], [0], [0], [1], [0, 0, 1, 1], [], []>} : vector<22x32xf32>, vector<32x32xf32>, vector<22x32xf32> -> vector<22x32xf32>
    %cst_16 = arith.constant dense<0.000000e+00> : vector<22x22xf32>
    %14 = tpu.matmul %13, %7, %cst_16 {dimension_numbers = #tpu.dot_dimension_numbers<[1], [0], [0], [1], [0, 0, 1, 1], [], []>} : vector<22x32xf32>, vector<32x22xf32>, vector<22x22xf32> -> vector<22x22xf32>
    %15 = arith.mulf %5, %5 : vector<32x32xf32>
    %cst_17 = arith.constant dense<0.000000e+00> : vector<22x32xf32>
    %16 = tpu.matmul %6, %15, %cst_17 {dimension_numbers = #tpu.dot_dimension_numbers<[1], [0], [0], [1], [0, 0, 1, 1], [], []>} : vector<22x32xf32>, vector<32x32xf32>, vector<22x32xf32> -> vector<22x32xf32>
    %cst_18 = arith.constant dense<0.000000e+00> : vector<22x22xf32>
    %17 = tpu.matmul %16, %7, %cst_18 {dimension_numbers = #tpu.dot_dimension_numbers<[1], [0], [0], [1], [0, 0, 1, 1], [], []>} : vector<22x32xf32>, vector<32x22xf32>, vector<22x22xf32> -> vector<22x22xf32>
    %18 = arith.mulf %3, %5 : vector<32x32xf32>
    %cst_19 = arith.constant dense<0.000000e+00> : vector<22x32xf32>
    %19 = tpu.matmul %6, %18, %cst_19 {dimension_numbers = #tpu.dot_dimension_numbers<[1], [0], [0], [1], [0, 0, 1, 1], [], []>} : vector<22x32xf32>, vector<32x32xf32>, vector<22x32xf32> -> vector<22x32xf32>
    %cst_20 = arith.constant dense<0.000000e+00> : vector<22x22xf32>
    %20 = tpu.matmul %19, %7, %cst_20 {dimension_numbers = #tpu.dot_dimension_numbers<[1], [0], [0], [1], [0, 0, 1, 1], [], []>} : vector<22x32xf32>, vector<32x22xf32>, vector<22x22xf32> -> vector<22x22xf32>
    %21 = arith.mulf %9, %9 : vector<22x22xf32>
    %22 = arith.mulf %11, %11 : vector<22x22xf32>
    %23 = arith.mulf %9, %11 : vector<22x22xf32>
    %24 = arith.subf %14, %21 : vector<22x22xf32>
    %25 = arith.subf %17, %22 : vector<22x22xf32>
    %26 = arith.subf %20, %23 : vector<22x22xf32>
    %cst_21 = arith.constant 2.000000e+00 : f32
    %27 = vector.broadcast %cst_21 : f32 to vector<22x22xf32>
    %28 = arith.mulf %27, %26 : vector<22x22xf32>
    %29 = vector.broadcast %1 : f32 to vector<22x22xf32>
    %30 = arith.addf %28, %29 : vector<22x22xf32>
    %31 = arith.addf %24, %25 : vector<22x22xf32>
    %32 = vector.broadcast %1 : f32 to vector<22x22xf32>
    %33 = arith.addf %31, %32 : vector<22x22xf32>
    %34 = tpu.reciprocal %33 {approx = true} : vector<22x22xf32> -> vector<22x22xf32>
    %35 = arith.mulf %30, %34 : vector<22x22xf32>
    %cst_22 = arith.constant 2.000000e+00 : f32
    %36 = vector.broadcast %cst_22 : f32 to vector<22x22xf32>
    %37 = arith.mulf %36, %23 : vector<22x22xf32>
    %38 = vector.broadcast %0 : f32 to vector<22x22xf32>
    %39 = arith.addf %37, %38 : vector<22x22xf32>
    %40 = arith.mulf %35, %39 : vector<22x22xf32>
    %41 = arith.addf %21, %22 : vector<22x22xf32>
    %42 = vector.broadcast %0 : f32 to vector<22x22xf32>
    %43 = arith.addf %41, %42 : vector<22x22xf32>
    %44 = tpu.reciprocal %43 {approx = true} : vector<22x22xf32> -> vector<22x22xf32>
    %45 = arith.mulf %40, %44 : vector<22x22xf32>
    %46 = vector.shape_cast %45 : vector<22x22xf32> to vector<1x22x22xf32>
    %cst_23 = arith.constant dense<0.000000e+00> : vector<1xf32>
    %47 = vector.multi_reduction <add>, %46, %cst_23 [1, 2] : vector<1x22x22xf32> to vector<1xf32>
    %48 = vector.shape_cast %47 : vector<1xf32> to vector<1x1x1xf32>
    %49 = vector.extract %48[0, 0, 0] : f32 from vector<1x1x1xf32>
    %50 = vector.broadcast %49 : f32 to vector<1x1x128xf32>
    %c0_24 = arith.constant 0 : index
    %c0_25 = arith.constant 0 : index
    %c0_26 = arith.constant 0 : index
    %51 = vector.load %arg9[%c0_24, %c0_25, %c0_26] : memref<1x1x128xf32, #tpu.memory_space<vmem>>, vector<1x1x128xf32>
    tpu.vector_store %arg9[%c0_24, %c0_25, %c0_26], %50 {strides = array<i32>} : memref<1x1x128xf32, #tpu.memory_space<vmem>>, vector<1x1x128xf32>,
    %52 = vector.shape_cast %35 : vector<22x22xf32> to vector<1x22x22xf32>
    %cst_27 = arith.constant dense<0.000000e+00> : vector<1xf32>
    %53 = vector.multi_reduction <add>, %52, %cst_27 [1, 2] : vector<1x22x22xf32> to vector<1xf32>
    %54 = vector.shape_cast %53 : vector<1xf32> to vector<1x1x1xf32>
    %55 = vector.extract %54[0, 0, 0] : f32 from vector<1x1x1xf32>
    %56 = vector.broadcast %55 : f32 to vector<1x1x128xf32>
    %c0_28 = arith.constant 0 : index
    %c0_29 = arith.constant 0 : index
    %c0_30 = arith.constant 0 : index
    %57 = vector.load %arg10[%c0_28, %c0_29, %c0_30] : memref<1x1x128xf32, #tpu.memory_space<vmem>>, vector<1x1x128xf32>
    tpu.vector_store %arg10[%c0_28, %c0_29, %c0_30], %56 {strides = array<i32>} : memref<1x1x128xf32, #tpu.memory_space<vmem>>, vector<1x1x128xf32>,
    %c0_31 = arith.constant 0 : index
    %c0_32 = arith.constant 0 : index
    %58 = vector.load %arg7[%c0_31, %c0_32] : memref<16x32xf32, #tpu.memory_space<vmem>>, vector<16x32xf32>
    %c0_33 = arith.constant 0 : index
    %c0_34 = arith.constant 0 : index
    %59 = vector.load %arg8[%c0_33, %c0_34] : memref<32x16xf32, #tpu.memory_space<vmem>>, vector<32x16xf32>
    %cst_35 = arith.constant dense<0.000000e+00> : vector<16x32xf32>
    %60 = tpu.matmul %58, %3, %cst_35 {dimension_numbers = #tpu.dot_dimension_numbers<[1], [0], [0], [1], [0, 0, 1, 1], [], []>} : vector<16x32xf32>, vector<32x32xf32>, vector<16x32xf32> -> vector<16x32xf32>
    %cst_36 = arith.constant dense<0.000000e+00> : vector<16x16xf32>
    %61 = tpu.matmul %60, %59, %cst_36 {dimension_numbers = #tpu.dot_dimension_numbers<[1], [0], [0], [1], [0, 0, 1, 1], [], []>} : vector<16x32xf32>, vector<32x16xf32>, vector<16x16xf32> -> vector<16x16xf32>
    %cst_37 = arith.constant dense<0.000000e+00> : vector<16x32xf32>
    %62 = tpu.matmul %58, %5, %cst_37 {dimension_numbers = #tpu.dot_dimension_numbers<[1], [0], [0], [1], [0, 0, 1, 1], [], []>} : vector<16x32xf32>, vector<32x32xf32>, vector<16x32xf32> -> vector<16x32xf32>
    %cst_38 = arith.constant dense<0.000000e+00> : vector<16x16xf32>
    %63 = tpu.matmul %62, %59, %cst_38 {dimension_numbers = #tpu.dot_dimension_numbers<[1], [0], [0], [1], [0, 0, 1, 1], [], []>} : vector<16x32xf32>, vector<32x16xf32>, vector<16x16xf32> -> vector<16x16xf32>
    %c0_39 = arith.constant 0 : index
    %c0_40 = arith.constant 0 : index
    %c0_41 = arith.constant 0 : index
    %c0_42 = arith.constant 0 : index
    %64 = vector.load %arg11[%c0_39, %c0_40, %c0_41, %c0_42] : memref<1x1x16x16xf32, #tpu.memory_space<vmem>>, vector<1x1x16x16xf32>
    %65 = vector.shape_cast %64 : vector<1x1x16x16xf32> to vector<16x16xf32>
    %66 = vector.shape_cast %61 : vector<16x16xf32> to vector<1x1x16x16xf32>
    tpu.vector_store %arg11[%c0_39, %c0_40, %c0_41, %c0_42], %66 {strides = array<i32>} : memref<1x1x16x16xf32, #tpu.memory_space<vmem>>, vector<1x1x16x16xf32>,
    %c0_43 = arith.constant 0 : index
    %c0_44 = arith.constant 0 : index
    %c0_45 = arith.constant 0 : index
    %c0_46 = arith.constant 0 : index
    %67 = vector.load %arg12[%c0_43, %c0_44, %c0_45, %c0_46] : memref<1x1x16x16xf32, #tpu.memory_space<vmem>>, vector<1x1x16x16xf32>
    %68 = vector.shape_cast %67 : vector<1x1x16x16xf32> to vector<16x16xf32>
    %69 = vector.shape_cast %63 : vector<16x16xf32> to vector<1x1x16x16xf32>
    tpu.vector_store %arg12[%c0_43, %c0_44, %c0_45, %c0_46], %69 {strides = array<i32>} : memref<1x1x16x16xf32, #tpu.memory_space<vmem>>, vector<1x1x16x16xf32>,
    %70 = vector.shape_cast %61 : vector<16x16xf32> to vector<1x16x16xf32>
    %cst_47 = arith.constant dense<0xFF800000> : vector<1xf32>
    %71 = vector.multi_reduction <maximumf>, %70, %cst_47 [1, 2] : vector<1x16x16xf32> to vector<1xf32>
    %72 = vector.shape_cast %71 : vector<1xf32> to vector<1x1x1xf32>
    %73 = vector.extract %72[0, 0, 0] : f32 from vector<1x1x1xf32>
    %74 = vector.broadcast %73 : f32 to vector<1x1x128xf32>
    %c0_48 = arith.constant 0 : index
    %c0_49 = arith.constant 0 : index
    %c0_50 = arith.constant 0 : index
    %75 = vector.load %arg13[%c0_48, %c0_49, %c0_50] : memref<1x1x128xf32, #tpu.memory_space<vmem>>, vector<1x1x128xf32>
    tpu.vector_store %arg13[%c0_48, %c0_49, %c0_50], %74 {strides = array<i32>} : memref<1x1x128xf32, #tpu.memory_space<vmem>>, vector<1x1x128xf32>,
    %76 = vector.shape_cast %61 : vector<16x16xf32> to vector<1x16x16xf32>
    %cst_51 = arith.constant dense<0x7F800000> : vector<1xf32>
    %77 = vector.multi_reduction <minimumf>, %76, %cst_51 [1, 2] : vector<1x16x16xf32> to vector<1xf32>
    %78 = vector.shape_cast %77 : vector<1xf32> to vector<1x1x1xf32>
    %79 = vector.extract %78[0, 0, 0] : f32 from vector<1x1x1xf32>
    %80 = vector.broadcast %79 : f32 to vector<1x1x128xf32>
    %c0_52 = arith.constant 0 : index
    %c0_53 = arith.constant 0 : index
    %c0_54 = arith.constant 0 : index
    %81 = vector.load %arg14[%c0_52, %c0_53, %c0_54] : memref<1x1x128xf32, #tpu.memory_space<vmem>>, vector<1x1x128xf32>
    tpu.vector_store %arg14[%c0_52, %c0_53, %c0_54], %80 {strides = array<i32>} : memref<1x1x128xf32, #tpu.memory_space<vmem>>, vector<1x1x128xf32>,
    return
  }
  func.func @transform_0(%arg0: i32, %arg1: i32) -> i32 {
    %c0_i32 = arith.constant 0 : i32
    %c0_i32_0 = arith.constant 0 : i32
    return %c0_i32 : i32
  }
  func.func @transform_1(%arg0: i32, %arg1: i32) -> (i32, i32, i32, i32) {
    %c0_i32 = arith.constant 0 : i32
    %c0_i32_0 = arith.constant 0 : i32
    %c0_i32_1 = arith.constant 0 : i32
    return %arg0, %arg1, %c0_i32, %c0_i32_0 : i32, i32, i32, i32
  }
  func.func @transform_2(%arg0: i32, %arg1: i32) -> (i32, i32, i32, i32) {
    %c0_i32 = arith.constant 0 : i32
    %c0_i32_0 = arith.constant 0 : i32
    %c0_i32_1 = arith.constant 0 : i32
    return %arg0, %arg1, %c0_i32, %c0_i32_0 : i32, i32, i32, i32
  }
  func.func @transform_3(%arg0: i32, %arg1: i32) -> (i32, i32) {
    %c0_i32 = arith.constant 0 : i32
    %c0_i32_0 = arith.constant 0 : i32
    %c0_i32_1 = arith.constant 0 : i32
    return %c0_i32, %c0_i32_0 : i32, i32
  }
  func.func @transform_4(%arg0: i32, %arg1: i32) -> (i32, i32) {
    %c0_i32 = arith.constant 0 : i32
    %c0_i32_0 = arith.constant 0 : i32
    %c0_i32_1 = arith.constant 0 : i32
    return %c0_i32, %c0_i32_0 : i32, i32
  }
  func.func @transform_5(%arg0: i32, %arg1: i32) -> (i32, i32) {
    %c0_i32 = arith.constant 0 : i32
    %c0_i32_0 = arith.constant 0 : i32
    %c0_i32_1 = arith.constant 0 : i32
    return %c0_i32, %c0_i32_0 : i32, i32
  }
  func.func @transform_6(%arg0: i32, %arg1: i32) -> (i32, i32) {
    %c0_i32 = arith.constant 0 : i32
    %c0_i32_0 = arith.constant 0 : i32
    %c0_i32_1 = arith.constant 0 : i32
    return %c0_i32, %c0_i32_0 : i32, i32
  }
  func.func @transform_7(%arg0: i32, %arg1: i32) -> (i32, i32, i32) {
    %c3_i32 = arith.constant 3 : i32
    %0 = arith.muli %arg0, %c3_i32 : i32
    %1 = arith.addi %0, %arg1 : i32
    %c0_i32 = arith.constant 0 : i32
    %c0_i32_0 = arith.constant 0 : i32
    %c0_i32_1 = arith.constant 0 : i32
    return %1, %c0_i32, %c0_i32_0 : i32, i32, i32
  }
  func.func @transform_8(%arg0: i32, %arg1: i32) -> (i32, i32, i32) {
    %c3_i32 = arith.constant 3 : i32
    %0 = arith.muli %arg0, %c3_i32 : i32
    %1 = arith.addi %0, %arg1 : i32
    %c0_i32 = arith.constant 0 : i32
    %c0_i32_0 = arith.constant 0 : i32
    %c0_i32_1 = arith.constant 0 : i32
    return %1, %c0_i32, %c0_i32_0 : i32, i32, i32
  }
  func.func @transform_9(%arg0: i32, %arg1: i32) -> (i32, i32, i32, i32) {
    %c0_i32 = arith.constant 0 : i32
    %c0_i32_0 = arith.constant 0 : i32
    %c0_i32_1 = arith.constant 0 : i32
    return %arg0, %arg1, %c0_i32, %c0_i32_0 : i32, i32, i32, i32
  }
  func.func @transform_10(%arg0: i32, %arg1: i32) -> (i32, i32, i32, i32) {
    %c0_i32 = arith.constant 0 : i32
    %c0_i32_0 = arith.constant 0 : i32
    %c0_i32_1 = arith.constant 0 : i32
    return %arg0, %arg1, %c0_i32, %c0_i32_0 : i32, i32, i32, i32
  }
  func.func @transform_11(%arg0: i32, %arg1: i32) -> (i32, i32, i32) {
    %c3_i32 = arith.constant 3 : i32
    %0 = arith.muli %arg0, %c3_i32 : i32
    %1 = arith.addi %0, %arg1 : i32
    %c0_i32 = arith.constant 0 : i32
    %c0_i32_0 = arith.constant 0 : i32
    %c0_i32_1 = arith.constant 0 : i32
    return %1, %c0_i32, %c0_i32_0 : i32, i32, i32
  }
  func.func @transform_12(%arg0: i32, %arg1: i32) -> (i32, i32, i32) {
    %c3_i32 = arith.constant 3 : i32
    %0 = arith.muli %arg0, %c3_i32 : i32
    %1 = arith.addi %0, %arg1 : i32
    %c0_i32 = arith.constant 0 : i32
    %c0_i32_0 = arith.constant 0 : i32
    %c0_i32_1 = arith.constant 0 : i32
    return %1, %c0_i32, %c0_i32_0 : i32, i32, i32
  }
}

</mosaic_0001>

<bundles_post_ra>
// kernel: _lambda_.3
= control target key start
LH: loop header
LB: loop body
LE: loop exit
PB: predicated region body
PF: predicated region fallthrough
CT: control target
= control target key end

     0   :  { %s3225_s0 = inlined_call_operand.vmem [shape: f32[2], index: 0, kind: input, shape index: {}]   ;;  %s3226_s1 = inlined_call_operand.vmem [shape: f32[2,3,32,32], index: 1, kind: input, shape index: {}]   ;;  %s3227_s2 = inlined_call_operand.vmem [shape: f32[2,3,32,32], index: 2, kind: input, shape index: {}]   ;;  %s3228_s3 = inlined_call_operand.vmem [shape: f32[22,32], index: 3, kind: input, shape index: {}]   ;;  %s3229_s4 = inlined_call_operand.vmem [shape: f32[32,22], index: 4, kind: input, shape index: {}]   ;;  %s3230_s5 = inlined_call_operand.vmem [shape: f32[16,32], index: 5, kind: input, shape index: {}]   ;;  %s3231_s6 = inlined_call_operand.vmem [shape: f32[32,16], index: 6, kind: input, shape index: {}]   ;;  %s3232_s7 = inlined_call_operand.vmem [shape: f32[6,1,128], index: 7, kind: output, shape index: {0}]   ;;  %s3233_s8 = inlined_call_operand.vmem [shape: f32[6,1,128], index: 8, kind: output, shape index: {1}]   ;;  %s3234_s9 = inlined_call_operand.vmem [shape: f32[2,3,16,16], index: 9, kind: output, shape index: {2}]   ;;  %s3235_s10 = inlined_call_operand.vmem [shape: f32[2,3,16,16], index: 10, kind: output, shape index: {3}]   ;;  %s3236_s11 = inlined_call_operand.vmem [shape: f32[6,1,128], index: 11, kind: output, shape index: {4}]   ;;  %s3237_s12 = inlined_call_operand.vmem [shape: f32[6,1,128], index: 12, kind: output, shape index: {5}]  }
   0x1   :  { %3238 = sst [smem:[#allocation6_spill]] %s3225_s0 }
   0x2   :  { %3239 = sst [smem:[#allocation7_spill]] %s3226_s1 }
   0x3   :  { %18 = vsyncpa [#allocation3], 0  ;;  %s2893_s21 = smov 0   ;;  %s2895_s22 = smov 0  }
   0x4   :  { %s2897_s23 = smov 0   ;;  %s2899_s24 = smov 0  }
   0x5   :  { %s2901_s25 = smov 0  }
   0x6 LB: > { %s2233_s26 = sadd.s32 4294967295, %s2822_s25   ;;  %s33_s27 = sadd.s32 1, %s2814_s23  ;;  %s2822_s25 = sphi %s2901_s25, %s24_s25   ;;  %s2818_s24 = sphi %s2899_s24, %s3249_s24   ;;  %s2814_s23 = sphi %s2897_s23, %s3248_s23   ;;  %s2810_s22 = sphi %s2895_s22, %s3247_s22   ;;  %s2806_s21 = sphi %s2893_s21, %s3246_s21  }
   0x7   : > { %p34_p0 = scmp.ge.s32.totalorder %s33_s27, 3  ;;  %s36_s28 = sadd.s32 1, %s2818_s24 }
   0x8   : > { %p2235_p1 = scmp.ge.s32.totalorder %s2822_s25, 1  ;;  %p378_p2 = scmp.lt.s32.totalorder %s2822_s25, 7 }
   0x9   : > { %s3251_s27 = smov (%p34_p0, %s33_s27), 0  ;;  %s3253_s28 = smov (!%p34_p0, %s36_s28), %s2818_s24 }
   0xa   : > { %p2926_p3 = pnand %p2235_p1, %p378_p2  ;;  %p38_p4 = scmp.ge.s32.totalorder %s3253_s28, 2 }
   0xb   : > { %p2930_p5 = scmp.eq.s32.totalorder %s2233_s26, 0  ;;  %s3242_s0 = sld [smem:[#allocation6_spill]] }
   0xc   : > { %p2703_p6 = pneg %p2926_p3  ;;  %s3255_s28 = smov (%p38_p4, %s3253_s28), 0 }
   0xd   : > { %3243 = sst [smem:[#allocation5_spill]] %s3255_s28 }
   0xe   : > { %p2704_p7 = pnand %p2930_p5, %p2703_p6 }
  0x10   : > { %p2767_p9 = pneg %p2704_p7 }
  0x11   : > { %s391_s15 = sshll.u32 %s3242_s0, 4  ;;  %s392_s15 = int_to_ptr.vmem [resolvable:$true] %s391_s15 }
  0x12   : > { %s2765_s16 = scalar_lea.vmem %s392_s15, 16  ;;  %p2773_p12 = scmp.lt.s32.totalorder %s392_s15, %s392_s15 }
  0x13   : > { %p2766_p8 = scmp.ne.s32.totalorder %s392_s15, %s2765_s16  ;;  %p2774_p13 = scmp.lt.s32.totalorder %s2765_s16, %s2765_s16 }
  0x15   : > { %p2768_p10 = pnand %p2767_p9, %p2766_p8  ;;  %p2775_p0 = por %p2774_p13, %p2773_p12 }
  0x17   : > { %p2769_p11 = pneg %p2768_p10 }
  0x19   : > { %p2776_p1 = pnand %p2775_p0, %p2769_p11 }
  0x1b   : > { %2779 = shalt.err (!%p2776_p1)
}
  0x1c   : > { %s2824_s17 = smov [#allocation2]   ;;  %440 = sbr.rel (%p2926_p3) target bundleno = 764 (0x2fc), region = 48 }
  0x1d   : > { %2706 = dma.vmem_to_smem (!%p2704_p7), %s392_s15, 16, %s2824_s17, [#allocation3]  }
  0x23   : > { %2801 = dma.done.wait (%p2930_p5), [#allocation3], 16  }
  0x24   : > { %2803 = vsyncadd (%p2930_p5), [#allocation3], 4294967280 }
  0x25   : > { %446 = sfence }
  0x26   : > { %p529_p2 = scmp.lt.s32.totalorder %s2810_s22, 1  ;;  %p531_p4 = scmp.lt.s32.totalorder %s2806_s21, 2  ;;  %v2825_v0 = vmov 0.0|0.0   ;;  %vm2826_vm0 = vmmov 0   ;;  %v2827_v1 = vmov 0.0   ;;  %v606_v2 = vld [vmem:[%s3229_s4] sm:$0xff] }
  0x27   : > { %2597 = vmatprep.subr.bf16.mxu0 %v2825_v0  ;;  %2391 = vmatprep.mubr.msk.f32.mxu0 %vm2826_vm0, %v2827_v1  ;;  %v607_v3 = vld [vmem:[%s3229_s4 + $0x8] sm:$0xff]  ;;  %v608_v5 = vld [vmem:[%s3229_s4 + $0x10] sm:$0xff]  ;;  %v609_v6 = vld [vmem:[%s3229_s4 + $0x18] sm:$0xff]  ;;  %s3244_s1 = sld [smem:[#allocation7_spill]]  ;;  %vm610_vm1 = vcmask 261120   ;;  %s2248_s29 = sld [smem:[#allocation2 + $0x1]] }
  0x28   : > { %s2955_s18 = scalar_select %p529_p2, %s2810_s22, 1  ;;  %2603 = vmatprep.subr.bf16.mxu1 %v2825_v0  ;;  %2408 = vmatprep.mubr.msk.f32.mxu1 %vm2826_vm0, %v2827_v1  ;;  %v2969_v4 = vpack.c.bf16 %v607_v3, %v606_v2  ;;  %v2980_v7 = vpack.c.bf16 %v609_v6, %v608_v5  ;;  %v3001_v16 = vld [vmem:[%s3228_s3] sm:$0xff]  ;;  %v604_v20 = vld [vmem:[%s3228_s3 + $0x8] sm:$0xff]  ;;  %v605_v24 = vld [vmem:[%s3228_s3 + $0x10] sm:$0x3f]  ;;  %vm1536_vm2 = vcmask 179200  }
  0x29   : > { %s2967_s30 = scalar_select %p531_p4, %s2806_s21, 2  ;;  %v1570_v41 = vld [vmem:[%s3230_s5] sm:$0xff]  ;;  %v1571_v42 = vld [vmem:[%s3230_s5 + $0x8] sm:$0xff]  ;;  %vm1894_vm3 = vcmask 130048   ;;  %vm1540_vm4 = vcmask 177152  }
  0x2a   : > { %s2689_s17 = smul.u32 12, %s2955_s18  ;;  %2605 = vmatpush3.bf16.msra.mxu1 %v2969_v4  ;;  %v1572_v62 = vld [vmem:[%s3231_s6] sm:$0xff]  ;;  %v1573_v63 = vld [vmem:[%s3231_s6 + $0x8] sm:$0xff]  ;;  %s593_s13 = sld [smem:[#allocation2]] }
  0x2b   : > { %s2240_s19 = sshll.u32 %s2967_s30, 2  ;;  %2606 = vmatprep.subr.bf16.mxu1 %v2825_v0  ;;  %v2665_v3 = vpack.c.bf16 %v1573_v63, %v1572_v62  ;;  %s2690_s14 = smul.u32 6, %s2955_s18 }
  0x2c   : > { %s535_s20 = sadd.s32 %s2689_s17, %s2240_s19 }
  0x2d   : > { %s2241_s26 = sshll.u32 %s535_s20, 3 }
  0x2e   : > { %s537_s28 = scalar_lea.vmem %s3244_s1, %s2241_s26  ;;  %2608 = vmatpush3.bf16.msra.mxu1 %v2980_v7  ;;  %s546_s15 = scalar_lea.vmem %s3227_s2, %s2241_s26 }
  0x2f   : > { %v595_v8 = vld [vmem:[%s537_s28] sm:$0xff]  ;;  %v596_v9 = vld [vmem:[%s537_s28 + $0x8] sm:$0xff]  ;;  %v597_v11 = vld [vmem:[%s537_s28 + $0x10] sm:$0xff]  ;;  %2615 = vmatprep.subr.bf16.mxu1 %v2825_v0  ;;  %s547_s26 = smul.u32 3, %s2810_s22 }
  0x30   : > { %v2990_v10 = vpack.c.bf16 %v596_v9, %v595_v8  ;;  %v598_v12 = vld [vmem:[%s537_s28 + $0x18] sm:$0xff]  ;;  %v599_v14 = vld [vmem:[%s546_s15] sm:$0xff]  ;;  %v600_v15 = vld [vmem:[%s546_s15 + $0x8] sm:$0xff]  ;;  %v958_v22 = vmul.f32 %v595_v8, %v595_v8  ;;  %v959_v23 = vmul.f32 %v596_v9, %v596_v9  ;;  %v960_v25 = vmul.f32 %v597_v11, %v597_v11 }
  0x31   : > { %v2994_v13 = vpack.c.bf16 %v598_v12, %v597_v11  ;;  %v3003_v17 = vpack.c.bf16 %v600_v15, %v599_v14  ;;  %v601_v18 = vld [vmem:[%s546_s15 + $0x10] sm:$0xff]  ;;  %v602_v19 = vld [vmem:[%s546_s15 + $0x18] sm:$0xff]  ;;  %v961_v26 = vmul.f32 %v598_v12, %v598_v12  ;;  %v1131_v29 = vmul.f32 %v599_v14, %v599_v14  ;;  %s2244_s15 = sshll.u32 %s2967_s30, 1 }
  0x32   : > { %2599 = vmatpush3.bf16.msra.mxu0 %v2990_v10  ;;  %v3014_v21 = vpack.c.bf16 %v602_v19, %v601_v18  ;;  %v2622_v27 = vpack.c.bf16 %v959_v23, %v958_v22  ;;  %v1132_v30 = vmul.f32 %v600_v15, %v600_v15  ;;  %v1133_v32 = vmul.f32 %v601_v18, %v601_v18  ;;  %s3167_s0 = sadd.s32 %s2690_s14, %s2244_s15 }
  0x33   : > { %2600 = vmatprep.subr.bf16.mxu0 %v2825_v0  ;;  %v2625_v28 = vpack.c.bf16 %v961_v26, %v960_v25  ;;  %v1134_v33 = vmul.f32 %v602_v19, %v602_v19  ;;  %v1304_v35 = vmul.f32 %v599_v14, %v595_v8  ;;  %v1305_v36 = vmul.f32 %v600_v15, %v596_v9  ;;  %s2245_s18 = sshll.u32 %s3167_s0, 3 }
  0x34   : > { %v2634_v31 = vpack.c.bf16 %v1132_v30, %v1131_v29  ;;  %v1306_v37 = vmul.f32 %v601_v18, %v597_v11  ;;  %v1307_v38 = vmul.f32 %v602_v19, %v598_v12  ;;  %s569_s28 = scalar_lea.vmem %s3234_s9, %s2245_s18  ;;  %s578_s20 = scalar_lea.vmem %s3235_s10, %s2245_s18 }
  0x35   : > { %v2637_v34 = vpack.c.bf16 %v1134_v33, %v1133_v32  ;;  %v2646_v39 = vpack.c.bf16 %v1305_v36, %v1304_v35 }
  0x36   : > { %2602 = vmatpush3.bf16.msra.mxu0 %v2994_v13  ;;  %v2649_v40 = vpack.c.bf16 %v1307_v38, %v1306_v37 }
  0x37   : > { %2609 = vmatprep.subr.bf16.mxu0 %v2825_v0 }
  0x39   : > { %2392 = vmatmul.mubr.msk.f32.vlgmr.msra.gmra.mrb[0].mxu0 %vm610_vm1, %v3001_v16 }
  0x3a   : > { %2611 = vmatpush3.bf16.msra.mxu0 %v3003_v17  ;;  %2394 = vmatprep.mubr.msk.f32.mxu0 %vm2826_vm0, %v2827_v1 }
  0x3b   : > { %2612 = vmatprep.subr.bf16.mxu0 %v2825_v0 }
  0x3d   : > { %2395 = vmatmul.mubr.msk.f32.gmra.mrb[2].mxu0 %vm610_vm1, %v604_v20 }
  0x3e   : > { %2397 = vmatprep.mubr.msk.f32.mxu0 %vm2826_vm0, %v2827_v1  ;;  %2614 = vmatpush3.bf16.msra.mxu0 %v3014_v21 }
  0x3f   : > { %2621 = vmatprep.subr.bf16.mxu0 %v2825_v0 }
  0x41   : > { %2398 = vmatmul.mubr.msk.f32.gmra.mrb[4].mxu0 %vm610_vm1, %v605_v24 }
  0x42   : > { %2425 = vmatprep.mubr.msk.f32.mxu0 %vm2826_vm0, %v2827_v1 }
  0x45   : > { %2426 = vmatmul.mubr.msk.f32.vlgmr.msra.gmra.mrb[6].mxu0 %vm610_vm1, %v3001_v16 }
  0x46   : > { %2623 = vmatpush3.bf16.msra.mxu0 %v2622_v27  ;;  %2428 = vmatprep.mubr.msk.f32.mxu0 %vm2826_vm0, %v2827_v1 }
  0x47   : > { %2624 = vmatprep.subr.bf16.mxu0 %v2825_v0 }
  0x49   : > { %2429 = vmatmul.mubr.msk.f32.gmra.mrb[8].mxu0 %vm610_vm1, %v604_v20 }
  0x4a   : > { %2431 = vmatprep.mubr.msk.f32.mxu0 %vm2826_vm0, %v2827_v1  ;;  %2626 = vmatpush3.bf16.msra.mxu0 %v2625_v28 }
  0x4b   : > { %2633 = vmatprep.subr.bf16.mxu0 %v2825_v0 }
  0x4d   : > { %2432 = vmatmul.mubr.msk.f32.gmra.mrb[10].mxu0 %vm610_vm1, %v605_v24 }
  0x4e   : > { %2459 = vmatprep.mubr.msk.f32.mxu0 %vm2826_vm0, %v2827_v1 }
  0x51   : > { %2460 = vmatmul.mubr.msk.f32.vlgmr.msra.gmra.mrb[12].mxu0 %vm610_vm1, %v3001_v16 }
  0x52   : > { %2635 = vmatpush3.bf16.msra.mxu0 %v2634_v31  ;;  %2462 = vmatprep.mubr.msk.f32.mxu0 %vm2826_vm0, %v2827_v1 }
  0x53   : > { %2636 = vmatprep.subr.bf16.mxu0 %v2825_v0 }
  0x55   : > { %2463 = vmatmul.mubr.msk.f32.gmra.mrb[14].mxu0 %vm610_vm1, %v604_v20 }
  0x56   : > { %2465 = vmatprep.mubr.msk.f32.mxu0 %vm2826_vm0, %v2827_v1  ;;  %2638 = vmatpush3.bf16.msra.mxu0 %v2637_v34 }
  0x57   : > { %2645 = vmatprep.subr.bf16.mxu0 %v2825_v0 }
  0x59   : > { %2466 = vmatmul.mubr.msk.f32.gmra.mrb[16].mxu0 %vm610_vm1, %v605_v24 }
  0x5a   : > { %2493 = vmatprep.mubr.msk.f32.mxu0 %vm2826_vm0, %v2827_v1 }
  0x5d   : > { %2494 = vmatmul.mubr.msk.f32.vlgmr.msra.gmra.mrb[18].mxu0 %vm610_vm1, %v3001_v16 }
  0x5e   : > { %2647 = vmatpush3.bf16.msra.mxu0 %v2646_v39  ;;  %2496 = vmatprep.mubr.msk.f32.mxu0 %vm2826_vm0, %v2827_v1 }
  0x5f   : > { %2648 = vmatprep.subr.bf16.mxu0 %v2825_v0 }
  0x61   : > { %2497 = vmatmul.mubr.msk.f32.gmra.mrb[20].mxu0 %vm610_vm1, %v604_v20 }
  0x62   : > { %2499 = vmatprep.mubr.msk.f32.mxu0 %vm2826_vm0, %v2827_v1  ;;  %2650 = vmatpush3.bf16.msra.mxu0 %v2649_v40 }
  0x63   : > { %2658 = vmatprep.subr.bf16.mxu0 %v2990_v10 }
  0x65   : > { %2500 = vmatmul.mubr.msk.f32.gmra.mrb[22].mxu0 %vm610_vm1, %v605_v24 }
  0x66   : > { %2527 = vmatprep.mubr.msk.f32.mxu0 %vm2826_vm0, %v2827_v1 }
  0x69   : > { %2528 = vmatmul.mubr.msk.f32.vlgmr.msra.gmra.mrb[24].mxu0 %vm610_vm1, %v3001_v16 }
  0x6a   : > { %2530 = vmatprep.mubr.msk.f32.mxu0 %vm2826_vm0, %v2827_v1  ;;  %2660 = vmatpush3.bf16.msra.mxu0 %v2990_v10 }
  0x6b   : > { %2662 = vmatprep.subr.bf16.mxu0 %v2994_v13 }
  0x6d   : > { %2531 = vmatmul.mubr.msk.f32.gmra.mrb[26].mxu0 %vm610_vm1, %v604_v20 }
  0x6e   : > { %2533 = vmatprep.mubr.msk.f32.mxu0 %vm2826_vm0, %v2827_v1  ;;  %2664 = vmatpush3.bf16.msra.mxu0 %v2994_v13 }
  0x6f   : > { %2674 = vmatprep.subr.bf16.mxu0 %v3003_v17 }
  0x71   : > { %2534 = vmatmul.mubr.msk.f32.gmra.mrb[28].mxu0 %vm610_vm1, %v605_v24 }
  0x72   : > { %2561 = vmatprep.mubr.msk.f32.mxu0 %vm610_vm1, %v1570_v41 }
  0x75   : > { %2562 = vmatmul.mubr.msk.f32.vlgmr.msra.gmra.mrb[30].mxu0 %vm610_vm1, %v1571_v42 }
  0x76   : > { %2676 = vmatpush3.bf16.msra.mxu0 %v3003_v17  ;;  %2583 = vmatprep.mubr.msk.f32.mxu0 %vm610_vm1, %v1570_v41 }
  0x77   : > { %2678 = vmatprep.subr.bf16.mxu0 %v3014_v21 }
  0x7a   : > { %2680 = vmatpush3.bf16.msra.mxu0 %v3014_v21 }
  0x7d   : > { %2584 = vmatmul.mubr.msk.f32.vlgmr.msra.gmra.mrb[32].mxu0 %vm610_vm1, %v1571_v42 }
 0x10c   : > { %v686_v43 = vpop.f32.mrb[0].mxu0 }
 0x10d   : > { %v2393_v44 = vpop.f32.mrb[1].mxu0  ;;  %2409 = vmatmul.mubr.msk.f32.vlgmr.msra.gmra.mrb[0].mxu1 %vm610_vm1, %v686_v43 }
 0x10e   : > { %2617 = vmatpush3.bf16.msra.mxu1 %v2969_v4  ;;  %2411 = vmatprep.mubr.msk.f32.mxu1 %vm2826_vm0, %v2827_v1 }
 0x10f   : > { %2618 = vmatprep.subr.bf16.mxu1 %v2825_v0 }
 0x110   : > { %v691_v45 = vpop.f32.mrb[2].mxu0 }
 0x111   : > { %v2396_v46 = vpop.f32.mrb[3].mxu0  ;;  %2412 = vmatmul.mubr.msk.f32.gmra.mrb[2].mxu1 %vm610_vm1, %v691_v45 }
 0x112   : > { %2414 = vmatprep.mubr.msk.f32.mxu1 %vm2826_vm0, %v2827_v1  ;;  %2620 = vmatpush3.bf16.msra.mxu1 %v2980_v7 }
 0x113   : > { %2627 = vmatprep.subr.bf16.mxu1 %v2825_v0 }
 0x114   : > { %v696_v47 = vpop.f32.mrb[4].mxu0 }
 0x115   : > { %v2399_v48 = vpop.f32.mrb[5].mxu0  ;;  %2415 = vmatmul.mubr.msk.f32.gmra.mrb[4].mxu1 %vm610_vm1, %v696_v47 }
 0x116   : > { %2442 = vmatprep.mubr.msk.f32.mxu1 %vm2826_vm0, %v2827_v1 }
 0x118   : > { %v855_v49 = vpop.f32.mrb[6].mxu0 }
 0x119   : > { %v2427_v50 = vpop.f32.mrb[7].mxu0  ;;  %2443 = vmatmul.mubr.msk.f32.vlgmr.msra.gmra.mrb[6].mxu1 %vm610_vm1, %v855_v49 }
 0x11a   : > { %2629 = vmatpush3.bf16.msra.mxu1 %v2969_v4  ;;  %2445 = vmatprep.mubr.msk.f32.mxu1 %vm2826_vm0, %v2827_v1 }
 0x11b   : > { %2630 = vmatprep.subr.bf16.mxu1 %v2825_v0 }
 0x11c   : > { %v860_v51 = vpop.f32.mrb[8].mxu0 }
 0x11d   : > { %v2430_v52 = vpop.f32.mrb[9].mxu0  ;;  %2446 = vmatmul.mubr.msk.f32.gmra.mrb[8].mxu1 %vm610_vm1, %v860_v51 }
 0x11e   : > { %2448 = vmatprep.mubr.msk.f32.mxu1 %vm2826_vm0, %v2827_v1  ;;  %2632 = vmatpush3.bf16.msra.mxu1 %v2980_v7 }
 0x11f   : > { %2639 = vmatprep.subr.bf16.mxu1 %v2825_v0 }
 0x120   : > { %v865_v53 = vpop.f32.mrb[10].mxu0 }
 0x121   : > { %v2433_v54 = vpop.f32.mrb[11].mxu0  ;;  %2449 = vmatmul.mubr.msk.f32.gmra.mrb[10].mxu1 %vm610_vm1, %v865_v53 }
 0x122   : > { %2476 = vmatprep.mubr.msk.f32.mxu1 %vm2826_vm0, %v2827_v1 }
 0x124   : > { %v1028_v55 = vpop.f32.mrb[12].mxu0 }
 0x125   : > { %v2461_v56 = vpop.f32.mrb[13].mxu0  ;;  %2477 = vmatmul.mubr.msk.f32.vlgmr.msra.gmra.mrb[12].mxu1 %vm610_vm1, %v1028_v55  ;;  %v1498_v55 = vstv %s2248_s29  ;;  %s548_s29 = sadd.s32 %s2806_s21, %s547_s26 }
 0x126   : > { %2641 = vmatpush3.bf16.msra.mxu1 %v2969_v4  ;;  %2479 = vmatprep.mubr.msk.f32.mxu1 %vm2826_vm0, %v2827_v1  ;;  %p549_p3 = scmp.lt.s32.totalorder %s548_s29, 5 }
 0x127   : > { %2642 = vmatprep.subr.bf16.mxu1 %v2825_v0 }
 0x128   : > { %v1033_v57 = vpop.f32.mrb[14].mxu0  ;;  %s3257_s29 = smov (!%p549_p3, %s548_s29), 5 }
 0x129   : > { %v2464_v58 = vpop.f32.mrb[15].mxu0  ;;  %2480 = vmatmul.mubr.msk.f32.gmra.mrb[14].mxu1 %vm610_vm1, %v1033_v57  ;;  %s551_s15 = scalar_lea.vmem %s3232_s7, %s3257_s29  ;;  %s558_s16 = scalar_lea.vmem %s3233_s8, %s3257_s29 }
 0x12a   : > { %2482 = vmatprep.mubr.msk.f32.mxu1 %vm2826_vm0, %v2827_v1  ;;  %2644 = vmatpush3.bf16.msra.mxu1 %v2980_v7  ;;  %v1517_v58 = vstv %s593_s13  ;;  %s590_s1 = scalar_lea.vmem %s3237_s12, %s3257_s29 }
 0x12b   : > { %2651 = vmatprep.subr.bf16.mxu1 %v2825_v0 }
 0x12c   : > { %v1038_v59 = vpop.f32.mrb[16].mxu0 }
 0x12d   : > { %v2467_v60 = vpop.f32.mrb[17].mxu0  ;;  %2483 = vmatmul.mubr.msk.f32.gmra.mrb[16].mxu1 %vm610_vm1, %v1038_v59 }
 0x12e   : > { %2510 = vmatprep.mubr.msk.f32.mxu1 %vm2826_vm0, %v2827_v1 }
 0x130   : > { %v1201_v61 = vpop.f32.mrb[18].mxu0 }
 0x131   : > { %v2495_v2 = vpop.f32.mrb[19].mxu0  ;;  %2511 = vmatmul.mubr.msk.f32.vlgmr.msra.gmra.mrb[18].mxu1 %vm610_vm1, %v1201_v61 }
 0x132   : > { %2653 = vmatpush3.bf16.msra.mxu1 %v2969_v4  ;;  %2513 = vmatprep.mubr.msk.f32.mxu1 %vm2826_vm0, %v2827_v1  ;;  %v1574_v4 = vld [vmem:[%s3231_s6 + $0x10] sm:$0xff] }
 0x133   : > { %2654 = vmatprep.subr.bf16.mxu1 %v2825_v0  ;;  %v1575_v0 = vld [vmem:[%s3231_s6 + $0x18] sm:$0xff] }
 0x134   : > { %v1206_v5 = vpop.f32.mrb[20].mxu0  ;;  %v2669_v10 = vpack.c.bf16 %v1575_v0, %v1574_v4 }
 0x135   : > { %v2498_v6 = vpop.f32.mrb[21].mxu0  ;;  %2514 = vmatmul.mubr.msk.f32.gmra.mrb[20].mxu1 %vm610_vm1, %v1206_v5 }
 0x136   : > { %2516 = vmatprep.mubr.msk.f32.mxu1 %vm2826_vm0, %v2827_v1  ;;  %2656 = vmatpush3.bf16.msra.mxu1 %v2980_v7 }
 0x137   : > { %2666 = vmatprep.subr.bf16.mxu1 %v2665_v3 }
 0x138   : > { %v1211_v8 = vpop.f32.mrb[22].mxu0 }
 0x139   : > { %v2501_v9 = vpop.f32.mrb[23].mxu0  ;;  %2517 = vmatmul.mubr.msk.f32.gmra.mrb[22].mxu1 %vm610_vm1, %v1211_v8 }
 0x13a   : > { %2544 = vmatprep.mubr.msk.f32.mxu1 %vm2826_vm0, %v2827_v1 }
 0x13c   : > { %v1374_v11 = vpop.f32.mrb[24].mxu0 }
 0x13d   : > { %v2529_v12 = vpop.f32.mrb[25].mxu0  ;;  %2545 = vmatmul.mubr.msk.f32.vlgmr.msra.gmra.mrb[24].mxu1 %vm610_vm1, %v1374_v11 }
 0x13e   : > { %2547 = vmatprep.mubr.msk.f32.mxu1 %vm2826_vm0, %v2827_v1  ;;  %2668 = vmatpush3.bf16.msra.mxu1 %v2665_v3 }
 0x13f   : > { %2670 = vmatprep.subr.bf16.mxu1 %v2669_v10 }
 0x140   : > { %v1379_v7 = vpop.f32.mrb[26].mxu0 }
 0x141   : > { %v2532_v13 = vpop.f32.mrb[27].mxu0  ;;  %2548 = vmatmul.mubr.msk.f32.gmra.mrb[26].mxu1 %vm610_vm1, %v1379_v7 }
 0x142   : > { %2550 = vmatprep.mubr.msk.f32.mxu1 %vm2826_vm0, %v2827_v1  ;;  %2672 = vmatpush3.bf16.msra.mxu1 %v2669_v10 }
 0x143   : > { %2682 = vmatprep.subr.bf16.mxu1 %v2665_v3 }
 0x144   : > { %v1384_v14 = vpop.f32.mrb[28].mxu0 }
 0x145   : > { %v2535_v15 = vpop.f32.mrb[29].mxu0  ;;  %2551 = vmatmul.mubr.msk.f32.gmra.mrb[28].mxu1 %vm610_vm1, %v1384_v14 }
 0x148   : > { %v2563_v16 = vpop.f32.mrb[30].mxu0 }
 0x149   : > { %v1648_v17 = vpop.f32.mrb[31].mxu0 }
 0x14a   : > { %2572 = vmatprep.mubr.msk.f32.mxu1 %vm610_vm1, %v1648_v17 }
 0x14b   : > { %2573 = vmatmul.mubr.msk.f32.vlgmr.msra.gmra.mrb[30].mxu1 %vm610_vm1, %v2563_v16 }
 0x14c   : > { %2684 = vmatpush3.bf16.msra.mxu1 %v2665_v3 }
 0x14d   : > { %2686 = vmatprep.subr.bf16.mxu1 %v2669_v10 }
 0x150   : > { %2688 = vmatpush3.bf16.msra.mxu1 %v2669_v10  ;;  %v2585_v18 = vpop.f32.mrb[32].mxu0 }
 0x151   : > { %v1804_v19 = vpop.f32.mrb[33].mxu0 }
 0x152   : > { %2594 = vmatprep.mubr.msk.f32.mxu1 %vm610_vm1, %v1804_v19 }
 0x153   : > { %2595 = vmatmul.mubr.msk.f32.vlgmr.msra.gmra.mrb[32].mxu1 %vm610_vm1, %v2585_v18 }
 0x1e0   : > { %v775_v1 = vpop.f32.mrb[0].mxu1 }
 0x1e1   : > { %v2410_v20 = vpop.f32.mrb[1].mxu1  ;;  %v1477_v26 = vmul.f32 %v775_v1, %v775_v1 }
 0x1e4   : > { %v780_v21 = vpop.f32.mrb[2].mxu1 }
 0x1e5   : > { %v2413_v22 = vpop.f32.mrb[3].mxu1  ;;  %v1478_v32 = vmul.f32 %v780_v21, %v780_v21 }
 0x1e8   : > { %v785_v23 = vpop.f32.mrb[4].mxu1 }
 0x1e9   : > { %v2416_v24 = vpop.f32.mrb[5].mxu1  ;;  %v1479_v38 = vmul.f32 %v785_v23, %v785_v23 }
 0x1ec   : > { %v944_v25 = vpop.f32.mrb[6].mxu1 }
 0x1ed   : > { %v1480_v27 = vmul.f32 %v944_v25, %v944_v25  ;;  %v1483_v28 = vmul.f32 %v944_v25, %v775_v1  ;;  %v2444_v29 = vpop.f32.mrb[7].mxu1 }
 0x1ef   : > { %v1524_v30 = vadd.f32 %v1480_v27, %v1477_v26  ;;  %v1514_v12 = vmul.f32 2.0, %v1483_v28 }
 0x1f0   : > { %v949_v31 = vpop.f32.mrb[8].mxu1 }
 0x1f1   : > { %v1481_v33 = vmul.f32 %v949_v31, %v949_v31  ;;  %v1484_v34 = vmul.f32 %v949_v31, %v780_v21  ;;  %v2447_v35 = vpop.f32.mrb[9].mxu1  ;;  %v1527_v63 = vadd.f32 %v1524_v30, %v1517_v58  ;;  %v1518_v19 = vadd.f32 %v1517_v58, %v1514_v12 }
 0x1f3   : > { %v1525_v36 = vadd.f32 %v1481_v33, %v1478_v32  ;;  %v1515_v1 = vmul.f32 2.0, %v1484_v34 }
 0x1f4   : > { %v954_v37 = vpop.f32.mrb[10].mxu1 }
 0x1f5   : > { %v1482_v39 = vmul.f32 %v954_v37, %v954_v37  ;;  %v3163_v40 = vmul.f32 %v954_v37, %v785_v23  ;;  %v2450_v41 = vpop.f32.mrb[11].mxu1  ;;  %v1528_v4 = vadd.f32 %v1525_v36, %v1517_v58  ;;  %v1519_v30 = vadd.f32 %v1517_v58, %v1515_v1 }
 0x1f7   : > { %v1526_v42 = vadd.f32 %v1482_v39, %v1479_v38  ;;  %v1516_v29 = vmul.f32 2.0, %v3163_v40 }
 0x1f8   : > { %v1117_v43 = vpop.f32.mrb[12].mxu1 }
 0x1f9   : > { %v1486_v44 = vsub.f32 %v1117_v43, %v1477_v26  ;;  %v2478_v45 = vpop.f32.mrb[13].mxu1  ;;  %v1529_v13 = vadd.f32 %v1526_v42, %v1517_v58 }
 0x1fc   : > { %v1122_v46 = vpop.f32.mrb[14].mxu1 }
 0x1fd   : > { %v1487_v47 = vsub.f32 %v1122_v46, %v1478_v32  ;;  %v2481_v48 = vpop.f32.mrb[15].mxu1 }
 0x200   : > { %v1127_v49 = vpop.f32.mrb[16].mxu1 }
 0x201   : > { %v1488_v50 = vsub.f32 %v1127_v49, %v1479_v38  ;;  %v2484_v51 = vpop.f32.mrb[17].mxu1 }
 0x204   : > { %v1290_v52 = vpop.f32.mrb[18].mxu1 }
 0x205   : > { %v1489_v53 = vsub.f32 %v1290_v52, %v1480_v27  ;;  %v2512_v54 = vpop.f32.mrb[19].mxu1 }
 0x207   : > { %v1502_v56 = vadd.f32 %v1489_v53, %v1486_v44 }
 0x208   : > { %v1295_v57 = vpop.f32.mrb[20].mxu1 }
 0x209   : > { %v1505_v59 = vadd.f32 %v1502_v56, %v1498_v55  ;;  %v1490_v60 = vsub.f32 %v1295_v57, %v1481_v33  ;;  %v2515_v61 = vpop.f32.mrb[21].mxu1 }
 0x20b   : > { %2753 = vrcp.f32 %v1505_v59  ;;  %v1503_v62 = vadd.f32 %v1490_v60, %v1487_v47 }
 0x20c   : > { %v1300_v2 = vpop.f32.mrb[22].mxu1 }
 0x20d   : > { %v1506_v3 = vadd.f32 %v1503_v62, %v1498_v55  ;;  %v1491_v5 = vsub.f32 %v1300_v2, %v1482_v39  ;;  %v2518_v6 = vpop.f32.mrb[23].mxu1 }
 0x20f   : > { %2755 = vrcp.f32 %v1506_v3  ;;  %v1504_v8 = vadd.f32 %v1491_v5, %v1488_v50 }
 0x210   : > { %2757 = vrcp.f32 %v1527_v63  ;;  %v1463_v0 = vpop.f32.mrb[24].mxu1 }
 0x211   : > { %v1507_v9 = vadd.f32 %v1504_v8, %v1498_v55  ;;  %v1492_v10 = vsub.f32 %v1463_v0, %v1483_v28  ;;  %v2546_v11 = vpop.f32.mrb[25].mxu1 }
 0x213   : > { %2759 = vrcp.f32 %v1507_v9  ;;  %v1495_v7 = vmul.f32 2.0, %v1492_v10 }
 0x214   : > { %2761 = vrcp.f32 %v1528_v4  ;;  %v1468_v14 = vpop.f32.mrb[26].mxu1 }
 0x215   : > { %v2754_v15 = vpop.eup %2753  ;;  %v1499_v16 = vadd.f32 %v1498_v55, %v1495_v7  ;;  %v1493_v17 = vsub.f32 %v1468_v14, %v1484_v34  ;;  %v2549_v18 = vpop.f32.mrb[27].mxu1  ;;  %2763 = vrcp.f32 %v1529_v13 }
 0x217   : > { %v1511_v20 = vmul.f32 %v2754_v15, %v1499_v16  ;;  %v1496_v21 = vmul.f32 2.0, %v1493_v17 }
 0x218   : > { %v1473_v22 = vpop.f32.mrb[28].mxu1 }
 0x219   : > { %v2756_v23 = vpop.eup %2755  ;;  %v1500_v24 = vadd.f32 %v1498_v55, %v1496_v21  ;;  %v1494_v25 = vsub.f32 %v1473_v22, %v3163_v40  ;;  %v2552_v26 = vpop.f32.mrb[29].mxu1  ;;  %v1521_v27 = vmul.f32 %v1518_v19, %v1511_v20  ;;  %v1554_v37 = vsel %vm1536_vm2, %v1511_v20, 0.0 }
 0x21a   : > { %v2758_v28 = vpop.eup %2757  ;;  %v1520_v40 = vadd.f32 %v1517_v58, %v1516_v29 }
 0x21b   : > { %v1512_v31 = vmul.f32 %v2756_v23, %v1500_v24  ;;  %v1497_v32 = vmul.f32 2.0, %v1494_v25  ;;  %v1533_v33 = vmul.f32 %v2758_v28, %v1521_v27 }
 0x21d   : > { %v2760_v34 = vpop.eup %2759  ;;  %v1501_v35 = vadd.f32 %v1498_v55, %v1497_v32  ;;  %v1522_v36 = vmul.f32 %v1519_v30, %v1512_v31  ;;  %v1555_v38 = vsel %vm1536_vm2, %v1512_v31, 0.0  ;;  %v1537_v50 = vsel %vm1536_vm2, %v1533_v33, 0.0 }
 0x21e   : > { %v2762_v39 = vpop.eup %2761  ;;  %v2574_v41 = vpop.f32.mrb[30].mxu1  ;;  %v1556_v42 = vadd.f32 %v1555_v38, %v1554_v37 }
 0x21f   : > { %v1513_v43 = vmul.f32 %v2760_v34, %v1501_v35  ;;  %1896 = vst.msk [vmem:[%s569_s28 + $0x8] sm:$0xff] %vm1894_vm3, %v2574_v41  ;;  %v1729_v44 = vpop.f32.mrb[31].mxu1  ;;  %v1900_v45 = vsel %vm1894_vm3, %v2574_v41, -inf  ;;  %v1914_v46 = vsel %vm1894_vm3, %v2574_v41, inf  ;;  %v1534_v47 = vmul.f32 %v2762_v39, %v1522_v36  ;;  %v2764_v55 = vpop.eup %2763 }
 0x220   : > { %1895 = vst.msk [vmem:[%s569_s28] sm:$0xff] %vm1894_vm3, %v1729_v44  ;;  %v1899_v48 = vsel %vm1894_vm3, %v1729_v44, -inf  ;;  %v1913_v49 = vsel %vm1894_vm3, %v1729_v44, inf }
 0x221   : > { %v1901_v51 = vmax.f32 %v1899_v48, %v1900_v45  ;;  %v1915_v52 = vmin.f32 %v1913_v49, %v1914_v46  ;;  %v1523_v53 = vmul.f32 %v1520_v40, %v1513_v43  ;;  %v1538_v54 = vsel %vm1536_vm2, %v1534_v47, 0.0 }
 0x222   : > { %v1539_v56 = vadd.f32 %v1538_v54, %v1537_v50  ;;  %v1557_v57 = vsel %vm1540_vm4, %v1513_v43, 0.0 }
 0x223   : > { %1902 = vmax.xlane.f32.xlu1 %v1901_v51  ;;  %v1535_v58 = vmul.f32 %v2764_v55, %v1523_v53  ;;  %v1558_v59 = vadd.f32 %v1557_v57, %v1556_v42 }
 0x225   : > { %v1541_v60 = vsel %vm1540_vm4, %v1535_v58, 0.0 }
 0x226   : > { %v1542_v61 = vadd.f32 %v1541_v60, %v1539_v56  ;;  %v2596_v62 = vpop.f32.mrb[32].mxu1 }
 0x227   : > { %1916 = vmin.xlane.f32.xlu1 %v1915_v52  ;;  %1898 = vst.msk [vmem:[%s578_s20 + $0x8] sm:$0xff] %vm1894_vm3, %v2596_v62  ;;  %v1885_v63 = vpop.f32.mrb[33].mxu1 }
 0x228   : > { %1543 = vadd.xlane.f32.xlu0 %v1542_v61  ;;  %1897 = vst.msk [vmem:[%s578_s20] sm:$0xff] %vm1894_vm3, %v1885_v63  ;;  %s583_s20 = scalar_lea.vmem %s3236_s11, %s3257_s29 }
 0x22c   : > { %1559 = vadd.xlane.f32.xlu0 %v1558_v59 }
 0x2b0   : > { %v1903_v2 = vpop.xlane.xlu1 %1902 }
 0x2b1   : > { %v1904_v3 = vrot.slane %v1903_v2, 4 }
 0x2b3   : > { %v1905_v6 = vmax.f32 %v1903_v2, %v1904_v3 }
 0x2b4   : > { %v1917_v5 = vpop.xlane.xlu1 %1916 }
 0x2b5   : > { %v1918_v8 = vrot.slane %v1917_v5, 4  ;;  %v1544_v4 = vpop.xlane.xlu0 %1543  ;;  %v1906_v11 = vrot.slane %v1905_v6, 2 }
 0x2b6   : > { %v1545_v0 = vrot.slane %v1544_v4, 4 }
 0x2b7   : > { %v1919_v9 = vmin.f32 %v1917_v5, %v1918_v8  ;;  %v1907_v17 = vmax.f32 %v1905_v6, %v1906_v11 }
 0x2b8   : > { %v1546_v10 = vadd.f32 %v1545_v0, %v1544_v4 }
 0x2b9   : > { %v1560_v12 = vpop.xlane.xlu0 %1559  ;;  %v1920_v7 = vrot.slane %v1919_v9, 2  ;;  %v1908_v22 = vrot.slane %v1907_v17, 1 }
 0x2ba   : > { %v1547_v13 = vrot.slane %v1546_v10, 2  ;;  %v1561_v14 = vrot.slane %v1560_v12, 4 }
 0x2bb   : > { %v1921_v18 = vmin.f32 %v1919_v9, %v1920_v7  ;;  %v1909_v26 = vmax.f32 %v1907_v17, %v1908_v22 }
 0x2bc   : > { %v1562_v15 = vadd.f32 %v1561_v14, %v1560_v12  ;;  %v1548_v16 = vadd.f32 %v1547_v13, %v1546_v10 }
 0x2bd   : > { %v1922_v24 = vrot.slane %v1921_v18, 1 }
 0x2be   : > { %v1563_v19 = vrot.slane %v1562_v15, 2  ;;  %v1549_v1 = vrot.slane %v1548_v16, 1 }
 0x2bf   : > { %v1923_v27 = vmin.f32 %v1921_v18, %v1922_v24 }
 0x2c0   : > { %v1564_v20 = vadd.f32 %v1563_v19, %v1562_v15  ;;  %v1550_v21 = vadd.f32 %v1549_v1, %v1548_v16 }
 0x2c2   : > { %2691 = vpush %v1550_v21  ;;  %v1565_v23 = vrot.slane %v1564_v20, 1 }
 0x2c4   : > { %v1566_v25 = vadd.f32 %v1565_v23, %v1564_v20 }
 0x2c6   : > { %2693 = vpush %v1566_v25 }
 0x2c7   : > { %2695 = vpush %v1909_v26 }
 0x2c8   : > { %2697 = vpush %v1923_v27 }
 0x2f3   : > { %s2692_s0 = spop %2691 }
 0x2f4   : > { %v1552_v28 = vstv %s2692_s0 }
 0x2f5   : > { %1553 = vst [vmem:[%s551_s15] sm:$0x1] %v1552_v28 }
 0x2f7   : > { %s2694_s28 = spop %2693 }
 0x2f8   : > { %v1568_v29 = vstv %s2694_s28  ;;  %s2696_s21 = spop %2695 }
 0x2f9   : > { %1569 = vst [vmem:[%s558_s16] sm:$0x1] %v1568_v29  ;;  %v1911_v30 = vstv %s2696_s21  ;;  %s2698_s13 = spop %2697 }
 0x2fa   : > { %1912 = vst [vmem:[%s583_s20] sm:$0x1] %v1911_v30  ;;  %v1925_v31 = vstv %s2698_s13 }
 0x2fb   : > { %1926 = vst [vmem:[%s590_s1] sm:$0x1] %v1925_v31 }
 0x2fc PF: > { %s24_s25 = sadd.s32 1, %s2822_s25   ;;  %s3245_s14 = sld [smem:[#allocation5_spill]] }
 0x2fd   : > { %p21_p5 = scmp.ge.s32.totalorder %s24_s25, 8   ;;  %s3246_s21 = smov %s2814_s23 }
 0x2fe   : > { %s3247_s22 = smov %s2818_s24  ;;  %s3248_s23 = smov %s3251_s27 }
 0x2ff   :  { %23 = sbr.rel (!%p21_p5) target bundleno = 6 (0x6), region = 146 }
 0x302   : > { %s3249_s24 = smov %s3245_s14 }
 0x306   :  { %2052 = vsyncpa [#allocation3], 1 }
 0x307   :  { %2054 = vsyncpa [#allocation3 + $0x1], 1 }

// kernel: _lambda_.2
= control target key start
LH: loop header
LB: loop body
LE: loop exit
PB: predicated region body
PF: predicated region fallthrough
CT: control target
= control target key end

     0   :  { %s5087_s0 = inlined_call_operand.vmem [shape: f32[2], index: 0, kind: input, shape index: {}]   ;;  %s5088_s1 = inlined_call_operand.vmem [shape: f32[2,3,64,64], index: 1, kind: input, shape index: {}]   ;;  %s5089_s2 = inlined_call_operand.hbm [shape: f32[2,3,64,64], index: 2, kind: input, shape index: {}]   ;;  %s5090_s3 = inlined_call_operand.hbm [shape: f32[54,64], index: 3, kind: input, shape index: {}]   ;;  %s5091_s4 = inlined_call_operand.vmem [shape: f32[64,54], index: 4, kind: input, shape index: {}]   ;;  %s5092_s5 = inlined_call_operand.vmem [shape: f32[32,64], index: 5, kind: input, shape index: {}]   ;;  %s5093_s6 = inlined_call_operand.hbm [shape: f32[64,32], index: 6, kind: input, shape index: {}]   ;;  %s5094_s7 = inlined_call_operand.vmem [shape: f32[6,1,128], index: 7, kind: output, shape index: {0}]   ;;  %s5095_s8 = inlined_call_operand.vmem [shape: f32[6,1,128], index: 8, kind: output, shape index: {1}]   ;;  %s5096_s9 = inlined_call_operand.vmem [shape: f32[2,3,32,32], index: 9, kind: output, shape index: {2}]   ;;  %s5097_s10 = inlined_call_operand.vmem [shape: f32[2,3,32,32], index: 10, kind: output, shape index: {3}]   ;;  %s5098_s11 = inlined_call_operand.vmem [shape: f32[6,1,128], index: 11, kind: output, shape index: {4}]   ;;  %s5099_s12 = inlined_call_operand.vmem [shape: f32[6,1,128], index: 12, kind: output, shape index: {5}]  }
   0x1   :  { %5111 = sst [smem:[#allocation15_spill]] %s5087_s0 }
   0x2   :  { %5112 = sst [smem:[#allocation16_spill]] %s5090_s3 }
   0x3   :  { %5113 = sst [smem:[#allocation17_spill]] %s5093_s6 }
   0x4   :  { %5114 = sst [smem:[#allocation18_spill]] %s5094_s7 }
   0x5   :  { %5115 = sst [smem:[#allocation19_spill]] %s5095_s8 }
   0x6   :  { %5116 = sst [smem:[#allocation20_spill]] %s5096_s9 }
   0x7   :  { %5117 = sst [smem:[#allocation21_spill]] %s5097_s10 }
   0x8   :  { %5118 = sst [smem:[#allocation22_spill]] %s5098_s11 }
   0x9   :  { %5119 = sst [smem:[#allocation23_spill]] %s5099_s12 }
   0xa   :  { %18 = vsyncpa [#allocation4], 0 }
   0xb   :  { %19 = vsyncpa [#allocation3], 0 }
   0xc   :  { %21 = vsyncpa [#allocation3 + $0x1], 0 }
   0xd   :  { %22 = vsyncpa [#allocation7], 0  ;;  %s4111_s21 = smov 0   ;;  %s4113_s22 = smov 0  }
   0xe   :  { %s4115_s23 = smov 0   ;;  %s4117_s24 = smov 0  }
   0xf   :  { %s4119_s25 = smov 0   ;;  %s4121_s26 = smov 0  }
  0x10   :  { %s4123_s27 = smov 0   ;;  %s4125_s28 = smov 0  }
  0x11 LB: > { %5120 = sst [smem:[#allocation12_spill]] %s4035_s28  ;;  %s2764_s29 = sadd.s32 4294967295, %s4035_s28   ;;  %s4035_s28 = sphi %s4125_s28, %s28_s28   ;;  %s4031_s27 = sphi %s4123_s27, %s5152_s27   ;;  %s4027_s26 = sphi %s4121_s26, %s5151_s26   ;;  %s4023_s25 = sphi %s4119_s25, %s5150_s25   ;;  %s4019_s24 = sphi %s4117_s24, %s5149_s24   ;;  %s4015_s23 = sphi %s4115_s23, %s5148_s23   ;;  %s4011_s22 = sphi %s4113_s22, %s5147_s22   ;;  %s4007_s21 = sphi %s4111_s21, %s5146_s21  }
  0x12   : > { %p111_p0 = scmp.ne.s32.totalorder %s4011_s22, %s4007_s21  ;;  %p4151_p1 = scmp.eq.s32.totalorder %s2764_s29, 0 }
  0x13   : > { %p2766_p2 = scmp.ge.s32.totalorder %s4035_s28, 1  ;;  %p382_p3 = scmp.lt.s32.totalorder %s4035_s28, 7 }
  0x14   : > { %s5121_s30 = scalar_select %p4151_p1, 1, 0 }
  0x15   : > { %p4159_p4 = por %p4151_p1, %p111_p0  ;;  %p4163_p5 = pnand %p2766_p2, %p382_p3 }
  0x16   : > { %s4037_s15 = smov [#allocation6]   ;;  %s5125_s0 = sld [smem:[#allocation15_spill]] }
  0x17   : > { %s5122_s13 = scalar_select %p4159_p4, 1, 0 }
  0x18   : > { %s5123_s14 = scalar_select %p4163_p5, 1, 0 }
  0x19   : > { %s405_s16 = sshll.u32 %s4037_s15, 4  ;;  %p3739_p6 = pneg %p4163_p5  ;;  %s406_s16 = int_to_ptr.vmem [resolvable:$true] %s405_s16 }
  0x1a   : > { %s5126_s3 = sld [smem:[#allocation16_spill]] }
  0x1b   : > { %p4171_p7 = pnand %p3739_p6, %p4151_p1 }
  0x1c   : > { %s395_s20 = sshll.u32 %s5125_s0, 4  ;;  %s396_s20 = int_to_ptr.vmem [resolvable:$true] %s395_s20 }
  0x1d   : > { %p4186_p9 = pneg %p4171_p7 }
  0x20   : > { %s3860_s12 = scalar_lea.hbm %s5126_s3, 896 }
  0x21   : > { %p3861_p8 = scmp.ne.s32.totalorder %s5126_s3, %s3860_s12  ;;  %p3867_p12 = scmp.lt.u32.totalorder %s3860_s12, %s5126_s3 }
  0x23   : > { %p3863_p10 = pnand %p4186_p9, %p3861_p8 }
  0x25   : > { %p3864_p11 = pneg %p3863_p10 }
  0x27   : > { %p3869_p13 = pnand %p3867_p12, %p3864_p11 }
  0x29   : > { %3872 = shalt.err (!%p3869_p13)
}
  0x2a   : > { %s3873_s21 = scalar_lea.vmem %s406_s16, 896  ;;  %p3881_p6 = scmp.lt.s32.totalorder %s406_s16, %s406_s16 }
  0x2b   : > { %p3874_p0 = scmp.ne.s32.totalorder %s406_s16, %s3873_s21  ;;  %p3882_p4 = scmp.lt.s32.totalorder %s3873_s21, %s3873_s21 }
  0x2d   : > { %p3876_p2 = pnand %p3874_p0, %p4186_p9  ;;  %p3883_p1 = por %p3882_p4, %p3881_p6 }
  0x2f   : > { %p3877_p3 = pneg %p3876_p2 }
  0x31   : > { %p3884_p5 = pnand %p3883_p1, %p3877_p3 }
  0x33   : > { %3887 = shalt.err (!%p3884_p5)
}
  0x34   : > { %s5104_s8 = smov 128   ;;  %s5106_s11 = smov 8  }
  0x35   : > { %3745 = dma.hbm_to_vmem [thread:$0]  (!%p4171_p7), %s5126_s3, 896, %s406_s16, [#allocation7], %s5104_s8, %s5104_s8, %s5106_s11  }
  0x36   : > { %s3888_s18 = scalar_lea.vmem %s396_s20, 16  ;;  %p3896_p1 = scmp.lt.s32.totalorder %s396_s20, %s396_s20 }
  0x37   : > { %p3889_p8 = scmp.ne.s32.totalorder %s396_s20, %s3888_s18  ;;  %p3897_p5 = scmp.lt.s32.totalorder %s3888_s18, %s3888_s18 }
  0x39   : > { %p3891_p10 = pnand %p3889_p8, %p4186_p9  ;;  %p3898_p11 = por %p3897_p5, %p3896_p1 }
  0x3b   : > { %p3892_p4 = pneg %p3891_p10 }
  0x3d   : > { %p3899_p12 = pnand %p3898_p11, %p3892_p4 }
  0x3f   : > { %3902 = shalt.err (!%p3899_p12)
}
  0x40   : > { %s4040_s19 = smov [#allocation2]   ;;  %s4041_s21 = smov [#allocation8]  }
  0x41   : > { %3742 = dma.vmem_to_smem (!%p4171_p7), %s396_s20, 16, %s4040_s19, [#allocation4]  }
  0x42   : > { %s424_s0 = sshll.u32 %s4041_s21, 4  ;;  %s5128_s6 = sld [smem:[#allocation17_spill]]  ;;  %s425_s0 = int_to_ptr.vmem [resolvable:$true] %s424_s0 }
  0x48   : > { %s3903_s29 = scalar_lea.hbm %s5128_s6, 1024 }
  0x49   : > { %p3904_p13 = scmp.ne.s32.totalorder %s5128_s6, %s3903_s29  ;;  %p3910_p3 = scmp.lt.u32.totalorder %s3903_s29, %s5128_s6 }
  0x4b   : > { %p3906_p0 = pnand %p3904_p13, %p4186_p9 }
  0x4d   : > { %p3907_p2 = pneg %p3906_p0 }
  0x4f   : > { %p3912_p6 = pnand %p3910_p3, %p3907_p2 }
  0x51   : > { %3915 = shalt.err (!%p3912_p6)
}
  0x52   : > { %s3916_s20 = scalar_lea.vmem %s425_s0, 1024  ;;  %p3924_p1 = scmp.lt.s32.totalorder %s425_s0, %s425_s0 }
  0x53   : > { %p3917_p8 = scmp.ne.s32.totalorder %s425_s0, %s3916_s20  ;;  %p3925_p5 = scmp.lt.s32.totalorder %s3916_s20, %s3916_s20 }
  0x55   : > { %p3919_p10 = pnand %p3917_p8, %p4186_p9  ;;  %p3926_p11 = por %p3925_p5, %p3924_p1 }
  0x57   : > { %p3920_p4 = pneg %p3919_p10 }
  0x59   : > { %p3927_p12 = pnand %p3926_p11, %p3920_p4 }
  0x5b   : > { %3930 = shalt.err (!%p3927_p12)
}
  0x5c   : > { %s5129_s8 = smov 8   ;;  %s5130_s11 = smov 128  }
  0x5d   : > { %3748 = dma.hbm_to_vmem [thread:$0]  (!%p4171_p7), %s5128_s6, 1024, %s425_s0, [#allocation7], %s5130_s11, %s5130_s11, %s5129_s8  }
  0x5e   : > { %s37_s15 = sadd.s32 1, %s4027_s26  ;;  %s40_s17 = sadd.s32 1, %s4031_s27 }
  0x5f   : > { %p38_p9 = scmp.ge.s32.totalorder %s37_s15, 3  ;;  %s98_s21 = sadd.s32 1, %s4015_s23 }
  0x60   : > { %p105_p13 = scmp.ne.s32.totalorder %s4015_s23, %s4011_s22  ;;  %p106_p0 = scmp.eq.s32.totalorder %s4035_s28, 0 }
  0x61   : > { %s5154_s15 = smov (%p38_p9, %s37_s15), 0  ;;  %s5156_s17 = smov (!%p38_p9, %s40_s17), %s4031_s27 }
  0x62   : > { %5131 = sst [smem:[#allocation13_spill]] %s5154_s15  ;;  %s94_s16 = ssub.s32 %s4027_s26, %s5154_s15 }
  0x63   : > { %p42_p2 = scmp.ge.s32.totalorder %s5156_s17, 2  ;;  %p3756_p3 = scmp.lt.s32.totalorder %s4035_s28, 6 }
  0x64   : > { %p107_p6 = por %p106_p0, %p105_p13  ;;  %s450_s12 = sand.u32 1, %s4015_s23  }
  0x65   : > { %s5158_s17 = smov (%p42_p2, %s5156_s17), 0  ;;  %s2771_s0 = sshll.u32 %s450_s12, 6 }
  0x66   : > { %5132 = sst [smem:[#allocation14_spill]] %s5158_s17  ;;  %s93_s29 = ssub.s32 %s4031_s27, %s5158_s17 }
  0x67   : > { %s95_s18 = sor.u32 %s94_s16, %s93_s29  ;;  %s2772_s20 = sshll.u32 %s4027_s26, 3 }
  0x68   : > { %p96_p7 = scmp.eq.s32.totalorder %s95_s18, 0  ;;  %s3714_s3 = smul.u32 24, %s4031_s27 }
  0x69   : > { %s454_s19 = scalar_lea.vmem [#allocation5], %s2771_s0  ;;  %p4249_p8 = pnand %p3756_p3, %p107_p6 }
  0x6a   : > { %s463_s6 = sshll.u32 %s454_s19, 4  ;;  %s460_s28 = sadd.s32 %s3714_s3, %s2772_s20  ;;  %s4256_s6 = int_to_ptr.vmem [resolvable:$true] %s463_s6 }
  0x6b   : > { %s4254_s15 = scalar_select %p96_p7, %s4015_s23, %s98_s21  }
  0x6c   : > { %s2773_s10 = sshll.u32 %s460_s28, 7  ;;  %s4263_s0 = scalar_lea.sflag [#allocation3], %s450_s12 }
  0x6d   : > { %s4261_s16 = scalar_lea.hbm %s5089_s2, %s2773_s10  ;;  %p3933_p4 = pneg %p4249_p8 }
  0x6e   : > { %s3931_s29 = scalar_lea.hbm %s4261_s16, 1024  ;;  %s3936_s9 = scalar_lea.hbm %s5089_s2, 6144 }
  0x6f   : > { %p3932_p10 = scmp.ne.s32.totalorder %s4261_s16, %s3931_s29  ;;  %p3937_p11 = scmp.lt.u32.totalorder %s4261_s16, %s5089_s2 }
  0x70   : > { %p3938_p12 = scmp.lt.u32.totalorder %s3936_s9, %s3931_s29  ;;  %p3940_p13 = scmp.lt.u32.totalorder %s3931_s29, %s4261_s16 }
  0x71   : > { %p3934_p1 = pnand %p3933_p4, %p3932_p10 }
  0x72   : > { %p3939_p9 = por %p3938_p12, %p3937_p11 }
  0x73   : > { %p3935_p5 = pneg %p3934_p1 }
  0x74   : > { %p3941_p0 = por %p3940_p13, %p3939_p9 }
  0x76   : > { %p3942_p2 = pnand %p3941_p0, %p3935_p5 }
  0x78   : > { %3945 = shalt.err (!%p3942_p2)
}
  0x79   : > { %s3946_s12 = scalar_lea.vmem %s4256_s6, 1024  ;;  %s4042_s18 = smov [#allocation5]  }
  0x7a   : > { %p3947_p3 = scmp.ne.s32.totalorder %s4256_s6, %s3946_s12  ;;  %s3951_s20 = sshll.u32 %s4042_s18, 4  ;;  %s3952_s20 = int_to_ptr.vmem [resolvable:$false] %s3951_s20 }
  0x7b   : > { %s3953_s3 = scalar_lea.vmem %s3952_s20, 2048  ;;  %p3954_p10 = scmp.lt.s32.totalorder %s4256_s6, %s3952_s20 }
  0x7c   : > { %p3949_p6 = pnand %p3947_p3, %p3933_p4  ;;  %p3955_p1 = scmp.lt.s32.totalorder %s3953_s3, %s3946_s12 }
  0x7e   : > { %p3950_p7 = pneg %p3949_p6  ;;  %p3956_p11 = por %p3955_p1, %p3954_p10 }
  0x80   : > { %p3957_p12 = pnand %p3956_p11, %p3950_p7 }
  0x82   : > { %3960 = shalt.err (!%p3957_p12)
}
  0x83   : > { %3752 = dma.hbm_to_vmem [thread:$0]  (!%p4249_p8), %s4261_s16, 1024, %s4256_s6, %s4263_s0, %s5130_s11, %s5130_s11, %s5129_s8  }
  0x84   : > { %p5134_p4 = scmp.ne.s32.totalorder %s5123_s14, 0 }
  0x85   : > { %p5135_p5 = scmp.ne.s32.totalorder (!%p5134_p4), %s5121_s30, 0 }
  0x86   : > { %475 = sbr.rel (%p5134_p4) target bundleno = 964 (0x3c4), region = 48 }
  0x8d   : > { %3994 = dma.done.wait (%p5135_p5), [#allocation4], 16  }
  0x8e   : > { %3996 = vsyncadd (%p5135_p5), [#allocation4], 4294967280  ;;  %s481_s19 = sand.u32 1, %s4011_s22   ;;  %p5136_p9 = scmp.ne.s32.totalorder %s5122_s13, 0 }
  0x8f   : > { %s2776_s7 = sshll.u32 %s481_s19, 6  ;;  %s482_s29 = scalar_lea.sflag [#allocation3], %s481_s19 }
  0x90   : > { %s4301_s28 = scalar_lea.vmem [#allocation5], %s2776_s7 }
  0x91   : > { %3998 = dma.done.wait (%p5136_p9), %s482_s29, 1024  }
  0x92   : > { %4000 = vsyncadd (%p5136_p9), %s482_s29, 4294966272 }
  0x93   : > { %4002 = dma.done.wait (%p5135_p5), [#allocation7], 1920  }
  0x94   : > { %4004 = vsyncadd (%p5135_p5), [#allocation7], 4294965376 }
  0x95   : > { %498 = sfence }
  0x96   : > { %p577_p8 = scmp.lt.s32.totalorder %s4023_s25, 1  ;;  %p579_p13 = scmp.lt.s32.totalorder %s4019_s24, 2  ;;  %v4043_v0 = vmov 0.0|0.0   ;;  %vm4044_vm0 = vmmov 0   ;;  %v4045_v1 = vmov 0.0   ;;  %v4331_v2 = vld [vmem:[%s4301_s28] sm:$0xff] }
  0x97   : > { %3530 = vmatprep.subr.bf16.mxu0 %v4043_v0  ;;  %3542 = vmatprep.subr.bf16.mxu1 %v4043_v0  ;;  %v4340_v6 = vld [vmem:[%s4301_s28 + $0x8] sm:$0xff]  ;;  %v4353_v10 = vld [vmem:[%s4301_s28 + $0x10] sm:$0xff]  ;;  %v4360_v12 = vld [vmem:[%s4301_s28 + $0x18] sm:$0xff]  ;;  %vm665_vm1 = vcmask 523264   ;;  %s2785_s3 = sld [smem:[#allocation2 + $0x1]]  ;;  %s632_s19 = sld [smem:[#allocation2]] }
  0x98   : > { %s4316_s6 = scalar_select %p577_p8, %s4023_s25, 1  ;;  %3088 = vmatprep.mubr.msk.f32.mxu0 %vm4044_vm0, %v4045_v1  ;;  %3125 = vmatprep.mubr.msk.f32.mxu1 %vm4044_vm0, %v4045_v1  ;;  %v4363_v13 = vld [vmem:[%s4301_s28 + $0x20] sm:$0xff]  ;;  %v4366_v14 = vld [vmem:[%s4301_s28 + $0x28] sm:$0xff]  ;;  %v4386_v20 = vld [vmem:[%s4301_s28 + $0x30] sm:$0xff]  ;;  %v4437_v35 = vpack.c.bf16 %v4340_v6, %v4331_v2  ;;  %v4449_v37 = vpack.c.bf16 %v4360_v12, %v4353_v10  ;;  %vm1951_vm2 = vcmask 441344   ;;  %vm2389_vm3 = vcmask 261120  }
  0x99   : > { %s4321_s30 = scalar_select %p579_p13, %s4019_s24, 2  ;;  %v4402_v25 = vld [vmem:[%s4301_s28 + $0x38] sm:$0xff]  ;;  %v4433_v34 = vld [vmem:[#allocation6] sm:$0xff]  ;;  %v4445_v36 = vld [vmem:[#allocation6 + $0x8] sm:$0xff]  ;;  %v4461_v39 = vpack.c.bf16 %v4366_v14, %v4363_v13  ;;  %vm1963_vm4 = vcmask 439296  }
  0x9a   : > { %s3715_s13 = smul.u32 24, %s4316_s6  ;;  %v4456_v38 = vld [vmem:[#allocation6 + $0x10] sm:$0xff]  ;;  %v4468_v40 = vld [vmem:[#allocation6 + $0x18] sm:$0xff]  ;;  %v4473_v41 = vpack.c.bf16 %v4402_v25, %v4386_v20  ;;  %v4480_v42 = vld [vmem:[#allocation6 + $0x20] sm:$0xff]  ;;  %s5138_s0 = sld [smem:[#allocation21_spill]] }
  0x9b   : > { %s2779_s14 = sshll.u32 %s4321_s30, 3  ;;  %v657_v43 = vld [vmem:[%s5091_s4] sm:$0xff]  ;;  %v658_v44 = vld [vmem:[%s5091_s4 + $0x8] sm:$0xff]  ;;  %v659_v45 = vld [vmem:[%s5091_s4 + $0x10] sm:$0xff]  ;;  %s3716_s7 = smul.u32 12, %s4316_s6 }
  0x9c   : > { %s583_s8 = sadd.s32 %s3715_s13, %s2779_s14  ;;  %v4497_v46 = vld [vmem:[#allocation6 + $0x28] sm:$0xff]  ;;  %v4499_v47 = vpack.c.bf16 %v658_v44, %v657_v43  ;;  %v660_v48 = vld [vmem:[%s5091_s4 + $0x18] sm:$0xff]  ;;  %v661_v50 = vld [vmem:[%s5091_s4 + $0x20] sm:$0xff]  ;;  %v1360_v43 = vmul.f32 %v4353_v10, %v4353_v10  ;;  %v1361_v44 = vmul.f32 %v4360_v12, %v4360_v12  ;;  %s2781_s29 = sshll.u32 %s4321_s30, 2 }
  0x9d   : > { %s2780_s11 = sshll.u32 %s583_s8, 3  ;;  %v4505_v49 = vpack.c.bf16 %v660_v48, %v659_v45  ;;  %v662_v51 = vld [vmem:[%s5091_s4 + $0x28] sm:$0xff]  ;;  %v4522_v54 = vld [vmem:[#allocation6 + $0x30] sm:$0x3f]  ;;  %v664_v57 = vld [vmem:[%s5091_s4 + $0x38] sm:$0xff]  ;;  %v1363_v45 = vmul.f32 %v4366_v14, %v4366_v14  ;;  %v1365_v48 = vmul.f32 %v4402_v25, %v4402_v25  ;;  %s5000_s6 = sadd.s32 %s3716_s7, %s2781_s29 }
  0x9e   : > { %s585_s21 = scalar_lea.vmem %s5088_s1, %s2780_s11  ;;  %3544 = vmatpush3.bf16.msra.mxu1 %v4499_v47  ;;  %v4525_v55 = vpack.c.bf16 %v662_v51, %v661_v50  ;;  %v663_v56 = vld [vmem:[%s5091_s4 + $0x30] sm:$0xff]  ;;  %s2782_s30 = sshll.u32 %s5000_s6, 3 }
  0x9f   : > { %v4333_v3 = vld [vmem:[%s585_s21] sm:$0xff]  ;;  %v4335_v4 = vld [vmem:[%s585_s21 + $0x8] sm:$0xff]  ;;  %v4337_v5 = vld [vmem:[%s585_s21 + $0x10] sm:$0xff]  ;;  %3545 = vmatprep.subr.bf16.mxu1 %v4043_v0  ;;  %v4543_v61 = vpack.c.bf16 %v664_v57, %v663_v56  ;;  %s5137_s14 = sld [smem:[#allocation20_spill]]  ;;  %s586_s9 = smul.u32 3, %s4023_s25 }
  0xa0   : > { %v4344_v7 = vpack.c.bf16 %v4335_v4, %v4333_v3  ;;  %v4348_v8 = vmul.f32 %v4331_v2, %v4333_v3  ;;  %v4350_v9 = vld [vmem:[%s585_s21 + $0x18] sm:$0xff]  ;;  %v4357_v11 = vmul.f32 %v4340_v6, %v4335_v4  ;;  %v4375_v16 = vmul.f32 %v4353_v10, %v4337_v5  ;;  %v4381_v18 = vld [vmem:[%s585_s21 + $0x20] sm:$0xff]  ;;  %v4383_v19 = vld [vmem:[%s585_s21 + $0x28] sm:$0xff]  ;;  %s5139_s18 = sld [smem:[#allocation18_spill]]  ;;  %s5140_s29 = sld [smem:[#allocation19_spill]] }
  0xa1   : > { %v4371_v15 = vpack.c.bf16 %v4350_v9, %v4337_v5  ;;  %v4379_v17 = vmul.f32 %v4360_v12, %v4350_v9  ;;  %v4391_v21 = vmul.f32 %v4363_v13, %v4381_v18  ;;  %v4395_v22 = vmul.f32 %v4366_v14, %v4383_v19  ;;  %v4397_v23 = vld [vmem:[%s585_s21 + $0x30] sm:$0xff]  ;;  %v4399_v24 = vld [vmem:[%s585_s21 + $0x38] sm:$0xff]  ;;  %s617_s21 = scalar_lea.vmem %s5138_s0, %s2782_s30  ;;  %s587_s10 = sadd.s32 %s4019_s24, %s586_s9 }
  0xa2   : > { %3532 = vmatpush3.bf16.msra.mxu0 %v4344_v7  ;;  %v4406_v26 = vmul.f32 %v4386_v20, %v4397_v23  ;;  %v4410_v27 = vmul.f32 %v4402_v25, %v4399_v24  ;;  %v3627_v28 = vpack.c.bf16 %v4357_v11, %v4348_v8  ;;  %v4417_v29 = vpack.c.bf16 %v4383_v19, %v4381_v18  ;;  %v2002_v8 = vld [vmem:[%s5092_s5 + $0x8] sm:$0xff]  ;;  %v2003_v11 = vld [vmem:[%s5092_s5 + $0x10] sm:$0xff]  ;;  %v2004_v14 = vld [vmem:[%s5092_s5 + $0x18] sm:$0xff]  ;;  %p588_p0 = scmp.lt.s32.totalorder %s587_s10, 5  ;;  %s5142_s16 = sld [smem:[#allocation23_spill]] }
  0xa3   : > { %3533 = vmatprep.subr.bf16.mxu0 %v4043_v0  ;;  %v3630_v30 = vpack.c.bf16 %v4379_v17, %v4375_v16  ;;  %v3633_v31 = vpack.c.bf16 %v4395_v22, %v4391_v21  ;;  %v4429_v33 = vpack.c.bf16 %v4399_v24, %v4397_v23  ;;  %v1129_v52 = vmul.f32 %v4333_v3, %v4333_v3 }
  0xa4   : > { %v3636_v32 = vpack.c.bf16 %v4410_v27, %v4406_v26  ;;  %v1130_v53 = vmul.f32 %v4335_v4, %v4335_v4  ;;  %3547 = vmatpush3.bf16.msra.mxu1 %v4505_v49  ;;  %v1131_v58 = vmul.f32 %v4337_v5, %v4337_v5  ;;  %v1132_v59 = vmul.f32 %v4350_v9, %v4350_v9  ;;  %s5160_s10 = smov (!%p588_p0, %s587_s10), 5 }
  0xa5   : > { %3548 = vmatprep.subr.bf16.mxu1 %v4043_v0  ;;  %v1133_v62 = vmul.f32 %v4381_v18, %v4381_v18  ;;  %v1134_v63 = vmul.f32 %v4383_v19, %v4383_v19  ;;  %v1135_v4 = vmul.f32 %v4397_v23, %v4397_v23  ;;  %v1136_v5 = vmul.f32 %v4399_v24, %v4399_v24  ;;  %s5015_s8 = scalar_lea.vmem %s5137_s14, %s2782_s30  ;;  %s5141_s14 = sld [smem:[#allocation22_spill]] }
  0xa6   : > { %3535 = vmatpush3.bf16.msra.mxu0 %v4371_v15  ;;  %v3579_v60 = vpack.c.bf16 %v1130_v53, %v1129_v52  ;;  %v3582_v3 = vpack.c.bf16 %v1132_v59, %v1131_v58  ;;  %v1358_v19 = vmul.f32 %v4331_v2, %v4331_v2  ;;  %v1359_v23 = vmul.f32 %v4340_v6, %v4340_v6  ;;  %s590_s20 = scalar_lea.vmem %s5139_s18, %s5160_s10  ;;  %s597_s6 = scalar_lea.vmem %s5140_s29, %s5160_s10 }
  0xa7   : > { %3536 = vmatprep.subr.bf16.mxu0 %v4043_v0  ;;  %v3585_v9 = vpack.c.bf16 %v1134_v63, %v1133_v62  ;;  %v3588_v18 = vpack.c.bf16 %v1136_v5, %v1135_v4  ;;  %v3606_v2 = vpack.c.bf16 %v1361_v44, %v1360_v43  ;;  %v1362_v6 = vmul.f32 %v4363_v13, %v4363_v13 }
  0xa8   : > { %3550 = vmatpush3.bf16.msra.mxu1 %v4525_v55  ;;  %v3603_v24 = vpack.c.bf16 %v1359_v23, %v1358_v19  ;;  %v1364_v12 = vmul.f32 %v4386_v20, %v4386_v20  ;;  %s629_s0 = scalar_lea.vmem %s5142_s16, %s5160_s10 }
  0xa9   : > { %3551 = vmatprep.subr.bf16.mxu1 %v4043_v0  ;;  %v3609_v10 = vpack.c.bf16 %v1363_v45, %v1362_v6  ;;  %v2006_v6 = vld [vmem:[#allocation8 + $0x8] sm:$0xff] }
  0xaa   : > { %3538 = vmatpush3.bf16.msra.mxu0 %v4417_v29  ;;  %v3612_v13 = vpack.c.bf16 %v1365_v48, %v1364_v12 }
  0xab   : > { %3539 = vmatprep.subr.bf16.mxu0 %v4043_v0 }
  0xac   : > { %3553 = vmatpush3.bf16.msra.mxu1 %v4543_v61 }
  0xad   : > { %3566 = vmatprep.subr.bf16.mxu1 %v4043_v0 }
  0xae   : > { %3541 = vmatpush3.bf16.msra.mxu0 %v4429_v33 }
  0xaf   : > { %3554 = vmatprep.subr.bf16.mxu0 %v4043_v0 }
  0xb1   : > { %3089 = vmatmul.mubr.msk.f32.vlgmr.msra.gmra.mrb[0].mxu0 %vm665_vm1, %v4433_v34 }
  0xb2   : > { %3556 = vmatpush3.bf16.msra.mxu0 %v4437_v35  ;;  %3091 = vmatprep.mubr.msk.f32.mxu0 %vm4044_vm0, %v4045_v1 }
  0xb3   : > { %3557 = vmatprep.subr.bf16.mxu0 %v4043_v0 }
  0xb5   : > { %3092 = vmatmul.mubr.msk.f32.gmra.mrb[2].mxu0 %vm665_vm1, %v4445_v36 }
  0xb6   : > { %3094 = vmatprep.mubr.msk.f32.mxu0 %vm4044_vm0, %v4045_v1  ;;  %3559 = vmatpush3.bf16.msra.mxu0 %v4449_v37 }
  0xb7   : > { %3560 = vmatprep.subr.bf16.mxu0 %v4043_v0 }
  0xb9   : > { %3095 = vmatmul.mubr.msk.f32.gmra.mrb[4].mxu0 %vm665_vm1, %v4456_v38 }
  0xba   : > { %3097 = vmatprep.mubr.msk.f32.mxu0 %vm4044_vm0, %v4045_v1  ;;  %3562 = vmatpush3.bf16.msra.mxu0 %v4461_v39 }
  0xbb   : > { %3563 = vmatprep.subr.bf16.mxu0 %v4043_v0 }
  0xbd   : > { %3098 = vmatmul.mubr.msk.f32.gmra.mrb[6].mxu0 %vm665_vm1, %v4468_v40 }
  0xbe   : > { %3100 = vmatprep.mubr.msk.f32.mxu0 %vm4044_vm0, %v4045_v1  ;;  %3565 = vmatpush3.bf16.msra.mxu0 %v4473_v41 }
  0xbf   : > { %3578 = vmatprep.subr.bf16.mxu0 %v4043_v0 }
  0xc1   : > { %3101 = vmatmul.mubr.msk.f32.gmra.mrb[8].mxu0 %vm665_vm1, %v4480_v42 }
  0xc2   : > { %3103 = vmatprep.mubr.msk.f32.mxu0 %vm4044_vm0, %v4045_v1 }
  0xc5   : > { %3104 = vmatmul.mubr.msk.f32.gmra.mrb[10].mxu0 %vm665_vm1, %v4497_v46 }
  0xc6   : > { %3106 = vmatprep.mubr.msk.f32.mxu0 %vm4044_vm0, %v4045_v1 }
  0xc9   : > { %3107 = vmatmul.mubr.msk.f32.gmra.mrb[12].mxu0 %vm665_vm1, %v4522_v54 }
  0xca   : > { %3162 = vmatprep.mubr.msk.f32.mxu0 %vm4044_vm0, %v4045_v1 }
  0xcd   : > { %3163 = vmatmul.mubr.msk.f32.vlgmr.msra.gmra.mrb[14].mxu0 %vm665_vm1, %v4433_v34 }
  0xce   : > { %3580 = vmatpush3.bf16.msra.mxu0 %v3579_v60  ;;  %3165 = vmatprep.mubr.msk.f32.mxu0 %vm4044_vm0, %v4045_v1 }
  0xcf   : > { %3581 = vmatprep.subr.bf16.mxu0 %v4043_v0 }
  0xd1   : > { %3166 = vmatmul.mubr.msk.f32.gmra.mrb[16].mxu0 %vm665_vm1, %v4445_v36 }
  0xd2   : > { %3168 = vmatprep.mubr.msk.f32.mxu0 %vm4044_vm0, %v4045_v1  ;;  %3583 = vmatpush3.bf16.msra.mxu0 %v3582_v3 }
  0xd3   : > { %3584 = vmatprep.subr.bf16.mxu0 %v4043_v0 }
  0xd5   : > { %3169 = vmatmul.mubr.msk.f32.gmra.mrb[18].mxu0 %vm665_vm1, %v4456_v38 }
  0xd6   : > { %3171 = vmatprep.mubr.msk.f32.mxu0 %vm4044_vm0, %v4045_v1  ;;  %3586 = vmatpush3.bf16.msra.mxu0 %v3585_v9 }
  0xd7   : > { %3587 = vmatprep.subr.bf16.mxu0 %v4043_v0 }
  0xd9   : > { %3172 = vmatmul.mubr.msk.f32.gmra.mrb[20].mxu0 %vm665_vm1, %v4468_v40 }
  0xda   : > { %3174 = vmatprep.mubr.msk.f32.mxu0 %vm4044_vm0, %v4045_v1  ;;  %3589 = vmatpush3.bf16.msra.mxu0 %v3588_v18 }
  0xdb   : > { %3602 = vmatprep.subr.bf16.mxu0 %v4043_v0 }
  0xdd   : > { %3175 = vmatmul.mubr.msk.f32.gmra.mrb[22].mxu0 %vm665_vm1, %v4480_v42 }
  0xde   : > { %3177 = vmatprep.mubr.msk.f32.mxu0 %vm4044_vm0, %v4045_v1 }
  0xe1   : > { %3178 = vmatmul.mubr.msk.f32.gmra.mrb[24].mxu0 %vm665_vm1, %v4497_v46 }
  0xe2   : > { %3180 = vmatprep.mubr.msk.f32.mxu0 %vm4044_vm0, %v4045_v1 }
  0xe5   : > { %3181 = vmatmul.mubr.msk.f32.gmra.mrb[26].mxu0 %vm665_vm1, %v4522_v54 }
  0xe6   : > { %3236 = vmatprep.mubr.msk.f32.mxu0 %vm4044_vm0, %v4045_v1 }
  0xe9   : > { %3237 = vmatmul.mubr.msk.f32.vlgmr.msra.gmra.mrb[28].mxu0 %vm665_vm1, %v4433_v34 }
  0xea   : > { %3604 = vmatpush3.bf16.msra.mxu0 %v3603_v24  ;;  %3239 = vmatprep.mubr.msk.f32.mxu0 %vm4044_vm0, %v4045_v1 }
  0xeb   : > { %3605 = vmatprep.subr.bf16.mxu0 %v4043_v0 }
  0xed   : > { %3240 = vmatmul.mubr.msk.f32.gmra.mrb[30].mxu0 %vm665_vm1, %v4445_v36 }
  0xee   : > { %3242 = vmatprep.mubr.msk.f32.mxu0 %vm4044_vm0, %v4045_v1  ;;  %3607 = vmatpush3.bf16.msra.mxu0 %v3606_v2  ;;  %v2005_v2 = vld [vmem:[#allocation8] sm:$0xff] }
  0xef   : > { %3608 = vmatprep.subr.bf16.mxu0 %v4043_v0  ;;  %v4843_v45 = vpack.c.bf16 %v2006_v6, %v2005_v2 }
  0xf1   : > { %3243 = vmatmul.mubr.msk.f32.gmra.mrb[32].mxu0 %vm665_vm1, %v4456_v38 }
  0xf2   : > { %3245 = vmatprep.mubr.msk.f32.mxu0 %vm4044_vm0, %v4045_v1  ;;  %3610 = vmatpush3.bf16.msra.mxu0 %v3609_v10 }
  0xf3   : > { %3611 = vmatprep.subr.bf16.mxu0 %v4043_v0 }
  0xf5   : > { %3246 = vmatmul.mubr.msk.f32.gmra.mrb[34].mxu0 %vm665_vm1, %v4468_v40 }
  0xf6   : > { %3248 = vmatprep.mubr.msk.f32.mxu0 %vm4044_vm0, %v4045_v1  ;;  %3613 = vmatpush3.bf16.msra.mxu0 %v3612_v13 }
  0xf7   : > { %3626 = vmatprep.subr.bf16.mxu0 %v4043_v0 }
  0xf9   : > { %3249 = vmatmul.mubr.msk.f32.gmra.mrb[36].mxu0 %vm665_vm1, %v4480_v42 }
  0xfa   : > { %3251 = vmatprep.mubr.msk.f32.mxu0 %vm4044_vm0, %v4045_v1 }
  0xfd   : > { %3252 = vmatmul.mubr.msk.f32.gmra.mrb[38].mxu0 %vm665_vm1, %v4497_v46 }
  0xfe   : > { %3254 = vmatprep.mubr.msk.f32.mxu0 %vm4044_vm0, %v4045_v1 }
 0x101   : > { %3255 = vmatmul.mubr.msk.f32.gmra.mrb[40].mxu0 %vm665_vm1, %v4522_v54 }
 0x102   : > { %3310 = vmatprep.mubr.msk.f32.mxu0 %vm4044_vm0, %v4045_v1 }
 0x105   : > { %3311 = vmatmul.mubr.msk.f32.vlgmr.msra.gmra.mrb[42].mxu0 %vm665_vm1, %v4433_v34 }
 0x106   : > { %3628 = vmatpush3.bf16.msra.mxu0 %v3627_v28  ;;  %3313 = vmatprep.mubr.msk.f32.mxu0 %vm4044_vm0, %v4045_v1 }
 0x107   : > { %3629 = vmatprep.subr.bf16.mxu0 %v4043_v0 }
 0x109   : > { %3314 = vmatmul.mubr.msk.f32.gmra.mrb[44].mxu0 %vm665_vm1, %v4445_v36 }
 0x10a   : > { %3316 = vmatprep.mubr.msk.f32.mxu0 %vm4044_vm0, %v4045_v1  ;;  %3631 = vmatpush3.bf16.msra.mxu0 %v3630_v30 }
 0x10b   : > { %3632 = vmatprep.subr.bf16.mxu0 %v4043_v0 }
 0x10d   : > { %3317 = vmatmul.mubr.msk.f32.gmra.mrb[46].mxu0 %vm665_vm1, %v4456_v38 }
 0x10e   : > { %3319 = vmatprep.mubr.msk.f32.mxu0 %vm4044_vm0, %v4045_v1  ;;  %3634 = vmatpush3.bf16.msra.mxu0 %v3633_v31 }
 0x10f   : > { %3635 = vmatprep.subr.bf16.mxu0 %v4043_v0 }
 0x111   : > { %3320 = vmatmul.mubr.msk.f32.gmra.mrb[48].mxu0 %vm665_vm1, %v4468_v40 }
 0x112   : > { %3322 = vmatprep.mubr.msk.f32.mxu0 %vm4044_vm0, %v4045_v1  ;;  %3637 = vmatpush3.bf16.msra.mxu0 %v3636_v32 }
 0x113   : > { %3651 = vmatprep.subr.bf16.mxu0 %v4344_v7 }
 0x115   : > { %3323 = vmatmul.mubr.msk.f32.gmra.mrb[50].mxu0 %vm665_vm1, %v4480_v42 }
 0x116   : > { %3325 = vmatprep.mubr.msk.f32.mxu0 %vm4044_vm0, %v4045_v1 }
 0x119   : > { %3326 = vmatmul.mubr.msk.f32.gmra.mrb[52].mxu0 %vm665_vm1, %v4497_v46 }
 0x11a   : > { %3328 = vmatprep.mubr.msk.f32.mxu0 %vm4044_vm0, %v4045_v1 }
 0x11d   : > { %3329 = vmatmul.mubr.msk.f32.gmra.mrb[54].mxu0 %vm665_vm1, %v4522_v54 }
 0x11e   : > { %3384 = vmatprep.mubr.msk.f32.mxu0 %vm4044_vm0, %v4045_v1 }
 0x121   : > { %3385 = vmatmul.mubr.msk.f32.vlgmr.msra.gmra.mrb[56].mxu0 %vm665_vm1, %v4433_v34 }
 0x122   : > { %3653 = vmatpush3.bf16.msra.mxu0 %v4344_v7  ;;  %3387 = vmatprep.mubr.msk.f32.mxu0 %vm4044_vm0, %v4045_v1  ;;  %v2001_v7 = vld [vmem:[%s5092_s5] sm:$0xff] }
 0x123   : > { %3655 = vmatprep.subr.bf16.mxu0 %v4371_v15 }
 0x125   : > { %3388 = vmatmul.mubr.msk.f32.gmra.mrb[58].mxu0 %vm665_vm1, %v4445_v36 }
 0x126   : > { %3390 = vmatprep.mubr.msk.f32.mxu0 %vm4044_vm0, %v4045_v1  ;;  %3657 = vmatpush3.bf16.msra.mxu0 %v4371_v15 }
 0x127   : > { %3659 = vmatprep.subr.bf16.mxu0 %v4417_v29 }
 0x129   : > { %3391 = vmatmul.mubr.msk.f32.gmra.mrb[60].mxu0 %vm665_vm1, %v4456_v38 }
 0x12a   : > { %3393 = vmatprep.mubr.msk.f32.mxu0 %vm4044_vm0, %v4045_v1  ;;  %3661 = vmatpush3.bf16.msra.mxu0 %v4417_v29 }
 0x12b   : > { %3663 = vmatprep.subr.bf16.mxu0 %v4429_v33 }
 0x12d   : > { %3394 = vmatmul.mubr.msk.f32.gmra.mrb[62].mxu0 %vm665_vm1, %v4468_v40 }
 0x12e   : > { %3396 = vmatprep.mubr.msk.f32.mxu0 %vm4044_vm0, %v4045_v1  ;;  %3665 = vmatpush3.bf16.msra.mxu0 %v4429_v33 }
 0x12f   : > { %3683 = vmatprep.subr.bf16.mxu0 %v4437_v35 }
 0x131   : > { %3397 = vmatmul.mubr.msk.f32.gmra.mrb[64].mxu0 %vm665_vm1, %v4480_v42 }
 0x132   : > { %3399 = vmatprep.mubr.msk.f32.mxu0 %vm4044_vm0, %v4045_v1 }
 0x135   : > { %3400 = vmatmul.mubr.msk.f32.gmra.mrb[66].mxu0 %vm665_vm1, %v4497_v46 }
 0x136   : > { %3402 = vmatprep.mubr.msk.f32.mxu0 %vm4044_vm0, %v4045_v1 }
 0x139   : > { %3403 = vmatmul.mubr.msk.f32.gmra.mrb[68].mxu0 %vm665_vm1, %v4522_v54 }
 0x13a   : > { %3458 = vmatprep.mubr.msk.f32.mxu0 %vm665_vm1, %v2001_v7 }
 0x13d   : > { %3459 = vmatmul.mubr.msk.f32.vlgmr.msra.gmra.mrb[70].mxu0 %vm665_vm1, %v2002_v8 }
 0x13e   : > { %3461 = vmatprep.mubr.msk.f32.mxu0 %vm665_vm1, %v2003_v11  ;;  %3685 = vmatpush3.bf16.msra.mxu0 %v4437_v35 }
 0x13f   : > { %3687 = vmatprep.subr.bf16.mxu0 %v4449_v37 }
 0x141   : > { %3462 = vmatmul.mubr.msk.f32.gmra.mrb[72].mxu0 %vm665_vm1, %v2004_v14 }
 0x142   : > { %3689 = vmatpush3.bf16.msra.mxu0 %v4449_v37  ;;  %3502 = vmatprep.mubr.msk.f32.mxu0 %vm665_vm1, %v2001_v7  ;;  %v2007_v7 = vld [vmem:[#allocation8 + $0x10] sm:$0xff] }
 0x143   : > { %3691 = vmatprep.subr.bf16.mxu0 %v4461_v39 }
 0x146   : > { %3693 = vmatpush3.bf16.msra.mxu0 %v4461_v39 }
 0x147   : > { %3695 = vmatprep.subr.bf16.mxu0 %v4473_v41 }
 0x14a   : > { %3697 = vmatpush3.bf16.msra.mxu0 %v4473_v41 }
 0x14d   : > { %3503 = vmatmul.mubr.msk.f32.vlgmr.msra.gmra.mrb[74].mxu0 %vm665_vm1, %v2002_v8  ;;  %v2008_v8 = vld [vmem:[#allocation8 + $0x18] sm:$0xff] }
 0x14e   : > { %3505 = vmatprep.mubr.msk.f32.mxu0 %vm665_vm1, %v2003_v11  ;;  %v3670_v11 = vpack.c.bf16 %v2008_v8, %v2007_v7 }
 0x151   : > { %3506 = vmatmul.mubr.msk.f32.gmra.mrb[76].mxu0 %vm665_vm1, %v2004_v14 }
 0x184   : > { %v753_v15 = vpop.f32.mrb[0].mxu0 }
 0x185   : > { %v3090_v16 = vpop.f32.mrb[1].mxu0  ;;  %3126 = vmatmul.mubr.msk.f32.vlgmr.msra.gmra.mrb[0].mxu1 %vm665_vm1, %v753_v15  ;;  %v2009_v15 = vld [vmem:[#allocation8 + $0x20] sm:$0xff] }
 0x186   : > { %3568 = vmatpush3.bf16.msra.mxu1 %v4499_v47  ;;  %3128 = vmatprep.mubr.msk.f32.mxu1 %vm4044_vm0, %v4045_v1  ;;  %v2010_v16 = vld [vmem:[#allocation8 + $0x28] sm:$0xff] }
 0x187   : > { %3569 = vmatprep.subr.bf16.mxu1 %v4043_v0 }
 0x188   : > { %v758_v17 = vpop.f32.mrb[2].mxu0 }
 0x189   : > { %v3093_v20 = vpop.f32.mrb[3].mxu0  ;;  %3129 = vmatmul.mubr.msk.f32.gmra.mrb[2].mxu1 %vm665_vm1, %v758_v17 }
 0x18a   : > { %3131 = vmatprep.mubr.msk.f32.mxu1 %vm4044_vm0, %v4045_v1  ;;  %3571 = vmatpush3.bf16.msra.mxu1 %v4505_v49  ;;  %v3674_v20 = vpack.c.bf16 %v2010_v16, %v2009_v15 }
 0x18b   : > { %3572 = vmatprep.subr.bf16.mxu1 %v4043_v0 }
 0x18c   : > { %v763_v21 = vpop.f32.mrb[4].mxu0 }
 0x18d   : > { %v3096_v22 = vpop.f32.mrb[5].mxu0  ;;  %3132 = vmatmul.mubr.msk.f32.gmra.mrb[4].mxu1 %vm665_vm1, %v763_v21 }
 0x18e   : > { %3134 = vmatprep.mubr.msk.f32.mxu1 %vm4044_vm0, %v4045_v1  ;;  %3574 = vmatpush3.bf16.msra.mxu1 %v4525_v55  ;;  %v2011_v22 = vld [vmem:[#allocation8 + $0x30] sm:$0xff] }
 0x18f   : > { %3575 = vmatprep.subr.bf16.mxu1 %v4043_v0 }
 0x190   : > { %v768_v25 = vpop.f32.mrb[6].mxu0 }
 0x191   : > { %v3099_v26 = vpop.f32.mrb[7].mxu0  ;;  %3135 = vmatmul.mubr.msk.f32.gmra.mrb[6].mxu1 %vm665_vm1, %v768_v25  ;;  %v2012_v25 = vld [vmem:[#allocation8 + $0x38] sm:$0xff] }
 0x192   : > { %3137 = vmatprep.mubr.msk.f32.mxu1 %vm4044_vm0, %v4045_v1  ;;  %3577 = vmatpush3.bf16.msra.mxu1 %v4543_v61 }
 0x193   : > { %3590 = vmatprep.subr.bf16.mxu1 %v4043_v0 }
 0x194   : > { %v773_v27 = vpop.f32.mrb[8].mxu0 }
 0x195   : > { %v3102_v28 = vpop.f32.mrb[9].mxu0  ;;  %3138 = vmatmul.mubr.msk.f32.gmra.mrb[8].mxu1 %vm665_vm1, %v773_v27  ;;  %v3678_v27 = vpack.c.bf16 %v2012_v25, %v2011_v22 }
 0x196   : > { %3140 = vmatprep.mubr.msk.f32.mxu1 %vm4044_vm0, %v4045_v1 }
 0x198   : > { %v778_v29 = vpop.f32.mrb[10].mxu0 }
 0x199   : > { %v3105_v30 = vpop.f32.mrb[11].mxu0  ;;  %3141 = vmatmul.mubr.msk.f32.gmra.mrb[10].mxu1 %vm665_vm1, %v778_v29 }
 0x19a   : > { %3143 = vmatprep.mubr.msk.f32.mxu1 %vm4044_vm0, %v4045_v1 }
 0x19c   : > { %v783_v31 = vpop.f32.mrb[12].mxu0 }
 0x19d   : > { %v3108_v32 = vpop.f32.mrb[13].mxu0  ;;  %3144 = vmatmul.mubr.msk.f32.gmra.mrb[12].mxu1 %vm665_vm1, %v783_v31 }
 0x19e   : > { %3199 = vmatprep.mubr.msk.f32.mxu1 %vm4044_vm0, %v4045_v1 }
 0x1a0   : > { %v974_v33 = vpop.f32.mrb[14].mxu0 }
 0x1a1   : > { %v3164_v34 = vpop.f32.mrb[15].mxu0  ;;  %3200 = vmatmul.mubr.msk.f32.vlgmr.msra.gmra.mrb[14].mxu1 %vm665_vm1, %v974_v33 }
 0x1a2   : > { %3592 = vmatpush3.bf16.msra.mxu1 %v4499_v47  ;;  %3202 = vmatprep.mubr.msk.f32.mxu1 %vm4044_vm0, %v4045_v1 }
 0x1a3   : > { %3593 = vmatprep.subr.bf16.mxu1 %v4043_v0 }
 0x1a4   : > { %v979_v35 = vpop.f32.mrb[16].mxu0 }
 0x1a5   : > { %v3167_v36 = vpop.f32.mrb[17].mxu0  ;;  %3203 = vmatmul.mubr.msk.f32.gmra.mrb[16].mxu1 %vm665_vm1, %v979_v35 }
 0x1a6   : > { %3205 = vmatprep.mubr.msk.f32.mxu1 %vm4044_vm0, %v4045_v1  ;;  %3595 = vmatpush3.bf16.msra.mxu1 %v4505_v49 }
 0x1a7   : > { %3596 = vmatprep.subr.bf16.mxu1 %v4043_v0 }
 0x1a8   : > { %v984_v37 = vpop.f32.mrb[18].mxu0 }
 0x1a9   : > { %v3170_v38 = vpop.f32.mrb[19].mxu0  ;;  %3206 = vmatmul.mubr.msk.f32.gmra.mrb[18].mxu1 %vm665_vm1, %v984_v37 }
 0x1aa   : > { %3208 = vmatprep.mubr.msk.f32.mxu1 %vm4044_vm0, %v4045_v1  ;;  %3598 = vmatpush3.bf16.msra.mxu1 %v4525_v55 }
 0x1ab   : > { %3599 = vmatprep.subr.bf16.mxu1 %v4043_v0 }
 0x1ac   : > { %v989_v39 = vpop.f32.mrb[20].mxu0 }
 0x1ad   : > { %v3173_v40 = vpop.f32.mrb[21].mxu0  ;;  %3209 = vmatmul.mubr.msk.f32.gmra.mrb[20].mxu1 %vm665_vm1, %v989_v39 }
 0x1ae   : > { %3211 = vmatprep.mubr.msk.f32.mxu1 %vm4044_vm0, %v4045_v1  ;;  %3601 = vmatpush3.bf16.msra.mxu1 %v4543_v61 }
 0x1af   : > { %3614 = vmatprep.subr.bf16.mxu1 %v4043_v0 }
 0x1b0   : > { %v994_v41 = vpop.f32.mrb[22].mxu0 }
 0x1b1   : > { %v3176_v42 = vpop.f32.mrb[23].mxu0  ;;  %3212 = vmatmul.mubr.msk.f32.gmra.mrb[22].mxu1 %vm665_vm1, %v994_v41 }
 0x1b2   : > { %3214 = vmatprep.mubr.msk.f32.mxu1 %vm4044_vm0, %v4045_v1 }
 0x1b4   : > { %v999_v46 = vpop.f32.mrb[24].mxu0 }
 0x1b5   : > { %v3179_v50 = vpop.f32.mrb[25].mxu0  ;;  %3215 = vmatmul.mubr.msk.f32.gmra.mrb[24].mxu1 %vm665_vm1, %v999_v46 }
 0x1b6   : > { %3217 = vmatprep.mubr.msk.f32.mxu1 %vm4044_vm0, %v4045_v1 }
 0x1b8   : > { %v1004_v51 = vpop.f32.mrb[26].mxu0 }
 0x1b9   : > { %v3182_v52 = vpop.f32.mrb[27].mxu0  ;;  %3218 = vmatmul.mubr.msk.f32.gmra.mrb[26].mxu1 %vm665_vm1, %v1004_v51 }
 0x1ba   : > { %3273 = vmatprep.mubr.msk.f32.mxu1 %vm4044_vm0, %v4045_v1 }
 0x1bc   : > { %v1203_v53 = vpop.f32.mrb[28].mxu0 }
 0x1bd   : > { %v3238_v54 = vpop.f32.mrb[29].mxu0  ;;  %3274 = vmatmul.mubr.msk.f32.vlgmr.msra.gmra.mrb[28].mxu1 %vm665_vm1, %v1203_v53 }
 0x1be   : > { %3616 = vmatpush3.bf16.msra.mxu1 %v4499_v47  ;;  %3276 = vmatprep.mubr.msk.f32.mxu1 %vm4044_vm0, %v4045_v1 }
 0x1bf   : > { %3617 = vmatprep.subr.bf16.mxu1 %v4043_v0 }
 0x1c0   : > { %v1208_v56 = vpop.f32.mrb[30].mxu0 }
 0x1c1   : > { %v3241_v57 = vpop.f32.mrb[31].mxu0  ;;  %3277 = vmatmul.mubr.msk.f32.gmra.mrb[30].mxu1 %vm665_vm1, %v1208_v56 }
 0x1c2   : > { %3279 = vmatprep.mubr.msk.f32.mxu1 %vm4044_vm0, %v4045_v1  ;;  %3619 = vmatpush3.bf16.msra.mxu1 %v4505_v49 }
 0x1c3   : > { %3620 = vmatprep.subr.bf16.mxu1 %v4043_v0 }
 0x1c4   : > { %v1213_v58 = vpop.f32.mrb[32].mxu0 }
 0x1c5   : > { %v3244_v59 = vpop.f32.mrb[33].mxu0  ;;  %3280 = vmatmul.mubr.msk.f32.gmra.mrb[32].mxu1 %vm665_vm1, %v1213_v58 }
 0x1c6   : > { %3282 = vmatprep.mubr.msk.f32.mxu1 %vm4044_vm0, %v4045_v1  ;;  %3622 = vmatpush3.bf16.msra.mxu1 %v4525_v55 }
 0x1c7   : > { %3623 = vmatprep.subr.bf16.mxu1 %v4043_v0 }
 0x1c8   : > { %v1218_v60 = vpop.f32.mrb[34].mxu0 }
 0x1c9   : > { %v3247_v62 = vpop.f32.mrb[35].mxu0  ;;  %3283 = vmatmul.mubr.msk.f32.gmra.mrb[34].mxu1 %vm665_vm1, %v1218_v60 }
 0x1ca   : > { %3285 = vmatprep.mubr.msk.f32.mxu1 %vm4044_vm0, %v4045_v1  ;;  %3625 = vmatpush3.bf16.msra.mxu1 %v4543_v61 }
 0x1cb   : > { %3638 = vmatprep.subr.bf16.mxu1 %v4043_v0 }
 0x1cc   : > { %v1223_v63 = vpop.f32.mrb[36].mxu0 }
 0x1cd   : > { %v3250_v3 = vpop.f32.mrb[37].mxu0  ;;  %3286 = vmatmul.mubr.msk.f32.gmra.mrb[36].mxu1 %vm665_vm1, %v1223_v63 }
 0x1ce   : > { %3288 = vmatprep.mubr.msk.f32.mxu1 %vm4044_vm0, %v4045_v1 }
 0x1d0   : > { %v1228_v4 = vpop.f32.mrb[38].mxu0 }
 0x1d1   : > { %v3253_v5 = vpop.f32.mrb[39].mxu0  ;;  %3289 = vmatmul.mubr.msk.f32.gmra.mrb[38].mxu1 %vm665_vm1, %v1228_v4 }
 0x1d2   : > { %3291 = vmatprep.mubr.msk.f32.mxu1 %vm4044_vm0, %v4045_v1 }
 0x1d4   : > { %v1233_v9 = vpop.f32.mrb[40].mxu0 }
 0x1d5   : > { %v3256_v18 = vpop.f32.mrb[41].mxu0  ;;  %3292 = vmatmul.mubr.msk.f32.gmra.mrb[40].mxu1 %vm665_vm1, %v1233_v9 }
 0x1d6   : > { %3347 = vmatprep.mubr.msk.f32.mxu1 %vm4044_vm0, %v4045_v1 }
 0x1d8   : > { %v1432_v19 = vpop.f32.mrb[42].mxu0 }
 0x1d9   : > { %v3312_v23 = vpop.f32.mrb[43].mxu0  ;;  %3348 = vmatmul.mubr.msk.f32.vlgmr.msra.gmra.mrb[42].mxu1 %vm665_vm1, %v1432_v19 }
 0x1da   : > { %3640 = vmatpush3.bf16.msra.mxu1 %v4499_v47  ;;  %3350 = vmatprep.mubr.msk.f32.mxu1 %vm4044_vm0, %v4045_v1 }
 0x1db   : > { %3641 = vmatprep.subr.bf16.mxu1 %v4043_v0 }
 0x1dc   : > { %v1437_v24 = vpop.f32.mrb[44].mxu0 }
 0x1dd   : > { %v3315_v43 = vpop.f32.mrb[45].mxu0  ;;  %3351 = vmatmul.mubr.msk.f32.gmra.mrb[44].mxu1 %vm665_vm1, %v1437_v24 }
 0x1de   : > { %3353 = vmatprep.mubr.msk.f32.mxu1 %vm4044_vm0, %v4045_v1  ;;  %3643 = vmatpush3.bf16.msra.mxu1 %v4505_v49 }
 0x1df   : > { %3644 = vmatprep.subr.bf16.mxu1 %v4043_v0 }
 0x1e0   : > { %v1442_v44 = vpop.f32.mrb[46].mxu0 }
 0x1e1   : > { %v3318_v47 = vpop.f32.mrb[47].mxu0  ;;  %3354 = vmatmul.mubr.msk.f32.gmra.mrb[46].mxu1 %vm665_vm1, %v1442_v44 }
 0x1e2   : > { %3356 = vmatprep.mubr.msk.f32.mxu1 %vm4044_vm0, %v4045_v1  ;;  %3646 = vmatpush3.bf16.msra.mxu1 %v4525_v55 }
 0x1e3   : > { %3647 = vmatprep.subr.bf16.mxu1 %v4043_v0 }
 0x1e4   : > { %v1447_v10 = vpop.f32.mrb[48].mxu0 }
 0x1e5   : > { %v3321_v12 = vpop.f32.mrb[49].mxu0  ;;  %3357 = vmatmul.mubr.msk.f32.gmra.mrb[48].mxu1 %vm665_vm1, %v1447_v10 }
 0x1e6   : > { %3359 = vmatprep.mubr.msk.f32.mxu1 %vm4044_vm0, %v4045_v1  ;;  %3649 = vmatpush3.bf16.msra.mxu1 %v4543_v61 }
 0x1e7   : > { %3667 = vmatprep.subr.bf16.mxu1 %v4843_v45 }
 0x1e8   : > { %v1452_v49 = vpop.f32.mrb[50].mxu0 }
 0x1e9   : > { %v3324_v48 = vpop.f32.mrb[51].mxu0  ;;  %3360 = vmatmul.mubr.msk.f32.gmra.mrb[50].mxu1 %vm665_vm1, %v1452_v49 }
 0x1ea   : > { %3362 = vmatprep.mubr.msk.f32.mxu1 %vm4044_vm0, %v4045_v1 }
 0x1ec   : > { %v1457_v0 = vpop.f32.mrb[52].mxu0 }
 0x1ed   : > { %v3327_v55 = vpop.f32.mrb[53].mxu0  ;;  %3363 = vmatmul.mubr.msk.f32.gmra.mrb[52].mxu1 %vm665_vm1, %v1457_v0 }
 0x1ee   : > { %3365 = vmatprep.mubr.msk.f32.mxu1 %vm4044_vm0, %v4045_v1 }
 0x1f0   : > { %v1462_v13 = vpop.f32.mrb[54].mxu0 }
 0x1f1   : > { %v3330_v61 = vpop.f32.mrb[55].mxu0  ;;  %3366 = vmatmul.mubr.msk.f32.gmra.mrb[54].mxu1 %vm665_vm1, %v1462_v13 }
 0x1f2   : > { %3421 = vmatprep.mubr.msk.f32.mxu1 %vm4044_vm0, %v4045_v1 }
 0x1f4   : > { %v1661_v14 = vpop.f32.mrb[56].mxu0 }
 0x1f5   : > { %v3386_v17 = vpop.f32.mrb[57].mxu0  ;;  %3422 = vmatmul.mubr.msk.f32.vlgmr.msra.gmra.mrb[56].mxu1 %vm665_vm1, %v1661_v14 }
 0x1f6   : > { %3424 = vmatprep.mubr.msk.f32.mxu1 %vm4044_vm0, %v4045_v1  ;;  %3669 = vmatpush3.bf16.msra.mxu1 %v4843_v45 }
 0x1f7   : > { %3671 = vmatprep.subr.bf16.mxu1 %v3670_v11 }
 0x1f8   : > { %v1666_v21 = vpop.f32.mrb[58].mxu0 }
 0x1f9   : > { %v3389_v26 = vpop.f32.mrb[59].mxu0  ;;  %3425 = vmatmul.mubr.msk.f32.gmra.mrb[58].mxu1 %vm665_vm1, %v1666_v21 }
 0x1fa   : > { %3427 = vmatprep.mubr.msk.f32.mxu1 %vm4044_vm0, %v4045_v1  ;;  %3673 = vmatpush3.bf16.msra.mxu1 %v3670_v11 }
 0x1fb   : > { %3675 = vmatprep.subr.bf16.mxu1 %v3674_v20 }
 0x1fc   : > { %v1671_v28 = vpop.f32.mrb[60].mxu0 }
 0x1fd   : > { %v3392_v29 = vpop.f32.mrb[61].mxu0  ;;  %3428 = vmatmul.mubr.msk.f32.gmra.mrb[60].mxu1 %vm665_vm1, %v1671_v28 }
 0x1fe   : > { %3430 = vmatprep.mubr.msk.f32.mxu1 %vm4044_vm0, %v4045_v1  ;;  %3677 = vmatpush3.bf16.msra.mxu1 %v3674_v20 }
 0x1ff   : > { %3679 = vmatprep.subr.bf16.mxu1 %v3678_v27 }
 0x200   : > { %v1676_v30 = vpop.f32.mrb[62].mxu0 }
 0x201   : > { %v3395_v31 = vpop.f32.mrb[63].mxu0  ;;  %3431 = vmatmul.mubr.msk.f32.gmra.mrb[62].mxu1 %vm665_vm1, %v1676_v30 }
 0x202   : > { %3433 = vmatprep.mubr.msk.f32.mxu1 %vm4044_vm0, %v4045_v1  ;;  %3681 = vmatpush3.bf16.msra.mxu1 %v3678_v27 }
 0x203   : > { %3699 = vmatprep.subr.bf16.mxu1 %v4843_v45 }
 0x204   : > { %v1681_v32 = vpop.f32.mrb[64].mxu0 }
 0x205   : > { %v3398_v33 = vpop.f32.mrb[65].mxu0  ;;  %3434 = vmatmul.mubr.msk.f32.gmra.mrb[64].mxu1 %vm665_vm1, %v1681_v32 }
 0x206   : > { %3436 = vmatprep.mubr.msk.f32.mxu1 %vm4044_vm0, %v4045_v1 }
 0x208   : > { %v1686_v34 = vpop.f32.mrb[66].mxu0 }
 0x209   : > { %v3401_v35 = vpop.f32.mrb[67].mxu0  ;;  %3437 = vmatmul.mubr.msk.f32.gmra.mrb[66].mxu1 %vm665_vm1, %v1686_v34 }
 0x20a   : > { %3439 = vmatprep.mubr.msk.f32.mxu1 %vm4044_vm0, %v4045_v1 }
 0x20c   : > { %v1691_v36 = vpop.f32.mrb[68].mxu0 }
 0x20d   : > { %v3404_v37 = vpop.f32.mrb[69].mxu0  ;;  %3440 = vmatmul.mubr.msk.f32.gmra.mrb[68].mxu1 %vm665_vm1, %v1691_v36 }
 0x210   : > { %v3460_v38 = vpop.f32.mrb[70].mxu0 }
 0x211   : > { %v2091_v39 = vpop.f32.mrb[71].mxu0 }
 0x212   : > { %3480 = vmatprep.mubr.msk.f32.mxu1 %vm665_vm1, %v2091_v39 }
 0x213   : > { %3481 = vmatmul.mubr.msk.f32.vlgmr.msra.gmra.mrb[70].mxu1 %vm665_vm1, %v3460_v38 }
 0x214   : > { %v3463_v40 = vpop.f32.mrb[72].mxu0  ;;  %3701 = vmatpush3.bf16.msra.mxu1 %v4843_v45 }
 0x215   : > { %v2101_v41 = vpop.f32.mrb[73].mxu0  ;;  %3703 = vmatprep.subr.bf16.mxu1 %v3670_v11 }
 0x216   : > { %3483 = vmatprep.mubr.msk.f32.mxu1 %vm665_vm1, %v2101_v41 }
 0x217   : > { %3484 = vmatmul.mubr.msk.f32.gmra.mrb[72].mxu1 %vm665_vm1, %v3463_v40 }
 0x218   : > { %3705 = vmatpush3.bf16.msra.mxu1 %v3670_v11 }
 0x219   : > { %3707 = vmatprep.subr.bf16.mxu1 %v3674_v20 }
 0x21c   : > { %3709 = vmatpush3.bf16.msra.mxu1 %v3674_v20 }
 0x21d   : > { %3711 = vmatprep.subr.bf16.mxu1 %v3678_v27 }
 0x220   : > { %3713 = vmatpush3.bf16.msra.mxu1 %v3678_v27  ;;  %v3504_v53 = vpop.f32.mrb[74].mxu0 }
 0x221   : > { %v2273_v56 = vpop.f32.mrb[75].mxu0 }
 0x222   : > { %3524 = vmatprep.mubr.msk.f32.mxu1 %vm665_vm1, %v2273_v56 }
 0x223   : > { %3525 = vmatmul.mubr.msk.f32.vlgmr.msra.gmra.mrb[74].mxu1 %vm665_vm1, %v3504_v53 }
 0x224   : > { %v3507_v58 = vpop.f32.mrb[76].mxu0 }
 0x225   : > { %v2283_v60 = vpop.f32.mrb[77].mxu0 }
 0x226   : > { %3527 = vmatprep.mubr.msk.f32.mxu1 %vm665_vm1, %v2283_v60 }
 0x227   : > { %3528 = vmatmul.mubr.msk.f32.gmra.mrb[76].mxu1 %vm665_vm1, %v3507_v58 }
 0x258   : > { %v874_v1 = vpop.f32.mrb[0].mxu1 }
 0x259   : > { %v3127_v42 = vpop.f32.mrb[1].mxu1  ;;  %v4889_v18 = vmul.f32 %v874_v1, %v874_v1 }
 0x25c   : > { %v879_v46 = vpop.f32.mrb[2].mxu1 }
 0x25d   : > { %v3130_v50 = vpop.f32.mrb[3].mxu1  ;;  %v4899_v2 = vmul.f32 %v879_v46, %v879_v46 }
 0x260   : > { %v884_v51 = vpop.f32.mrb[4].mxu1 }
 0x261   : > { %v3133_v52 = vpop.f32.mrb[5].mxu1  ;;  %v4909_v49 = vmul.f32 %v884_v51, %v884_v51 }
 0x264   : > { %v889_v54 = vpop.f32.mrb[6].mxu1 }
 0x265   : > { %v3136_v57 = vpop.f32.mrb[7].mxu1  ;;  %v1819_v8 = vmul.f32 %v889_v54, %v889_v54 }
 0x268   : > { %v894_v59 = vpop.f32.mrb[8].mxu1 }
 0x269   : > { %v3139_v62 = vpop.f32.mrb[9].mxu1  ;;  %v1820_v17 = vmul.f32 %v894_v59, %v894_v59 }
 0x26c   : > { %v899_v63 = vpop.f32.mrb[10].mxu1 }
 0x26d   : > { %v3142_v3 = vpop.f32.mrb[11].mxu1  ;;  %v1821_v27 = vmul.f32 %v899_v63, %v899_v63 }
 0x270   : > { %v904_v4 = vpop.f32.mrb[12].mxu1 }
 0x271   : > { %v3145_v5 = vpop.f32.mrb[13].mxu1  ;;  %v4928_v33 = vmul.f32 %v904_v4, %v904_v4 }
 0x274   : > { %v1095_v9 = vpop.f32.mrb[14].mxu1 }
 0x275   : > { %v4891_v19 = vmul.f32 %v1095_v9, %v1095_v9  ;;  %v4893_v23 = vmul.f32 %v1095_v9, %v874_v1  ;;  %v3201_v24 = vpop.f32.mrb[15].mxu1 }
 0x277   : > { %v4897_v43 = vadd.f32 %v4891_v19, %v4889_v18 }
 0x278   : > { %v1100_v44 = vpop.f32.mrb[16].mxu1 }
 0x279   : > { %v4901_v6 = vmul.f32 %v1100_v44, %v1100_v44  ;;  %v4903_v47 = vmul.f32 %v1100_v44, %v879_v46  ;;  %v3204_v45 = vpop.f32.mrb[17].mxu1 }
 0x27b   : > { %v4907_v10 = vadd.f32 %v4901_v6, %v4899_v2 }
 0x27c   : > { %v1105_v12 = vpop.f32.mrb[18].mxu1 }
 0x27d   : > { %v1825_v48 = vmul.f32 %v1105_v12, %v1105_v12  ;;  %v4911_v0 = vmul.f32 %v1105_v12, %v884_v51  ;;  %v3207_v55 = vpop.f32.mrb[19].mxu1 }
 0x27f   : > { %v4914_v13 = vadd.f32 %v1825_v48, %v4909_v49 }
 0x280   : > { %v1110_v7 = vpop.f32.mrb[20].mxu1 }
 0x281   : > { %v1826_v61 = vmul.f32 %v1110_v7, %v1110_v7  ;;  %v4916_v11 = vmul.f32 %v1110_v7, %v889_v54  ;;  %v3210_v14 = vpop.f32.mrb[21].mxu1 }
 0x283   : > { %v4918_v15 = vadd.f32 %v1826_v61, %v1819_v8 }
 0x284   : > { %v1115_v16 = vpop.f32.mrb[22].mxu1 }
 0x285   : > { %v1827_v20 = vmul.f32 %v1115_v16, %v1115_v16  ;;  %v4920_v21 = vmul.f32 %v1115_v16, %v894_v59  ;;  %v3213_v22 = vpop.f32.mrb[23].mxu1 }
 0x287   : > { %v4922_v25 = vadd.f32 %v1827_v20, %v1820_v17 }
 0x288   : > { %v1120_v26 = vpop.f32.mrb[24].mxu1 }
 0x289   : > { %v1828_v28 = vmul.f32 %v1120_v26, %v1120_v26  ;;  %v4924_v29 = vmul.f32 %v1120_v26, %v899_v63  ;;  %v3216_v30 = vpop.f32.mrb[25].mxu1 }
 0x28b   : > { %v4926_v31 = vadd.f32 %v1828_v28, %v1821_v27 }
 0x28c   : > { %v1125_v32 = vpop.f32.mrb[26].mxu1 }
 0x28d   : > { %v4930_v34 = vmul.f32 %v1125_v32, %v1125_v32  ;;  %v4932_v35 = vmul.f32 %v1125_v32, %v904_v4  ;;  %v3219_v36 = vpop.f32.mrb[27].mxu1 }
 0x28f   : > { %v4936_v37 = vadd.f32 %v4930_v34, %v4928_v33 }
 0x290   : > { %v1324_v38 = vpop.f32.mrb[28].mxu1 }
 0x291   : > { %v1837_v39 = vsub.f32 %v1324_v38, %v4889_v18  ;;  %v3275_v40 = vpop.f32.mrb[29].mxu1 }
 0x294   : > { %v1329_v41 = vpop.f32.mrb[30].mxu1 }
 0x295   : > { %v1838_v1 = vsub.f32 %v1329_v41, %v4899_v2  ;;  %v3278_v42 = vpop.f32.mrb[31].mxu1 }
 0x298   : > { %v1334_v46 = vpop.f32.mrb[32].mxu1 }
 0x299   : > { %v1839_v50 = vsub.f32 %v1334_v46, %v4909_v49  ;;  %v3281_v51 = vpop.f32.mrb[33].mxu1 }
 0x29c   : > { %v1339_v52 = vpop.f32.mrb[34].mxu1 }
 0x29d   : > { %v1840_v53 = vsub.f32 %v1339_v52, %v1819_v8  ;;  %v3284_v54 = vpop.f32.mrb[35].mxu1  ;;  %v1901_v52 = vmul.f32 2.0, %v4893_v23 }
 0x2a0   : > { %v1344_v56 = vpop.f32.mrb[36].mxu1 }
 0x2a1   : > { %v1841_v57 = vsub.f32 %v1344_v56, %v1820_v17  ;;  %v3287_v58 = vpop.f32.mrb[37].mxu1 }
 0x2a4   : > { %v1349_v59 = vpop.f32.mrb[38].mxu1 }
 0x2a5   : > { %v1842_v60 = vsub.f32 %v1349_v59, %v1821_v27  ;;  %v3290_v62 = vpop.f32.mrb[39].mxu1  ;;  %v4944_v27 = vstv %s2785_s3 }
 0x2a8   : > { %v1354_v63 = vpop.f32.mrb[40].mxu1 }
 0x2a9   : > { %v1843_v3 = vsub.f32 %v1354_v63, %v4928_v33  ;;  %v3293_v4 = vpop.f32.mrb[41].mxu1  ;;  %v4946_v33 = vstv %s632_s19 }
 0x2aa   : > { %v1931_v42 = vadd.f32 %v4907_v10, %v4946_v33  ;;  %v1909_v62 = vadd.f32 %v4946_v33, %v1901_v52 }
 0x2ac   : > { %v1553_v5 = vpop.f32.mrb[42].mxu1 }
 0x2ad   : > { %v1844_v9 = vsub.f32 %v1553_v5, %v4891_v19  ;;  %v3349_v18 = vpop.f32.mrb[43].mxu1 }
 0x2af   : > { %v1873_v24 = vadd.f32 %v1844_v9, %v1837_v39  ;;  %v1930_v39 = vadd.f32 %v4897_v43, %v4946_v33 }
 0x2b0   : > { %v1558_v44 = vpop.f32.mrb[44].mxu1 }
 0x2b1   : > { %v1845_v2 = vsub.f32 %v1558_v44, %v4901_v6  ;;  %v3352_v45 = vpop.f32.mrb[45].mxu1  ;;  %v1880_v6 = vadd.f32 %v1873_v24, %v4944_v27 }
 0x2b2   : > { %v1934_v45 = vadd.f32 %v4922_v25, %v4946_v33 }
 0x2b3   : > { %v1874_v12 = vadd.f32 %v1845_v2, %v1838_v1  ;;  %3832 = vrcp.f32 %v1880_v6  ;;  %v1903_v2 = vmul.f32 2.0, %v4911_v0  ;;  %v1935_v6 = vadd.f32 %v4926_v31, %v4946_v33 }
 0x2b4   : > { %v1563_v49 = vpop.f32.mrb[46].mxu1  ;;  %3834 = vrcp.f32 %v1930_v39 }
 0x2b5   : > { %v1846_v55 = vsub.f32 %v1563_v49, %v1825_v48  ;;  %v3355_v7 = vpop.f32.mrb[47].mxu1 }
 0x2b6   : > { %v1904_v7 = vmul.f32 2.0, %v4916_v11 }
 0x2b7   : > { %v1875_v8 = vadd.f32 %v1846_v55, %v1839_v50 }
 0x2b8   : > { %v1568_v14 = vpop.f32.mrb[48].mxu1 }
 0x2b9   : > { %v1847_v16 = vsub.f32 %v1568_v14, %v1826_v61  ;;  %v3358_v17 = vpop.f32.mrb[49].mxu1  ;;  %v1881_v61 = vadd.f32 %v1874_v12, %v4944_v27 }
 0x2bb   : > { %v1876_v22 = vadd.f32 %v1847_v16, %v1840_v53  ;;  %3836 = vrcp.f32 %v1881_v61  ;;  %v1932_v53 = vadd.f32 %v4914_v13, %v4946_v33  ;;  %v1905_v61 = vmul.f32 2.0, %v4920_v21 }
 0x2bc   : > { %v1573_v26 = vpop.f32.mrb[50].mxu1  ;;  %3838 = vrcp.f32 %v1931_v42 }
 0x2bd   : > { %v1848_v19 = vsub.f32 %v1573_v26, %v1827_v20  ;;  %v3361_v30 = vpop.f32.mrb[51].mxu1  ;;  %v1883_v54 = vadd.f32 %v1876_v22, %v4944_v27  ;;  %v3833_v59 = vpop.eup %3832 }
 0x2be   : > { %v3835_v5 = vpop.eup %3834 }
 0x2bf   : > { %v1877_v32 = vadd.f32 %v1848_v19, %v1841_v57 }
 0x2c0   : > { %v1578_v36 = vpop.f32.mrb[52].mxu1 }
 0x2c1   : > { %v1849_v38 = vsub.f32 %v1578_v36, %v1828_v28  ;;  %v3364_v48 = vpop.f32.mrb[53].mxu1  ;;  %v1882_v28 = vadd.f32 %v1875_v8, %v4944_v27 }
 0x2c3   : > { %v1878_v40 = vadd.f32 %v1849_v38, %v1842_v60  ;;  %3840 = vrcp.f32 %v1882_v28  ;;  %v1902_v60 = vmul.f32 2.0, %v4903_v47 }
 0x2c4   : > { %v1583_v41 = vpop.f32.mrb[54].mxu1  ;;  %3842 = vrcp.f32 %v1932_v53 }
 0x2c5   : > { %v1850_v1 = vsub.f32 %v1583_v41, %v4930_v34  ;;  %v3367_v20 = vpop.f32.mrb[55].mxu1  ;;  %3844 = vrcp.f32 %v1883_v54  ;;  %v3837_v44 = vpop.eup %3836  ;;  %v1885_v8 = vadd.f32 %v1878_v40, %v4944_v27  ;;  %v1912_v40 = vadd.f32 %v4946_v33, %v1904_v7 }
 0x2c6   : > { %v3839_v17 = vpop.eup %3838  ;;  %v1907_v7 = vmul.f32 2.0, %v4932_v35 }
 0x2c7   : > { %v1879_v46 = vadd.f32 %v1850_v1, %v1843_v3  ;;  %v1884_v3 = vadd.f32 %v1877_v32, %v4944_v27  ;;  %v1911_v32 = vadd.f32 %v4946_v33, %v1903_v2 }
 0x2c8   : > { %v1782_v50 = vpop.f32.mrb[56].mxu1 }
 0x2c9   : > { %v1851_v51 = vsub.f32 %v1782_v50, %v4893_v23  ;;  %v3423_v43 = vpop.f32.mrb[57].mxu1  ;;  %v1933_v23 = vadd.f32 %v4918_v15, %v4946_v33  ;;  %v1910_v15 = vadd.f32 %v4946_v33, %v1902_v60 }
 0x2cb   : > { %v1858_v34 = vmul.f32 2.0, %v1851_v51  ;;  %3846 = vrcp.f32 %v1933_v23 }
 0x2cc   : > { %v1787_v56 = vpop.f32.mrb[58].mxu1  ;;  %3848 = vrcp.f32 %v1884_v3  ;;  %v1906_v3 = vmul.f32 2.0, %v4924_v29 }
 0x2cd   : > { %v1866_v10 = vadd.f32 %v4944_v27, %v1858_v34  ;;  %v1852_v57 = vsub.f32 %v1787_v56, %v4903_v47  ;;  %v3426_v58 = vpop.f32.mrb[59].mxu1  ;;  %v3841_v30 = vpop.eup %3840  ;;  %3850 = vrcp.f32 %v1934_v45 }
 0x2ce   : > { %3852 = vrcp.f32 %v1885_v8  ;;  %v3843_v1 = vpop.eup %3842 }
 0x2cf   : > { %v1894_v13 = vmul.f32 %v3833_v59, %v1866_v10  ;;  %v1859_v63 = vmul.f32 2.0, %v1852_v57  ;;  %v3845_v51 = vpop.eup %3844  ;;  %3854 = vrcp.f32 %v1935_v6  ;;  %v1936_v57 = vadd.f32 %v4936_v37, %v4946_v33 }
 0x2d0   : > { %v1792_v4 = vpop.f32.mrb[60].mxu1  ;;  %v1915_v6 = vadd.f32 %v4946_v33, %v1907_v7 }
 0x2d1   : > { %v1916_v9 = vmul.f32 %v1909_v62, %v1894_v13  ;;  %v1867_v18 = vadd.f32 %v4944_v27, %v1859_v63  ;;  %v1853_v24 = vsub.f32 %v1792_v4, %v4911_v0  ;;  %v3429_v47 = vpop.f32.mrb[61].mxu1  ;;  %v1977_v14 = vsel %vm1951_vm2, %v1894_v13, 0.0 }
 0x2d2   : > { %v1913_v63 = vadd.f32 %v4946_v33, %v1905_v61 }
 0x2d3   : > { %v1944_v12 = vmul.f32 %v3835_v5, %v1916_v9  ;;  %v1895_v49 = vmul.f32 %v3837_v44, %v1867_v18  ;;  %v1860_v55 = vmul.f32 2.0, %v1853_v24 }
 0x2d4   : > { %v1797_v16 = vpop.f32.mrb[62].mxu1 }
 0x2d5   : > { %v1917_v22 = vmul.f32 %v1910_v15, %v1895_v49  ;;  %v1978_v26 = vsel %vm1951_vm2, %v1895_v49, 0.0  ;;  %v1868_v0 = vadd.f32 %v4944_v27, %v1860_v55  ;;  %v1854_v19 = vsub.f32 %v1797_v16, %v4916_v11  ;;  %v3432_v25 = vpop.f32.mrb[63].mxu1  ;;  %v3847_v10 = vpop.eup %3846 }
 0x2d6   : > { %v1979_v36 = vadd.f32 %v1978_v26, %v1977_v14  ;;  %v1886_v11 = vadd.f32 %v1879_v46, %v4944_v27  ;;  %v1952_v52 = vsel %vm1951_vm2, %v1944_v12, 0.0  ;;  %v3849_v13 = vpop.eup %3848  ;;  %v1914_v55 = vadd.f32 %v4946_v33, %v1906_v3 }
 0x2d7   : > { %v1945_v38 = vmul.f32 %v3839_v17, %v1917_v22  ;;  %v1896_v48 = vmul.f32 %v3841_v30, %v1868_v0  ;;  %v1861_v39 = vmul.f32 2.0, %v1854_v19  ;;  %v3851_v44 = vpop.eup %3850 }
 0x2d8   : > { %v1802_v41 = vpop.f32.mrb[64].mxu1  ;;  %3856 = vrcp.f32 %v1886_v11  ;;  %v3853_v49 = vpop.eup %3852 }
 0x2d9   : > { %v1918_v20 = vmul.f32 %v1911_v32, %v1896_v48  ;;  %v1980_v42 = vsel %vm1951_vm2, %v1896_v48, 0.0  ;;  %v1869_v31 = vadd.f32 %v4944_v27, %v1861_v39  ;;  %v1855_v28 = vsub.f32 %v1802_v41, %v4920_v21  ;;  %v3435_v50 = vpop.f32.mrb[65].mxu1  ;;  %v3855_v0 = vpop.eup %3854 }
 0x2da   : > { %v1981_v43 = vadd.f32 %v1980_v42, %v1979_v36  ;;  %v1953_v53 = vsel %vm1951_vm2, %v1945_v38, 0.0  ;;  %3858 = vrcp.f32 %v1936_v57 }
 0x2db   : > { %v1946_v46 = vmul.f32 %v3843_v1, %v1918_v20  ;;  %v1897_v34 = vmul.f32 %v3845_v51, %v1869_v31  ;;  %v1862_v54 = vmul.f32 2.0, %v1855_v28  ;;  %v1954_v56 = vadd.f32 %v1953_v53, %v1952_v52 }
 0x2dc   : > { %v1807_v21 = vpop.f32.mrb[66].mxu1 }
 0x2dd   : > { %v1919_v58 = vmul.f32 %v1912_v40, %v1897_v34  ;;  %v1982_v59 = vsel %vm1951_vm2, %v1897_v34, 0.0  ;;  %v1870_v60 = vadd.f32 %v4944_v27, %v1862_v54  ;;  %v1856_v23 = vsub.f32 %v1807_v21, %v4924_v29  ;;  %v3438_v62 = vpop.f32.mrb[67].mxu1 }
 0x2de   : > { %v1955_v37 = vsel %vm1951_vm2, %v1946_v46, 0.0  ;;  %v1983_v4 = vadd.f32 %v1982_v59, %v1981_v43 }
 0x2df   : > { %v1898_v5 = vmul.f32 %v3849_v13, %v1870_v60  ;;  %v1863_v9 = vmul.f32 2.0, %v1856_v23  ;;  %v1947_v18 = vmul.f32 %v3847_v10, %v1919_v58  ;;  %v1956_v24 = vadd.f32 %v1955_v37, %v1954_v56 }
 0x2e0   : > { %v1812_v47 = vpop.f32.mrb[68].mxu1 }
 0x2e1   : > { %v1920_v15 = vmul.f32 %v1913_v63, %v1898_v5  ;;  %v1871_v2 = vadd.f32 %v4944_v27, %v1863_v9  ;;  %v1857_v45 = vsub.f32 %v1812_v47, %v4932_v35  ;;  %v3441_v29 = vpop.f32.mrb[69].mxu1  ;;  %v1957_v12 = vsel %vm1951_vm2, %v1947_v18, 0.0 }
 0x2e2   : > { %v1958_v8 = vadd.f32 %v1957_v12, %v1956_v24  ;;  %v1984_v14 = vsel %vm1951_vm2, %v1898_v5, 0.0  ;;  %v3857_v32 = vpop.eup %3856 }
 0x2e3   : > { %v1899_v16 = vmul.f32 %v3853_v49, %v1871_v2  ;;  %v1864_v17 = vmul.f32 2.0, %v1857_v45  ;;  %v1948_v22 = vmul.f32 %v3851_v44, %v1920_v15  ;;  %v1985_v26 = vadd.f32 %v1984_v14, %v1983_v4 }
 0x2e4   : > { %v3859_v28 = vpop.eup %3858 }
 0x2e5   : > { %v1872_v19 = vadd.f32 %v4944_v27, %v1864_v17  ;;  %v1921_v35 = vmul.f32 %v1914_v55, %v1899_v16  ;;  %v1959_v25 = vsel %vm1951_vm2, %v1948_v22, 0.0  ;;  %v1986_v30 = vsel %vm1951_vm2, %v1899_v16, 0.0 }
 0x2e6   : > { %v3482_v36 = vpop.f32.mrb[70].mxu1  ;;  %v1960_v38 = vadd.f32 %v1959_v25, %v1958_v8  ;;  %v1987_v48 = vadd.f32 %v1986_v30, %v1985_v26 }
 0x2e7   : > { %v1900_v39 = vmul.f32 %v3857_v32, %v1872_v19  ;;  %2391 = vst.msk [vmem:[%s5015_s8 + $0x8] sm:$0xff] %vm2389_vm3, %v3482_v36  ;;  %v2417_v40 = vsel %vm2389_vm3, %v3482_v36, inf  ;;  %v2188_v27 = vpop.f32.mrb[71].mxu1  ;;  %v1949_v61 = vmul.f32 %v3855_v0, %v1921_v35  ;;  %v2399_v11 = vsel %vm2389_vm3, %v3482_v36, -inf }
 0x2e8   : > { %2390 = vst.msk [vmem:[%s5015_s8] sm:$0xff] %vm2389_vm3, %v2188_v27  ;;  %v2416_v41 = vsel %vm2389_vm3, %v2188_v27, inf  ;;  %v2398_v33 = vsel %vm2389_vm3, %v2188_v27, -inf }
 0x2e9   : > { %v1922_v1 = vmul.f32 %v1915_v6, %v1900_v39  ;;  %v1961_v20 = vsel %vm1951_vm2, %v1949_v61, 0.0  ;;  %v2402_v42 = vmax.f32 %v2398_v33, %v2399_v11  ;;  %v1988_v31 = vsel %vm1963_vm4, %v1900_v39, 0.0 }
 0x2ea   : > { %v3485_v50 = vpop.f32.mrb[72].mxu1  ;;  %v1962_v51 = vadd.f32 %v1961_v20, %v1960_v38  ;;  %v1989_v43 = vadd.f32 %v1988_v31, %v1987_v48  ;;  %v2420_v52 = vmin.f32 %v2416_v41, %v2417_v40 }
 0x2eb   : > { %2393 = vst.msk [vmem:[%s5015_s8 + $0x18] sm:$0xff] %vm2389_vm3, %v3485_v50  ;;  %v2419_v53 = vsel %vm2389_vm3, %v3485_v50, inf  ;;  %v2198_v46 = vpop.f32.mrb[73].mxu1  ;;  %v1950_v34 = vmul.f32 %v3859_v28, %v1922_v1  ;;  %v2401_v54 = vsel %vm2389_vm3, %v3485_v50, -inf }
 0x2ec   : > { %2392 = vst.msk [vmem:[%s5015_s8 + $0x10] sm:$0xff] %vm2389_vm3, %v2198_v46  ;;  %v2418_v56 = vsel %vm2389_vm3, %v2198_v46, inf  ;;  %v2400_v10 = vsel %vm2389_vm3, %v2198_v46, -inf  ;;  %s622_s8 = scalar_lea.vmem %s5141_s14, %s5160_s10 }
 0x2ed   : > { %v1964_v57 = vsel %vm1963_vm4, %v1950_v34, 0.0  ;;  %v2403_v21 = vmax.f32 %v2400_v10, %v2401_v54  ;;  %v2421_v58 = vmin.f32 %v2418_v56, %v2419_v53 }
 0x2ee   : > { %v1965_v59 = vadd.f32 %v1964_v57, %v1962_v51 }
 0x2ef   : > { %v2404_v60 = vmax.f32 %v2402_v42, %v2403_v21  ;;  %v2422_v23 = vmin.f32 %v2420_v52, %v2421_v58 }
 0x2f0   : > { %1966 = vadd.xlane.f32.xlu0 %v1965_v59 }
 0x2f1   : > { %2405 = vmax.xlane.f32.xlu1 %v2404_v60 }
 0x2f4   : > { %1990 = vadd.xlane.f32.xlu0 %v1989_v43 }
 0x2f5   : > { %2423 = vmin.xlane.f32.xlu1 %v2422_v23 }
 0x2f6   : > { %v3526_v62 = vpop.f32.mrb[74].mxu1 }
 0x2f7   : > { %2395 = vst.msk [vmem:[%s617_s21 + $0x8] sm:$0xff] %vm2389_vm3, %v3526_v62  ;;  %v2370_v13 = vpop.f32.mrb[75].mxu1 }
 0x2f8   : > { %2394 = vst.msk [vmem:[%s617_s21] sm:$0xff] %vm2389_vm3, %v2370_v13 }
 0x2fa   : > { %v3529_v63 = vpop.f32.mrb[76].mxu1 }
 0x2fb   : > { %2397 = vst.msk [vmem:[%s617_s21 + $0x18] sm:$0xff] %vm2389_vm3, %v3529_v63  ;;  %v2380_v3 = vpop.f32.mrb[77].mxu1 }
 0x2fc   : > { %2396 = vst.msk [vmem:[%s617_s21 + $0x10] sm:$0xff] %vm2389_vm3, %v2380_v3 }
 0x37d   : > { %v1967_v37 = vpop.xlane.xlu0 %1966 }
 0x37e   : > { %v1968_v4 = vrot.slane %v1967_v37, 4  ;;  %v2406_v5 = vpop.xlane.xlu1 %2405 }
 0x37f   : > { %v2407_v9 = vrot.slane %v2406_v5, 4 }
 0x380   : > { %v1969_v18 = vadd.f32 %v1968_v4, %v1967_v37 }
 0x381   : > { %v2408_v24 = vmax.f32 %v2406_v5, %v2407_v9  ;;  %v1991_v47 = vpop.xlane.xlu0 %1990 }
 0x382   : > { %v1970_v44 = vrot.slane %v1969_v18, 2  ;;  %v1992_v15 = vrot.slane %v1991_v47, 4  ;;  %v2424_v2 = vpop.xlane.xlu1 %2423 }
 0x383   : > { %v2409_v45 = vrot.slane %v2408_v24, 2  ;;  %v2425_v29 = vrot.slane %v2424_v2, 4 }
 0x384   : > { %v1993_v12 = vadd.f32 %v1992_v15, %v1991_v47  ;;  %v1971_v49 = vadd.f32 %v1970_v44, %v1969_v18 }
 0x385   : > { %v2426_v55 = vmin.f32 %v2424_v2, %v2425_v29  ;;  %v2410_v7 = vmax.f32 %v2408_v24, %v2409_v45 }
 0x386   : > { %v1994_v8 = vrot.slane %v1993_v12, 2  ;;  %v1972_v14 = vrot.slane %v1971_v49, 1 }
 0x387   : > { %v2427_v16 = vrot.slane %v2426_v55, 2  ;;  %v2411_v0 = vrot.slane %v2410_v7, 1 }
 0x388   : > { %v1995_v17 = vadd.f32 %v1994_v8, %v1993_v12  ;;  %v1973_v22 = vadd.f32 %v1972_v14, %v1971_v49 }
 0x389   : > { %v2428_v26 = vmin.f32 %v2426_v55, %v2427_v16  ;;  %v2412_v30 = vmax.f32 %v2410_v7, %v2411_v0 }
 0x38a   : > { %3717 = vpush %v1973_v22  ;;  %v1996_v19 = vrot.slane %v1995_v17, 1 }
 0x38b   : > { %v2429_v35 = vrot.slane %v2428_v26, 1 }
 0x38c   : > { %v1997_v25 = vadd.f32 %v1996_v19, %v1995_v17 }
 0x38d   : > { %v2430_v32 = vmin.f32 %v2428_v26, %v2429_v35 }
 0x38e   : > { %3719 = vpush %v1997_v25 }
 0x38f   : > { %3721 = vpush %v2412_v30 }
 0x390   : > { %3723 = vpush %v2430_v32 }
 0x3bb   : > { %s3718_s3 = spop %3717 }
 0x3bc   : > { %v1975_v6 = vstv %s3718_s3 }
 0x3bd   : > { %1976 = vst [vmem:[%s590_s20] sm:$0x1] %v1975_v6 }
 0x3bf   : > { %s3720_s30 = spop %3719 }
 0x3c0   : > { %v1999_v36 = vstv %s3720_s30  ;;  %s3722_s24 = spop %3721 }
 0x3c1   : > { %2000 = vst [vmem:[%s597_s6] sm:$0x1] %v1999_v36  ;;  %v2414_v38 = vstv %s3722_s24  ;;  %s3724_s21 = spop %3723 }
 0x3c2   : > { %2415 = vst [vmem:[%s622_s8] sm:$0x1] %v2414_v38  ;;  %v2432_v48 = vstv %s3724_s21 }
 0x3c3   : > { %2433 = vst [vmem:[%s629_s0] sm:$0x1] %v2432_v48 }
 0x3c4 PF: > { %s5143_s9 = sld [smem:[#allocation12_spill]]  ;;  %s5144_s17 = sld [smem:[#allocation13_spill]] }
 0x3c5   : > { %s5145_s12 = sld [smem:[#allocation14_spill]]  ;;  %s5146_s21 = smov %s4011_s22 }
 0x3c6   : > { %s5147_s22 = smov %s4015_s23  ;;  %s5148_s23 = smov %s4254_s15 }
 0x3c7   : > { %s5149_s24 = smov %s4027_s26  ;;  %s5150_s25 = smov %s4031_s27 }
 0x3ca   : > { %s28_s28 = sadd.s32 1, %s5143_s9   ;;  %s5151_s26 = smov %s5144_s17 }
 0x3cb   : > { %p25_p2 = scmp.ge.s32.totalorder %s28_s28, 8   ;;  %s5152_s27 = smov %s5145_s12 }
 0x3cd   :  { %27 = sbr.rel (!%p25_p2) target bundleno = 17 (0x11), region = 164 }
 0x3d4   :  { %2559 = vsyncpa [#allocation3], 1 }
 0x3d5   :  { %2561 = vsyncpa [#allocation3 + $0x1], 1 }
 0x3d6   :  { %2562 = vsyncpa [#allocation7], 1 }
 0x3d7   :  { %2563 = vsyncpa [#allocation4], 1 }
 0x3d8   :  { %2565 = vsyncpa [#allocation4 + $0x1], 1 }

</bundles_post_ra>
